<compile_context>
chip_gen: v7x
topology: tpu7x:2x2x1
jax: 0.10.0
libtpu: 0.0.40
codegen_flags: <defaults>
</compile_context>

<pallas_src>
import jax
import jax.numpy as jnp
import numpy as np
from jax import lax
from jax.experimental import pallas as pl
from jax.experimental.pallas import tpu as pltpu


# ------------------------------ fused Pallas kernel ------------------------------ #

def _basicblock_kernel(x_ref, w1_ref, s1_ref, b1_ref, w2_ref, s2_ref, b2_ref, o_ref):
    """Fused BasicBlock, one full image per grid step.

    x_ref  : (1, H, W, C) f32  unpadded NHWC image (also the identity branch)
    w1/w2  : (9, C, C)    bf16 conv taps, index = dh*3 + dw, layout [tap, cin, cout]
    s1/s2  : (1, C)       f32  BN scale  gamma / sqrt(var + eps)
    b1/b2  : (1, C)       f32  BN bias   beta - mean * scale
    o_ref  : (1, H, W, C) f32  output
    """
    _, H, W, C = o_ref.shape

    x = x_ref[0]                                              # (H, W, C) f32
    zrow = jnp.zeros((1, W, C), jnp.float32)
    col = lax.broadcasted_iota(jnp.int32, (1, W, 1), 1)       # column index (sublane axis)

    def conv3x3(act_f32, w_ref):
        # act_f32: (H, W, C) f32 -> (H*W, C) f32, 3x3 "same" conv with zero padding.
        # Zero halo rows: one small row-concat (copies the slab once).
        slab = jnp.concatenate([zrow, act_f32, zrow], axis=0)             # (H+2, W, C)
        # Zero halo columns + dw shifts: XLU roll + column mask (no (W+2)-wide buffer,
        # no unaligned sublane slices).  pltpu.roll matches jnp.roll: positive shift
        # moves data to higher column index.
        left = jnp.where(col > 0, pltpu.roll(slab, 1, 1), 0.0)            # x[:, j-1]
        right = jnp.where(col < W - 1, pltpu.roll(slab, W - 1, 1), 0.0)   # x[:, j+1]
        shifted = tuple(a.astype(jnp.bfloat16) for a in (left, slab, right))

        # 9 accumulating K=C matmuls; the dh row shifts are free leading-dim views,
        # so no (M, 9C) im2col buffer is ever materialized.
        acc = None
        for dh in range(3):
            for dw in range(3):
                lhs = shifted[dw][dh:dh + H].reshape(H * W, C)
                p = jnp.dot(lhs, w_ref[dh * 3 + dw],
                            preferred_element_type=jnp.float32)
                acc = p if acc is None else acc + p
        return acc                                                        # (H*W, C) f32

    # conv1 + bn1 + relu  (BN affine applied in f32 after accumulation)
    t1 = conv3x3(x, w1_ref)
    t1 = jnp.maximum(t1 * s1_ref[...] + b1_ref[...], 0.0)

    # conv2 + bn2 + exact-f32 identity add + relu
    y = conv3x3(t1.reshape(H, W, C), w2_ref)
    y = y * s2_ref[...] + b2_ref[...] + x.reshape(H * W, C)
    o_ref[...] = jnp.maximum(y, 0.0).reshape(1, H, W, C)


# ------------------------------ wrappers ------------------------------ #

def basicblock_forward_nhwc(x_nhwc, params):
    """BasicBlock forward on an NHWC f32 activation. stride=1, downsample=None."""
    N, H, W, C = x_nhwc.shape
    assert params["w1"].shape == (9, C, C), "identity shortcut needs inplanes == planes"
    assert C % 128 == 0 and W % 8 == 0, "lane/sublane-dense layout expects C%128==0, W%8==0"

    flops = 2 * (2 * N * H * W * 9 * C * C)                    # two 3x3 convs
    bytes_accessed = (2 * N * H * W * C * 4                    # input + output (f32)
                      + 2 * 9 * C * C * 2                      # bf16 conv weights
                      + 4 * C * 4)                             # BN scales / biases

    return pl.pallas_call(
        _basicblock_kernel,
        out_shape=jax.ShapeDtypeStruct((N, H, W, C), jnp.float32),
        grid=(N,),
        in_specs=[
            pl.BlockSpec((1, H, W, C), lambda n: (n, 0, 0, 0)),   # one image per step
            pl.BlockSpec((9, C, C), lambda n: (0, 0, 0)),
            pl.BlockSpec((1, C), lambda n: (0, 0)),
            pl.BlockSpec((1, C), lambda n: (0, 0)),
            pl.BlockSpec((9, C, C), lambda n: (0, 0, 0)),
            pl.BlockSpec((1, C), lambda n: (0, 0)),
            pl.BlockSpec((1, C), lambda n: (0, 0)),
        ],
        out_specs=pl.BlockSpec((1, H, W, C), lambda n: (n, 0, 0, 0)),
        compiler_params=pltpu.CompilerParams(
            dimension_semantics=("parallel",),                 # megacore splits over batch
            vmem_limit_bytes=32 * 1024 * 1024),
        cost_estimate=pl.CostEstimate(flops=flops, transcendentals=0,
                                      bytes_accessed=bytes_accessed),
    )(x_nhwc, params["w1"], params["s1"], params["b1"],
      params["w2"], params["s2"], params["b2"])


def basicblock_forward(x_nchw, params):
    """PyTorch-parity entry point (NCHW in / NCHW out). One transpose copy each way."""
    x = jnp.transpose(x_nchw, (0, 2, 3, 1))
    out = basicblock_forward_nhwc(x, params)
    return jnp.transpose(out, (0, 3, 1, 2))


# ------------------------------ reference (pure JAX) ------------------------------ #

def basicblock_reference(x, p):
    dn = ("NCHW", "OIHW", "NCHW")
    eps = 1e-5

    def bn(y, g, b, m, v):
        s = g / jnp.sqrt(v + eps)
        return y * s[None, :, None, None] + (b - m * s)[None, :, None, None]

    y = lax.conv_general_dilated(x, p["w1_t"], (1, 1), ((1, 1), (1, 1)),
                                 dimension_numbers=dn)
    y = jnp.maximum(bn(y, p["g1"], p["be1"], p["m1"], p["v1"]), 0.0)
    y = lax.conv_general_dilated(y, p["w2_t"], (1, 1), ((1, 1), (1, 1)),
                                 dimension_numbers=dn)
    y = bn(y, p["g2"], p["be2"], p["m2"], p["v2"])
    return jnp.maximum(y + x, 0.0)


# ------------------------------ parameter setup ------------------------------ #

def make_params(planes, key):
    """Random conv weights + eval-mode BN stats; kernel-layout weights in bf16,
    BN scale/bias kept in f32 (applied in-kernel after the f32 accumulation)."""
    eps = 1e-5
    ks = jax.random.split(key, 10)
    wscale = (2.0 / (9 * planes)) ** 0.5                       # He-style init

    def bn_params(kk, c):
        g = 1.0 + 0.1 * jax.random.normal(kk[0], (c,), jnp.float32)
        b = 0.1 * jax.random.normal(kk[1], (c,), jnp.float32)
        m = 0.1 * jax.random.normal(kk[2], (c,), jnp.float32)
        v = jnp.abs(jax.random.normal(kk[3], (c,), jnp.float32)) + 0.5
        return g, b, m, v

    w1_t = wscale * jax.random.normal(ks[0], (planes, planes, 3, 3), jnp.float32)  # OIHW
    w2_t = wscale * jax.random.normal(ks[1], (planes, planes, 3, 3), jnp.float32)
    g1, be1, m1, v1 = bn_params(ks[2:6], planes)
    g2, be2, m2, v2 = bn_params(ks[6:10], planes)

    def prep(w_t, g, b, m, v):
        # (Cout, Cin, kh, kw) -> (kh*kw, Cin, Cout); tap index = dh*3 + dw.
        w9 = jnp.transpose(w_t, (2, 3, 1, 0)).reshape(9, w_t.shape[1], w_t.shape[0])
        s = g / jnp.sqrt(v + eps)
        return (w9.astype(jnp.bfloat16),
                s.reshape(1, -1).astype(jnp.float32),
                (b - m * s).reshape(1, -1).astype(jnp.float32))

    w1, s1, b1 = prep(w1_t, g1, be1, m1, v1)
    w2, s2, b2 = prep(w2_t, g2, be2, m2, v2)

    return {
        # kernel-layout params
        "w1": w1, "s1": s1, "b1": b1, "w2": w2, "s2": s2, "b2": b2,
        # torch-layout weights + raw BN stats (for the reference)
        "w1_t": w1_t, "w2_t": w2_t,
        "g1": g1, "be1": be1, "m1": m1, "v1": v1,
        "g2": g2, "be2": be2, "m2": m2, "v2": v2,
    }


# ------------------------------ main ------------------------------ #

if __name__ == "__main__":
    # BasicBlock(inplanes=128, planes=128), norm_layer = eval-mode BatchNorm2d,
    # act_layer = ReLU, stride=1, downsample=None (identity shortcut).
    N, planes, H, W = 2, 128, 16, 16

    key = jax.random.PRNGKey(0)
    kx, kp = jax.random.split(key)
    x = jax.random.normal(kx, (N, planes, H, W), jnp.float32)   # PyTorch NCHW input
    params = make_params(planes, key=kp)

    out = jax.block_until_ready(basicblock_forward(x, params))
    ref = jax.block_until_ready(basicblock_reference(x, params))

    assert out.shape == (N, planes, H, W), out.shape
    # bf16 conv operands (f32 accumulate, f32 BN affine, exact f32 residual) vs f32 ref.
    np.testing.assert_allclose(np.asarray(out), np.asarray(ref), rtol=5e-2, atol=1e-1)
    print("KERNEL_OK")
</pallas_src>

<mosaic_0001>
module attributes {stable_mosaic.version = 11 : i64} {
  func.func @_basicblock_kernel(%arg0: i32, %arg1: memref<1x16x16x128xf32, #tpu.memory_space<vmem>>, %arg2: memref<9x128x128xbf16, #tpu.memory_space<vmem>>, %arg3: memref<1x128xf32, #tpu.memory_space<vmem>>, %arg4: memref<1x128xf32, #tpu.memory_space<vmem>>, %arg5: memref<9x128x128xbf16, #tpu.memory_space<vmem>>, %arg6: memref<1x128xf32, #tpu.memory_space<vmem>>, %arg7: memref<1x128xf32, #tpu.memory_space<vmem>>, %arg8: memref<1x16x16x128xf32, #tpu.memory_space<vmem>>) attributes {dimension_semantics = [#tpu.dimension_semantics<parallel>], iteration_bounds = array<i64: 2>, scalar_prefetch = 0 : i64, scratch_operands = 0 : i64, tpu.core_type = #tpu.core_type<tc>, window_params = [{transform_indices = @transform_0, window_bounds = array<i64: 1, 16, 16, 128>}, {pipeline_mode = #tpu.pipeline_mode<synchronous>, transform_indices = @transform_1, window_bounds = array<i64: 9, 128, 128>}, {pipeline_mode = #tpu.pipeline_mode<synchronous>, transform_indices = @transform_2, window_bounds = array<i64: 1, 128>}, {pipeline_mode = #tpu.pipeline_mode<synchronous>, transform_indices = @transform_3, window_bounds = array<i64: 1, 128>}, {pipeline_mode = #tpu.pipeline_mode<synchronous>, transform_indices = @transform_4, window_bounds = array<i64: 9, 128, 128>}, {pipeline_mode = #tpu.pipeline_mode<synchronous>, transform_indices = @transform_5, window_bounds = array<i64: 1, 128>}, {pipeline_mode = #tpu.pipeline_mode<synchronous>, transform_indices = @transform_6, window_bounds = array<i64: 1, 128>}, {transform_indices = @transform_7, window_bounds = array<i64: 1, 16, 16, 128>}]} {
    %c0 = arith.constant 0 : index
    %c0_0 = arith.constant 0 : index
    %c0_1 = arith.constant 0 : index
    %c0_2 = arith.constant 0 : index
    %0 = vector.load %arg1[%c0, %c0_0, %c0_1, %c0_2] : memref<1x16x16x128xf32, #tpu.memory_space<vmem>>, vector<1x16x16x128xf32>
    %1 = vector.shape_cast %0 : vector<1x16x16x128xf32> to vector<16x16x128xf32>
    %cst = arith.constant 0.000000e+00 : f32
    %2 = vector.broadcast %cst : f32 to vector<1x16x128xf32>
    %3 = tpu.iota {dimensions = array<i32: 1>} : vector<1x16x1xi32>
    %4 = tpu.concatenate %2, %1, %2 in 0 : vector<1x16x128xf32>, vector<16x16x128xf32>, vector<1x16x128xf32> -> vector<18x16x128xf32>
    %c0_i32 = arith.constant 0 : i32
    %5 = vector.broadcast %c0_i32 : i32 to vector<1x16x1xi32>
    %6 = arith.cmpi sgt, %3, %5 : vector<1x16x1xi32>
    %c1_i32 = arith.constant 1 : i32
    %7 = tpu.dynamic_rotate %4 by %c1_i32 dim 1 : vector<18x16x128xf32>, i32 -> vector<18x16x128xf32>
    %cst_3 = arith.constant 0.000000e+00 : f32
    %8 = vector.shape_cast %6 : vector<1x16x1xi1> to vector<1x16x1xi1>
    %9 = vector.broadcast %8 : vector<1x16x1xi1> to vector<18x16x128xi1>
    %10 = vector.broadcast %cst_3 : f32 to vector<18x16x128xf32>
    %11 = arith.select %9, %7, %10 : vector<18x16x128xi1>, vector<18x16x128xf32>
    %c15_i32 = arith.constant 15 : i32
    %12 = vector.broadcast %c15_i32 : i32 to vector<1x16x1xi32>
    %13 = arith.cmpi slt, %3, %12 : vector<1x16x1xi32>
    %c15_i32_4 = arith.constant 15 : i32
    %14 = tpu.dynamic_rotate %4 by %c15_i32_4 dim 1 : vector<18x16x128xf32>, i32 -> vector<18x16x128xf32>
    %cst_5 = arith.constant 0.000000e+00 : f32
    %15 = vector.shape_cast %13 : vector<1x16x1xi1> to vector<1x16x1xi1>
    %16 = vector.broadcast %15 : vector<1x16x1xi1> to vector<18x16x128xi1>
    %17 = vector.broadcast %cst_5 : f32 to vector<18x16x128xf32>
    %18 = arith.select %16, %14, %17 : vector<18x16x128xi1>, vector<18x16x128xf32>
    %19 = arith.truncf %11 : vector<18x16x128xf32> to vector<18x16x128xbf16>
    %20 = arith.truncf %4 : vector<18x16x128xf32> to vector<18x16x128xbf16>
    %21 = arith.truncf %18 : vector<18x16x128xf32> to vector<18x16x128xbf16>
    %22 = vector.extract_strided_slice %19 {offsets = [0, 0, 0], sizes = [16, 16, 128], strides = [1, 1, 1]} : vector<18x16x128xbf16> to vector<16x16x128xbf16>
    %23 = vector.shape_cast %22 : vector<16x16x128xbf16> to vector<256x128xbf16>
    %c0_6 = arith.constant 0 : index
    %c0_7 = arith.constant 0 : index
    %c0_8 = arith.constant 0 : index
    %24 = vector.load %arg2[%c0_6, %c0_7, %c0_8] : memref<9x128x128xbf16, #tpu.memory_space<vmem>>, vector<1x128x128xbf16>
    %25 = vector.shape_cast %24 : vector<1x128x128xbf16> to vector<128x128xbf16>
    %cst_9 = arith.constant dense<0.000000e+00> : vector<256x128xf32>
    %26 = tpu.matmul %23, %25, %cst_9 {dimension_numbers = #tpu.dot_dimension_numbers<[1], [0], [0], [1], [0, 0, 1, 1], [], []>} : vector<256x128xbf16>, vector<128x128xbf16>, vector<256x128xf32> -> vector<256x128xf32>
    %27 = vector.extract_strided_slice %20 {offsets = [0, 0, 0], sizes = [16, 16, 128], strides = [1, 1, 1]} : vector<18x16x128xbf16> to vector<16x16x128xbf16>
    %28 = vector.shape_cast %27 : vector<16x16x128xbf16> to vector<256x128xbf16>
    %c1 = arith.constant 1 : index
    %c0_10 = arith.constant 0 : index
    %c0_11 = arith.constant 0 : index
    %29 = vector.load %arg2[%c1, %c0_10, %c0_11] : memref<9x128x128xbf16, #tpu.memory_space<vmem>>, vector<1x128x128xbf16>
    %30 = vector.shape_cast %29 : vector<1x128x128xbf16> to vector<128x128xbf16>
    %cst_12 = arith.constant dense<0.000000e+00> : vector<256x128xf32>
    %31 = tpu.matmul %28, %30, %cst_12 {dimension_numbers = #tpu.dot_dimension_numbers<[1], [0], [0], [1], [0, 0, 1, 1], [], []>} : vector<256x128xbf16>, vector<128x128xbf16>, vector<256x128xf32> -> vector<256x128xf32>
    %32 = arith.addf %26, %31 : vector<256x128xf32>
    %33 = vector.extract_strided_slice %21 {offsets = [0, 0, 0], sizes = [16, 16, 128], strides = [1, 1, 1]} : vector<18x16x128xbf16> to vector<16x16x128xbf16>
    %34 = vector.shape_cast %33 : vector<16x16x128xbf16> to vector<256x128xbf16>
    %c2 = arith.constant 2 : index
    %c0_13 = arith.constant 0 : index
    %c0_14 = arith.constant 0 : index
    %35 = vector.load %arg2[%c2, %c0_13, %c0_14] : memref<9x128x128xbf16, #tpu.memory_space<vmem>>, vector<1x128x128xbf16>
    %36 = vector.shape_cast %35 : vector<1x128x128xbf16> to vector<128x128xbf16>
    %cst_15 = arith.constant dense<0.000000e+00> : vector<256x128xf32>
    %37 = tpu.matmul %34, %36, %cst_15 {dimension_numbers = #tpu.dot_dimension_numbers<[1], [0], [0], [1], [0, 0, 1, 1], [], []>} : vector<256x128xbf16>, vector<128x128xbf16>, vector<256x128xf32> -> vector<256x128xf32>
    %38 = arith.addf %32, %37 : vector<256x128xf32>
    %39 = vector.extract_strided_slice %19 {offsets = [1, 0, 0], sizes = [16, 16, 128], strides = [1, 1, 1]} : vector<18x16x128xbf16> to vector<16x16x128xbf16>
    %40 = vector.shape_cast %39 : vector<16x16x128xbf16> to vector<256x128xbf16>
    %c3 = arith.constant 3 : index
    %c0_16 = arith.constant 0 : index
    %c0_17 = arith.constant 0 : index
    %41 = vector.load %arg2[%c3, %c0_16, %c0_17] : memref<9x128x128xbf16, #tpu.memory_space<vmem>>, vector<1x128x128xbf16>
    %42 = vector.shape_cast %41 : vector<1x128x128xbf16> to vector<128x128xbf16>
    %cst_18 = arith.constant dense<0.000000e+00> : vector<256x128xf32>
    %43 = tpu.matmul %40, %42, %cst_18 {dimension_numbers = #tpu.dot_dimension_numbers<[1], [0], [0], [1], [0, 0, 1, 1], [], []>} : vector<256x128xbf16>, vector<128x128xbf16>, vector<256x128xf32> -> vector<256x128xf32>
    %44 = arith.addf %38, %43 : vector<256x128xf32>
    %45 = vector.extract_strided_slice %20 {offsets = [1, 0, 0], sizes = [16, 16, 128], strides = [1, 1, 1]} : vector<18x16x128xbf16> to vector<16x16x128xbf16>
    %46 = vector.shape_cast %45 : vector<16x16x128xbf16> to vector<256x128xbf16>
    %c4 = arith.constant 4 : index
    %c0_19 = arith.constant 0 : index
    %c0_20 = arith.constant 0 : index
    %47 = vector.load %arg2[%c4, %c0_19, %c0_20] : memref<9x128x128xbf16, #tpu.memory_space<vmem>>, vector<1x128x128xbf16>
    %48 = vector.shape_cast %47 : vector<1x128x128xbf16> to vector<128x128xbf16>
    %cst_21 = arith.constant dense<0.000000e+00> : vector<256x128xf32>
    %49 = tpu.matmul %46, %48, %cst_21 {dimension_numbers = #tpu.dot_dimension_numbers<[1], [0], [0], [1], [0, 0, 1, 1], [], []>} : vector<256x128xbf16>, vector<128x128xbf16>, vector<256x128xf32> -> vector<256x128xf32>
    %50 = arith.addf %44, %49 : vector<256x128xf32>
    %51 = vector.extract_strided_slice %21 {offsets = [1, 0, 0], sizes = [16, 16, 128], strides = [1, 1, 1]} : vector<18x16x128xbf16> to vector<16x16x128xbf16>
    %52 = vector.shape_cast %51 : vector<16x16x128xbf16> to vector<256x128xbf16>
    %c5 = arith.constant 5 : index
    %c0_22 = arith.constant 0 : index
    %c0_23 = arith.constant 0 : index
    %53 = vector.load %arg2[%c5, %c0_22, %c0_23] : memref<9x128x128xbf16, #tpu.memory_space<vmem>>, vector<1x128x128xbf16>
    %54 = vector.shape_cast %53 : vector<1x128x128xbf16> to vector<128x128xbf16>
    %cst_24 = arith.constant dense<0.000000e+00> : vector<256x128xf32>
    %55 = tpu.matmul %52, %54, %cst_24 {dimension_numbers = #tpu.dot_dimension_numbers<[1], [0], [0], [1], [0, 0, 1, 1], [], []>} : vector<256x128xbf16>, vector<128x128xbf16>, vector<256x128xf32> -> vector<256x128xf32>
    %56 = arith.addf %50, %55 : vector<256x128xf32>
    %57 = vector.extract_strided_slice %19 {offsets = [2, 0, 0], sizes = [16, 16, 128], strides = [1, 1, 1]} : vector<18x16x128xbf16> to vector<16x16x128xbf16>
    %58 = vector.shape_cast %57 : vector<16x16x128xbf16> to vector<256x128xbf16>
    %c6 = arith.constant 6 : index
    %c0_25 = arith.constant 0 : index
    %c0_26 = arith.constant 0 : index
    %59 = vector.load %arg2[%c6, %c0_25, %c0_26] : memref<9x128x128xbf16, #tpu.memory_space<vmem>>, vector<1x128x128xbf16>
    %60 = vector.shape_cast %59 : vector<1x128x128xbf16> to vector<128x128xbf16>
    %cst_27 = arith.constant dense<0.000000e+00> : vector<256x128xf32>
    %61 = tpu.matmul %58, %60, %cst_27 {dimension_numbers = #tpu.dot_dimension_numbers<[1], [0], [0], [1], [0, 0, 1, 1], [], []>} : vector<256x128xbf16>, vector<128x128xbf16>, vector<256x128xf32> -> vector<256x128xf32>
    %62 = arith.addf %56, %61 : vector<256x128xf32>
    %63 = vector.extract_strided_slice %20 {offsets = [2, 0, 0], sizes = [16, 16, 128], strides = [1, 1, 1]} : vector<18x16x128xbf16> to vector<16x16x128xbf16>
    %64 = vector.shape_cast %63 : vector<16x16x128xbf16> to vector<256x128xbf16>
    %c7 = arith.constant 7 : index
    %c0_28 = arith.constant 0 : index
    %c0_29 = arith.constant 0 : index
    %65 = vector.load %arg2[%c7, %c0_28, %c0_29] : memref<9x128x128xbf16, #tpu.memory_space<vmem>>, vector<1x128x128xbf16>
    %66 = vector.shape_cast %65 : vector<1x128x128xbf16> to vector<128x128xbf16>
    %cst_30 = arith.constant dense<0.000000e+00> : vector<256x128xf32>
    %67 = tpu.matmul %64, %66, %cst_30 {dimension_numbers = #tpu.dot_dimension_numbers<[1], [0], [0], [1], [0, 0, 1, 1], [], []>} : vector<256x128xbf16>, vector<128x128xbf16>, vector<256x128xf32> -> vector<256x128xf32>
    %68 = arith.addf %62, %67 : vector<256x128xf32>
    %69 = vector.extract_strided_slice %21 {offsets = [2, 0, 0], sizes = [16, 16, 128], strides = [1, 1, 1]} : vector<18x16x128xbf16> to vector<16x16x128xbf16>
    %70 = vector.shape_cast %69 : vector<16x16x128xbf16> to vector<256x128xbf16>
    %c8 = arith.constant 8 : index
    %c0_31 = arith.constant 0 : index
    %c0_32 = arith.constant 0 : index
    %71 = vector.load %arg2[%c8, %c0_31, %c0_32] : memref<9x128x128xbf16, #tpu.memory_space<vmem>>, vector<1x128x128xbf16>
    %72 = vector.shape_cast %71 : vector<1x128x128xbf16> to vector<128x128xbf16>
    %cst_33 = arith.constant dense<0.000000e+00> : vector<256x128xf32>
    %73 = tpu.matmul %70, %72, %cst_33 {dimension_numbers = #tpu.dot_dimension_numbers<[1], [0], [0], [1], [0, 0, 1, 1], [], []>} : vector<256x128xbf16>, vector<128x128xbf16>, vector<256x128xf32> -> vector<256x128xf32>
    %74 = arith.addf %68, %73 : vector<256x128xf32>
    %c0_34 = arith.constant 0 : index
    %c0_35 = arith.constant 0 : index
    %75 = vector.load %arg3[%c0_34, %c0_35] : memref<1x128xf32, #tpu.memory_space<vmem>>, vector<1x128xf32>
    %76 = vector.broadcast %75 : vector<1x128xf32> to vector<256x128xf32>
    %77 = arith.mulf %74, %76 : vector<256x128xf32>
    %c0_36 = arith.constant 0 : index
    %c0_37 = arith.constant 0 : index
    %78 = vector.load %arg4[%c0_36, %c0_37] : memref<1x128xf32, #tpu.memory_space<vmem>>, vector<1x128xf32>
    %79 = vector.broadcast %78 : vector<1x128xf32> to vector<256x128xf32>
    %80 = arith.addf %77, %79 : vector<256x128xf32>
    %cst_38 = arith.constant 0.000000e+00 : f32
    %81 = vector.broadcast %cst_38 : f32 to vector<256x128xf32>
    %82 = arith.maximumf %80, %81 : vector<256x128xf32>
    %83 = vector.shape_cast %82 : vector<256x128xf32> to vector<16x16x128xf32>
    %84 = tpu.concatenate %2, %83, %2 in 0 : vector<1x16x128xf32>, vector<16x16x128xf32>, vector<1x16x128xf32> -> vector<18x16x128xf32>
    %c0_i32_39 = arith.constant 0 : i32
    %85 = vector.broadcast %c0_i32_39 : i32 to vector<1x16x1xi32>
    %86 = arith.cmpi sgt, %3, %85 : vector<1x16x1xi32>
    %c1_i32_40 = arith.constant 1 : i32
    %87 = tpu.dynamic_rotate %84 by %c1_i32_40 dim 1 : vector<18x16x128xf32>, i32 -> vector<18x16x128xf32>
    %cst_41 = arith.constant 0.000000e+00 : f32
    %88 = vector.shape_cast %86 : vector<1x16x1xi1> to vector<1x16x1xi1>
    %89 = vector.broadcast %88 : vector<1x16x1xi1> to vector<18x16x128xi1>
    %90 = vector.broadcast %cst_41 : f32 to vector<18x16x128xf32>
    %91 = arith.select %89, %87, %90 : vector<18x16x128xi1>, vector<18x16x128xf32>
    %c15_i32_42 = arith.constant 15 : i32
    %92 = vector.broadcast %c15_i32_42 : i32 to vector<1x16x1xi32>
    %93 = arith.cmpi slt, %3, %92 : vector<1x16x1xi32>
    %c15_i32_43 = arith.constant 15 : i32
    %94 = tpu.dynamic_rotate %84 by %c15_i32_43 dim 1 : vector<18x16x128xf32>, i32 -> vector<18x16x128xf32>
    %cst_44 = arith.constant 0.000000e+00 : f32
    %95 = vector.shape_cast %93 : vector<1x16x1xi1> to vector<1x16x1xi1>
    %96 = vector.broadcast %95 : vector<1x16x1xi1> to vector<18x16x128xi1>
    %97 = vector.broadcast %cst_44 : f32 to vector<18x16x128xf32>
    %98 = arith.select %96, %94, %97 : vector<18x16x128xi1>, vector<18x16x128xf32>
    %99 = arith.truncf %91 : vector<18x16x128xf32> to vector<18x16x128xbf16>
    %100 = arith.truncf %84 : vector<18x16x128xf32> to vector<18x16x128xbf16>
    %101 = arith.truncf %98 : vector<18x16x128xf32> to vector<18x16x128xbf16>
    %102 = vector.extract_strided_slice %99 {offsets = [0, 0, 0], sizes = [16, 16, 128], strides = [1, 1, 1]} : vector<18x16x128xbf16> to vector<16x16x128xbf16>
    %103 = vector.shape_cast %102 : vector<16x16x128xbf16> to vector<256x128xbf16>
    %c0_45 = arith.constant 0 : index
    %c0_46 = arith.constant 0 : index
    %c0_47 = arith.constant 0 : index
    %104 = vector.load %arg5[%c0_45, %c0_46, %c0_47] : memref<9x128x128xbf16, #tpu.memory_space<vmem>>, vector<1x128x128xbf16>
    %105 = vector.shape_cast %104 : vector<1x128x128xbf16> to vector<128x128xbf16>
    %cst_48 = arith.constant dense<0.000000e+00> : vector<256x128xf32>
    %106 = tpu.matmul %103, %105, %cst_48 {dimension_numbers = #tpu.dot_dimension_numbers<[1], [0], [0], [1], [0, 0, 1, 1], [], []>} : vector<256x128xbf16>, vector<128x128xbf16>, vector<256x128xf32> -> vector<256x128xf32>
    %107 = vector.extract_strided_slice %100 {offsets = [0, 0, 0], sizes = [16, 16, 128], strides = [1, 1, 1]} : vector<18x16x128xbf16> to vector<16x16x128xbf16>
    %108 = vector.shape_cast %107 : vector<16x16x128xbf16> to vector<256x128xbf16>
    %c1_49 = arith.constant 1 : index
    %c0_50 = arith.constant 0 : index
    %c0_51 = arith.constant 0 : index
    %109 = vector.load %arg5[%c1_49, %c0_50, %c0_51] : memref<9x128x128xbf16, #tpu.memory_space<vmem>>, vector<1x128x128xbf16>
    %110 = vector.shape_cast %109 : vector<1x128x128xbf16> to vector<128x128xbf16>
    %cst_52 = arith.constant dense<0.000000e+00> : vector<256x128xf32>
    %111 = tpu.matmul %108, %110, %cst_52 {dimension_numbers = #tpu.dot_dimension_numbers<[1], [0], [0], [1], [0, 0, 1, 1], [], []>} : vector<256x128xbf16>, vector<128x128xbf16>, vector<256x128xf32> -> vector<256x128xf32>
    %112 = arith.addf %106, %111 : vector<256x128xf32>
    %113 = vector.extract_strided_slice %101 {offsets = [0, 0, 0], sizes = [16, 16, 128], strides = [1, 1, 1]} : vector<18x16x128xbf16> to vector<16x16x128xbf16>
    %114 = vector.shape_cast %113 : vector<16x16x128xbf16> to vector<256x128xbf16>
    %c2_53 = arith.constant 2 : index
    %c0_54 = arith.constant 0 : index
    %c0_55 = arith.constant 0 : index
    %115 = vector.load %arg5[%c2_53, %c0_54, %c0_55] : memref<9x128x128xbf16, #tpu.memory_space<vmem>>, vector<1x128x128xbf16>
    %116 = vector.shape_cast %115 : vector<1x128x128xbf16> to vector<128x128xbf16>
    %cst_56 = arith.constant dense<0.000000e+00> : vector<256x128xf32>
    %117 = tpu.matmul %114, %116, %cst_56 {dimension_numbers = #tpu.dot_dimension_numbers<[1], [0], [0], [1], [0, 0, 1, 1], [], []>} : vector<256x128xbf16>, vector<128x128xbf16>, vector<256x128xf32> -> vector<256x128xf32>
    %118 = arith.addf %112, %117 : vector<256x128xf32>
    %119 = vector.extract_strided_slice %99 {offsets = [1, 0, 0], sizes = [16, 16, 128], strides = [1, 1, 1]} : vector<18x16x128xbf16> to vector<16x16x128xbf16>
    %120 = vector.shape_cast %119 : vector<16x16x128xbf16> to vector<256x128xbf16>
    %c3_57 = arith.constant 3 : index
    %c0_58 = arith.constant 0 : index
    %c0_59 = arith.constant 0 : index
    %121 = vector.load %arg5[%c3_57, %c0_58, %c0_59] : memref<9x128x128xbf16, #tpu.memory_space<vmem>>, vector<1x128x128xbf16>
    %122 = vector.shape_cast %121 : vector<1x128x128xbf16> to vector<128x128xbf16>
    %cst_60 = arith.constant dense<0.000000e+00> : vector<256x128xf32>
    %123 = tpu.matmul %120, %122, %cst_60 {dimension_numbers = #tpu.dot_dimension_numbers<[1], [0], [0], [1], [0, 0, 1, 1], [], []>} : vector<256x128xbf16>, vector<128x128xbf16>, vector<256x128xf32> -> vector<256x128xf32>
    %124 = arith.addf %118, %123 : vector<256x128xf32>
    %125 = vector.extract_strided_slice %100 {offsets = [1, 0, 0], sizes = [16, 16, 128], strides = [1, 1, 1]} : vector<18x16x128xbf16> to vector<16x16x128xbf16>
    %126 = vector.shape_cast %125 : vector<16x16x128xbf16> to vector<256x128xbf16>
    %c4_61 = arith.constant 4 : index
    %c0_62 = arith.constant 0 : index
    %c0_63 = arith.constant 0 : index
    %127 = vector.load %arg5[%c4_61, %c0_62, %c0_63] : memref<9x128x128xbf16, #tpu.memory_space<vmem>>, vector<1x128x128xbf16>
    %128 = vector.shape_cast %127 : vector<1x128x128xbf16> to vector<128x128xbf16>
    %cst_64 = arith.constant dense<0.000000e+00> : vector<256x128xf32>
    %129 = tpu.matmul %126, %128, %cst_64 {dimension_numbers = #tpu.dot_dimension_numbers<[1], [0], [0], [1], [0, 0, 1, 1], [], []>} : vector<256x128xbf16>, vector<128x128xbf16>, vector<256x128xf32> -> vector<256x128xf32>
    %130 = arith.addf %124, %129 : vector<256x128xf32>
    %131 = vector.extract_strided_slice %101 {offsets = [1, 0, 0], sizes = [16, 16, 128], strides = [1, 1, 1]} : vector<18x16x128xbf16> to vector<16x16x128xbf16>
    %132 = vector.shape_cast %131 : vector<16x16x128xbf16> to vector<256x128xbf16>
    %c5_65 = arith.constant 5 : index
    %c0_66 = arith.constant 0 : index
    %c0_67 = arith.constant 0 : index
    %133 = vector.load %arg5[%c5_65, %c0_66, %c0_67] : memref<9x128x128xbf16, #tpu.memory_space<vmem>>, vector<1x128x128xbf16>
    %134 = vector.shape_cast %133 : vector<1x128x128xbf16> to vector<128x128xbf16>
    %cst_68 = arith.constant dense<0.000000e+00> : vector<256x128xf32>
    %135 = tpu.matmul %132, %134, %cst_68 {dimension_numbers = #tpu.dot_dimension_numbers<[1], [0], [0], [1], [0, 0, 1, 1], [], []>} : vector<256x128xbf16>, vector<128x128xbf16>, vector<256x128xf32> -> vector<256x128xf32>
    %136 = arith.addf %130, %135 : vector<256x128xf32>
    %137 = vector.extract_strided_slice %99 {offsets = [2, 0, 0], sizes = [16, 16, 128], strides = [1, 1, 1]} : vector<18x16x128xbf16> to vector<16x16x128xbf16>
    %138 = vector.shape_cast %137 : vector<16x16x128xbf16> to vector<256x128xbf16>
    %c6_69 = arith.constant 6 : index
    %c0_70 = arith.constant 0 : index
    %c0_71 = arith.constant 0 : index
    %139 = vector.load %arg5[%c6_69, %c0_70, %c0_71] : memref<9x128x128xbf16, #tpu.memory_space<vmem>>, vector<1x128x128xbf16>
    %140 = vector.shape_cast %139 : vector<1x128x128xbf16> to vector<128x128xbf16>
    %cst_72 = arith.constant dense<0.000000e+00> : vector<256x128xf32>
    %141 = tpu.matmul %138, %140, %cst_72 {dimension_numbers = #tpu.dot_dimension_numbers<[1], [0], [0], [1], [0, 0, 1, 1], [], []>} : vector<256x128xbf16>, vector<128x128xbf16>, vector<256x128xf32> -> vector<256x128xf32>
    %142 = arith.addf %136, %141 : vector<256x128xf32>
    %143 = vector.extract_strided_slice %100 {offsets = [2, 0, 0], sizes = [16, 16, 128], strides = [1, 1, 1]} : vector<18x16x128xbf16> to vector<16x16x128xbf16>
    %144 = vector.shape_cast %143 : vector<16x16x128xbf16> to vector<256x128xbf16>
    %c7_73 = arith.constant 7 : index
    %c0_74 = arith.constant 0 : index
    %c0_75 = arith.constant 0 : index
    %145 = vector.load %arg5[%c7_73, %c0_74, %c0_75] : memref<9x128x128xbf16, #tpu.memory_space<vmem>>, vector<1x128x128xbf16>
    %146 = vector.shape_cast %145 : vector<1x128x128xbf16> to vector<128x128xbf16>
    %cst_76 = arith.constant dense<0.000000e+00> : vector<256x128xf32>
    %147 = tpu.matmul %144, %146, %cst_76 {dimension_numbers = #tpu.dot_dimension_numbers<[1], [0], [0], [1], [0, 0, 1, 1], [], []>} : vector<256x128xbf16>, vector<128x128xbf16>, vector<256x128xf32> -> vector<256x128xf32>
    %148 = arith.addf %142, %147 : vector<256x128xf32>
    %149 = vector.extract_strided_slice %101 {offsets = [2, 0, 0], sizes = [16, 16, 128], strides = [1, 1, 1]} : vector<18x16x128xbf16> to vector<16x16x128xbf16>
    %150 = vector.shape_cast %149 : vector<16x16x128xbf16> to vector<256x128xbf16>
    %c8_77 = arith.constant 8 : index
    %c0_78 = arith.constant 0 : index
    %c0_79 = arith.constant 0 : index
    %151 = vector.load %arg5[%c8_77, %c0_78, %c0_79] : memref<9x128x128xbf16, #tpu.memory_space<vmem>>, vector<1x128x128xbf16>
    %152 = vector.shape_cast %151 : vector<1x128x128xbf16> to vector<128x128xbf16>
    %cst_80 = arith.constant dense<0.000000e+00> : vector<256x128xf32>
    %153 = tpu.matmul %150, %152, %cst_80 {dimension_numbers = #tpu.dot_dimension_numbers<[1], [0], [0], [1], [0, 0, 1, 1], [], []>} : vector<256x128xbf16>, vector<128x128xbf16>, vector<256x128xf32> -> vector<256x128xf32>
    %154 = arith.addf %148, %153 : vector<256x128xf32>
    %c0_81 = arith.constant 0 : index
    %c0_82 = arith.constant 0 : index
    %155 = vector.load %arg6[%c0_81, %c0_82] : memref<1x128xf32, #tpu.memory_space<vmem>>, vector<1x128xf32>
    %156 = vector.broadcast %155 : vector<1x128xf32> to vector<256x128xf32>
    %157 = arith.mulf %154, %156 : vector<256x128xf32>
    %c0_83 = arith.constant 0 : index
    %c0_84 = arith.constant 0 : index
    %158 = vector.load %arg7[%c0_83, %c0_84] : memref<1x128xf32, #tpu.memory_space<vmem>>, vector<1x128xf32>
    %159 = vector.broadcast %158 : vector<1x128xf32> to vector<256x128xf32>
    %160 = arith.addf %157, %159 : vector<256x128xf32>
    %161 = vector.shape_cast %1 : vector<16x16x128xf32> to vector<256x128xf32>
    %162 = arith.addf %160, %161 : vector<256x128xf32>
    %cst_85 = arith.constant 0.000000e+00 : f32
    %163 = vector.broadcast %cst_85 : f32 to vector<256x128xf32>
    %164 = arith.maximumf %162, %163 : vector<256x128xf32>
    %165 = vector.shape_cast %164 : vector<256x128xf32> to vector<1x16x16x128xf32>
    %c0_86 = arith.constant 0 : index
    %c0_87 = arith.constant 0 : index
    %c0_88 = arith.constant 0 : index
    %c0_89 = arith.constant 0 : index
    %166 = vector.load %arg8[%c0_86, %c0_87, %c0_88, %c0_89] : memref<1x16x16x128xf32, #tpu.memory_space<vmem>>, vector<1x16x16x128xf32>
    tpu.vector_store %arg8[%c0_86, %c0_87, %c0_88, %c0_89], %165 {strides = array<i32>} : memref<1x16x16x128xf32, #tpu.memory_space<vmem>>, vector<1x16x16x128xf32>,
    return
  }
  func.func @transform_0(%arg0: i32) -> (i32, i32, i32, i32) {
    %c0_i32 = arith.constant 0 : i32
    %c0_i32_0 = arith.constant 0 : i32
    %c0_i32_1 = arith.constant 0 : i32
    %c0_i32_2 = arith.constant 0 : i32
    return %arg0, %c0_i32, %c0_i32_0, %c0_i32_1 : i32, i32, i32, i32
  }
  func.func @transform_1(%arg0: i32) -> (i32, i32, i32) {
    %c0_i32 = arith.constant 0 : i32
    %c0_i32_0 = arith.constant 0 : i32
    %c0_i32_1 = arith.constant 0 : i32
    %c0_i32_2 = arith.constant 0 : i32
    return %c0_i32, %c0_i32_0, %c0_i32_1 : i32, i32, i32
  }
  func.func @transform_2(%arg0: i32) -> (i32, i32) {
    %c0_i32 = arith.constant 0 : i32
    %c0_i32_0 = arith.constant 0 : i32
    %c0_i32_1 = arith.constant 0 : i32
    return %c0_i32, %c0_i32_0 : i32, i32
  }
  func.func @transform_3(%arg0: i32) -> (i32, i32) {
    %c0_i32 = arith.constant 0 : i32
    %c0_i32_0 = arith.constant 0 : i32
    %c0_i32_1 = arith.constant 0 : i32
    return %c0_i32, %c0_i32_0 : i32, i32
  }
  func.func @transform_4(%arg0: i32) -> (i32, i32, i32) {
    %c0_i32 = arith.constant 0 : i32
    %c0_i32_0 = arith.constant 0 : i32
    %c0_i32_1 = arith.constant 0 : i32
    %c0_i32_2 = arith.constant 0 : i32
    return %c0_i32, %c0_i32_0, %c0_i32_1 : i32, i32, i32
  }
  func.func @transform_5(%arg0: i32) -> (i32, i32) {
    %c0_i32 = arith.constant 0 : i32
    %c0_i32_0 = arith.constant 0 : i32
    %c0_i32_1 = arith.constant 0 : i32
    return %c0_i32, %c0_i32_0 : i32, i32
  }
  func.func @transform_6(%arg0: i32) -> (i32, i32) {
    %c0_i32 = arith.constant 0 : i32
    %c0_i32_0 = arith.constant 0 : i32
    %c0_i32_1 = arith.constant 0 : i32
    return %c0_i32, %c0_i32_0 : i32, i32
  }
  func.func @transform_7(%arg0: i32) -> (i32, i32, i32, i32) {
    %c0_i32 = arith.constant 0 : i32
    %c0_i32_0 = arith.constant 0 : i32
    %c0_i32_1 = arith.constant 0 : i32
    %c0_i32_2 = arith.constant 0 : i32
    return %arg0, %c0_i32, %c0_i32_0, %c0_i32_1 : i32, i32, i32, i32
  }
}

</mosaic_0001>

<bundles_post_ra>
// kernel: tpu_custom_call.1
= control target key start
LH: loop header
LB: loop body
LE: loop exit
PB: predicated region body
PF: predicated region fallthrough
CT: control target
= control target key end

     0   :  { %12 = vsyncpa [#allocation3], 0  ;;  %s10782_s0 = inlined_call_operand.hbm [shape: f32[2,16,16,128], index: 0, kind: input, shape index: {}]   ;;  %s10783_s1 = inlined_call_operand.hbm [shape: bf16[9,128,128], index: 1, kind: input, shape index: {}]   ;;  %s10784_s2 = inlined_call_operand.vmem [shape: f32[1,128], index: 2, kind: input, shape index: {}]   ;;  %s10785_s3 = inlined_call_operand.vmem [shape: f32[1,128], index: 3, kind: input, shape index: {}]   ;;  %s10786_s4 = inlined_call_operand.hbm [shape: bf16[9,128,128], index: 4, kind: input, shape index: {}]   ;;  %s10787_s5 = inlined_call_operand.vmem [shape: f32[1,128], index: 5, kind: input, shape index: {}]   ;;  %s10788_s6 = inlined_call_operand.vmem [shape: f32[1,128], index: 6, kind: input, shape index: {}]   ;;  %s10789_s7 = inlined_call_operand.hbm [shape: f32[2,16,16,128], index: 7, kind: output, shape index: {}]  }
   0x1   :  { %14 = vsyncpa [#allocation3 + $0x1], 0 }
   0x2   :  { %15 = vsyncpa [#allocation6], 0 }
   0x3   :  { %16 = vsyncpa [#allocation4], 0 }
   0x4   :  { %18 = vsyncpa [#allocation4 + $0x1], 0  ;;  %s8756_s24 = smov 0   ;;  %s8758_s25 = smov 0  }
   0x5   :  { %s8760_s26 = smov 0   ;;  %s8762_s27 = smov 0  }
   0x6 LB: > { %s8777_s28 = sadd.s32 4294967295, %s8702_s27   ;;  %s5767_s29 = sadd.s32 4294967294, %s8702_s27   ;;  %s8702_s27 = sphi %s8762_s27, %s10946_s27   ;;  %s8698_s26 = sphi %s8760_s26, %s10945_s26   ;;  %s8694_s25 = sphi %s8758_s25, %s10944_s25   ;;  %s8690_s24 = sphi %s8756_s24, %s10943_s24  }
   0x7   : > { %p44_p0 = scmp.ne.s32.totalorder %s8694_s25, %s8690_s24  ;;  %p10790_p1 = scmp.eq.s32.totalorder %s8777_s28, 0 }
   0x8   : > { %p200_p3 = scmp.eq.s32.totalorder %s5767_s29, 1  ;;  %p5768_p5 = scmp.ge.s32.totalorder %s8702_s27, 1 }
   0x9   : > { %p8786_p4 = por %p10790_p1, %p44_p0  ;;  %p207_p7 = scmp.lt.s32.totalorder %s8702_s27, 3 }
   0xa   : > { %p8791_p6 = por %p200_p3, %p44_p0  ;;  %s8704_s10 = smov [#allocation5]  }
   0xb   : > { %s10837_s30 = scalar_select %p8786_p4, 1, 0 }
   0xc   : > { %s10838_s8 = scalar_select %p8791_p6, 1, 0 }
   0xd   : > { %p8796_p8 = pnand %p5768_p5, %p207_p7  ;;  %s219_s11 = sshll.u32 %s8704_s10, 4  ;;  %s8800_s11 = int_to_ptr.vmem [resolvable:$true] %s219_s11 }
   0xe   : > { %s8705_s13 = smov [#allocation7]   ;;  %s8546_s17 = scalar_lea.hbm %s10783_s1, 9216 }
   0xf   : > { %p8307_p9 = pneg %p8796_p8  ;;  %s238_s14 = sshll.u32 %s8705_s13, 4  ;;  %s8811_s14 = int_to_ptr.vmem [resolvable:$true] %s238_s14 }
  0x10   : > { %p8547_p12 = scmp.ne.s32.totalorder %s10783_s1, %s8546_s17  ;;  %p8553_p5 = scmp.lt.u32.totalorder %s8546_s17, %s10783_s1 }
  0x11   : > { %p8807_p11 = pnand %p8307_p9, %p10790_p1 }
  0x13   : > { %p8548_p13 = pneg %p8807_p11 }
  0x15   : > { %p8549_p0 = pnand %p8548_p13, %p8547_p12 }
  0x17   : > { %p8550_p3 = pneg %p8549_p0 }
  0x19   : > { %p8555_p7 = pnand %p8553_p5, %p8550_p3 }
  0x1b   : > { %8558 = shalt.err (!%p8555_p7)
}
  0x1c   : > { %s8559_s22 = scalar_lea.vmem %s8800_s11, 9216  ;;  %p8567_p2 = scmp.lt.s32.totalorder %s8800_s11, %s8800_s11 }
  0x1d   : > { %p8560_p9 = scmp.ne.s32.totalorder %s8800_s11, %s8559_s22  ;;  %p8568_p12 = scmp.lt.s32.totalorder %s8559_s22, %s8559_s22 }
  0x1f   : > { %p8562_p10 = pnand %p8560_p9, %p8548_p13  ;;  %p8569_p0 = por %p8568_p12, %p8567_p2 }
  0x21   : > { %p8563_p1 = pneg %p8562_p10 }
  0x23   : > { %p8570_p6 = pnand %p8569_p0, %p8563_p1 }
  0x25   : > { %8573 = shalt.err (!%p8570_p6)
}
  0x26   : > { %s8706_s23 = smov 64   ;;  %s8707_s29 = smov 4  }
  0x27   : > { %8310 = dma.hbm_to_vmem [thread:$0]  (!%p8807_p11), %s10783_s1, 9216, %s8800_s11, [#allocation6], %s8706_s23, %s8706_s23, %s8707_s29  }
  0x28   : > { %s8574_s17 = scalar_lea.hbm %s10786_s4, 9216 }
  0x29   : > { %p8575_p2 = scmp.ne.s32.totalorder %s10786_s4, %s8574_s17  ;;  %p8581_p10 = scmp.lt.u32.totalorder %s8574_s17, %s10786_s4 }
  0x2b   : > { %p8577_p1 = pnand %p8575_p2, %p8548_p13 }
  0x2d   : > { %p8578_p6 = pneg %p8577_p1 }
  0x2f   : > { %p8583_p3 = pnand %p8581_p10, %p8578_p6 }
  0x31   : > { %8586 = shalt.err (!%p8583_p3)
}
  0x32   : > { %s8587_s11 = scalar_lea.vmem %s8811_s14, 9216  ;;  %p8595_p12 = scmp.lt.s32.totalorder %s8811_s14, %s8811_s14 }
  0x33   : > { %p8588_p5 = scmp.ne.s32.totalorder %s8811_s14, %s8587_s11  ;;  %p8596_p0 = scmp.lt.s32.totalorder %s8587_s11, %s8587_s11 }
  0x35   : > { %p8590_p7 = pnand %p8588_p5, %p8548_p13  ;;  %p8597_p2 = por %p8596_p0, %p8595_p12 }
  0x37   : > { %p8591_p9 = pneg %p8590_p7 }
  0x39   : > { %p8598_p1 = pnand %p8597_p2, %p8591_p9 }
  0x3b   : > { %8601 = shalt.err (!%p8598_p1)
}
  0x3c   : > { %8313 = dma.hbm_to_vmem [thread:$0]  (!%p8807_p11), %s10786_s4, 9216, %s8811_s14, [#allocation6], %s8706_s23, %s8706_s23, %s8707_s29  }
  0x3d   : > { %s8866_s13 = sadd.s32 1, %s8702_s27   ;;  %s31_s12 = sadd.s32 1, %s8698_s26 }
  0x3e   : > { %s28_s15 = ssub.s32 %s8702_s27, %s8866_s13  ;;  %p38_p13 = scmp.ne.s32.totalorder %s8698_s26, %s8694_s25 }
  0x3f   : > { %p29_p6 = scmp.eq.s32.totalorder %s28_s15, 0  ;;  %p39_p10 = scmp.eq.s32.totalorder %s8702_s27, 0 }
  0x40   : > { %p10841_p3 = scmp.eq.s32.totalorder %s8777_s28, 1  ;;  %p8324_p7 = scmp.lt.s32.totalorder %s8702_s27, 2 }
  0x41   : > { %s8882_s17 = scalar_select %p29_p6, %s8698_s26, %s31_s12  }
  0x42   : > { %p8876_p5 = por %p10841_p3, %p38_p13  ;;  %p40_p9 = por %p39_p10, %p38_p13 }
  0x43   : > { %s258_s18 = sand.u32 1, %s8698_s26   ;;  %s6485_s14 = sshll.u32 %s8702_s27, 12 }
  0x44   : > { %s10842_s16 = scalar_select %p8876_p5, 1, 0 }
  0x45   : > { %s5772_s19 = sshll.u32 %s258_s18, 8  ;;  %s8889_s20 = scalar_lea.hbm %s10782_s0, %s6485_s14 }
  0x46   : > { %s262_s21 = scalar_lea.vmem [#allocation2], %s5772_s19  ;;  %p8893_p11 = pnand %p8324_p7, %p40_p9 }
  0x47   : > { %s269_s11 = sshll.u32 %s262_s21, 4  ;;  %s8897_s10 = scalar_lea.sflag [#allocation3], %s258_s18  ;;  %s8891_s11 = int_to_ptr.vmem [resolvable:$true] %s269_s11 }
  0x48   : > { %s8602_s12 = scalar_lea.hbm %s8889_s20, 4096  ;;  %p8604_p0 = pneg %p8893_p11 }
  0x49   : > { %p8603_p12 = scmp.ne.s32.totalorder %s8889_s20, %s8602_s12  ;;  %s8607_s14 = scalar_lea.hbm %s10782_s0, 8192 }
  0x4a   : > { %p8608_p13 = scmp.lt.u32.totalorder %s8889_s20, %s10782_s0  ;;  %p8609_p6 = scmp.lt.u32.totalorder %s8607_s14, %s8602_s12 }
  0x4b   : > { %p8605_p2 = pnand %p8604_p0, %p8603_p12  ;;  %p8611_p3 = scmp.lt.u32.totalorder %s8602_s12, %s8889_s20 }
  0x4c   : > { %p8610_p10 = por %p8609_p6, %p8608_p13 }
  0x4d   : > { %p8606_p1 = pneg %p8605_p2 }
  0x4e   : > { %p8612_p7 = por %p8611_p3, %p8610_p10 }
  0x50   : > { %p8613_p9 = pnand %p8612_p7, %p8606_p1 }
  0x52   : > { %8616 = shalt.err (!%p8613_p9)
}
  0x53   : > { %s8617_s18 = scalar_lea.vmem %s8891_s11, 4096  ;;  %s8708_s21 = smov [#allocation2]  }
  0x54   : > { %p8618_p12 = scmp.ne.s32.totalorder %s8891_s11, %s8617_s18  ;;  %s8622_s15 = sshll.u32 %s8708_s21, 4  ;;  %s8623_s15 = int_to_ptr.vmem [resolvable:$false] %s8622_s15 }
  0x55   : > { %s8624_s19 = scalar_lea.vmem %s8623_s15, 8192  ;;  %p8625_p4 = scmp.lt.s32.totalorder %s8891_s11, %s8623_s15 }
  0x56   : > { %p8620_p2 = pnand %p8618_p12, %p8604_p0  ;;  %p8626_p13 = scmp.lt.s32.totalorder %s8624_s19, %s8617_s18 }
  0x58   : > { %p8621_p5 = pneg %p8620_p2  ;;  %p8627_p6 = por %p8626_p13, %p8625_p4 }
  0x5a   : > { %p8628_p10 = pnand %p8627_p6, %p8621_p5 }
  0x5c   : > { %8631 = shalt.err (!%p8628_p10)
}
  0x5d   : > { %s8709_s12 = smov 128   ;;  %s8710_s14 = smov 8  }
  0x5e   : > { %8317 = dma.hbm_to_vmem [thread:$0]  (!%p8893_p11), %s8889_s20, 4096, %s8891_s11, %s8897_s10, %s8709_s12, %s8709_s12, %s8710_s14  }
  0x5f   : > { %281 = sbr.rel (%p8796_p8) target bundleno = 1687 (0x697), region = 48 }
  0x66   : > { %s8928_s23 = sand.u32 1, %s8694_s25   ;;  %p10844_p4 = scmp.ne.s32.totalorder %s10837_s30, 0 }
  0x67   : > { %s5776_s29 = sshll.u32 %s8928_s23, 8  ;;  %s284_s18 = scalar_lea.sflag [#allocation3], %s8928_s23 }
  0x68   : > { %s8934_s21 = scalar_lea.vmem [#allocation2], %s5776_s29 }
  0x69   : > { %8677 = dma.done.wait (%p10844_p4), %s284_s18, 4096  }
  0x6a   : > { %8679 = vsyncadd (%p10844_p4), %s284_s18, 4294963200  ;;  %p10845_p5 = scmp.eq.s32.totalorder %s8777_s28, 0 }
  0x6c   : > { %8681 = dma.done.wait (%p10845_p5), [#allocation6], 18432   ;;  %p10846_p8 = pmov %p10845_p5 }
  0x6d   : > { %v10793_v0 = vmov 0.0|0.0   ;;  %v359_v1 = vlaneseq  ;;  %v8370_v2 = vld [vmem:[#allocation5 + $0x40] sm:$0xff]   ;;  %v8371_v4 = vld [vmem:[#allocation5 + $0x48] sm:$0xff]   ;;  %v8372_v6 = vld [vmem:[#allocation5 + $0x50] sm:$0xff]   ;;  %vm8712_vm1 = vmmov 1   ;;  %s10613_s12 = scalar_lea.vmem [#allocation8], %s5776_s29 }
  0x6e   : > { %8683 = vsyncadd (%p10846_p8), [#allocation6], 4294948864  ;;  %6935 = vmatprep.mubr.bf16.mxu0 %v10793_v0  ;;  %7367 = vmatprep.mubr.bf16.mxu1 %v10793_v0  ;;  %v8373_v7 = vld [vmem:[#allocation5 + $0x58] sm:$0xff]   ;;  %v8374_v9 = vld [vmem:[#allocation5 + $0x60] sm:$0xff]   ;;  %s6486_s14 = sshll.u32 %s8777_s28, 12  ;;  %s5675_s29 = sshll.u32 %s10613_s12, 4  ;;  %s10735_s29 = int_to_ptr.vmem [resolvable:$true] %s5675_s29 }
  0x6f   : > { %v8946_v3 = vshrl.u32 %v359_v1, 7  ;;  %6919 = vmatprep.subr.bf16.mxu0 %v8370_v2  ;;  %v8375_v10 = vld [vmem:[#allocation5 + $0x68] sm:$0xff]   ;;  %v8376_v11 = vld [vmem:[#allocation5 + $0x70] sm:$0xff]   ;;  %v8377_v12 = vld [vmem:[#allocation5 + $0x78] sm:$0xff]   ;;  %s10733_s9 = scalar_lea.hbm %s10789_s7, %s6486_s14  ;;  %s5662_s28 = scalar_lea.sflag [#allocation4], %s8928_s23 }
  0x70   : > { %6920 = vmatpush3.bf16.msra.mxu0 %v8370_v2  ;;  %v8955_v13 = vld [vmem:[%s8934_s21] sm:$0xff]  ;;  %v8958_v14 = vld [vmem:[%s8934_s21 + $0x8] sm:$0xff]  ;;  %v8961_v16 = vld [vmem:[%s8934_s21 + $0x10] sm:$0xff]  ;;  %s8632_s20 = scalar_lea.vmem %s10735_s29, 4096  ;;  %p10940_p0 = scmp.ne.s32.totalorder %s10842_s16, 0 }
  0x71   : > { %v361_v5 = vadd.s32 8, %v8946_v3  ;;  %6921 = vmatprep.subr.bf16.mxu0 %v8371_v4  ;;  %v8378_v15 = vld [vmem:[#allocation5] sm:$0xff]   ;;  %v8964_v17 = vld [vmem:[%s8934_s21 + $0x18] sm:$0xff]  ;;  %v8968_v18 = vpack.c.bf16 %v8958_v14, %v8955_v13  ;;  %v8379_v20 = vld [vmem:[#allocation5 + $0x8] sm:$0xff]   ;;  %v364_v21 = vrot.slane %v8955_v13, 7  ;;  %v380_v24 = vrot.slane %v8958_v14, 7  ;;  %p8633_p11 = scmp.ne.s32.totalorder %s10735_s29, %s8632_s20 }
  0x72   : > { %v8972_v19 = vpack.c.bf16 %v8964_v17, %v8961_v16  ;;  %v8976_v22 = vld [vmem:[%s8934_s21 + $0x20] sm:$0xff]  ;;  %v8979_v23 = vld [vmem:[%s8934_s21 + $0x28] sm:$0xff]  ;;  %v8984_v25 = vld [vmem:[%s8934_s21 + $0x30] sm:$0xff]  ;;  %v365_v26 = vrot.slane %v8961_v16, 7  ;;  %v381_v28 = vrot.slane %v8964_v17, 7  ;;  %vm362_vm3 = vcmp.gt.s32.totalorder %v8946_v3, 0 }
  0x73   : > { %vm468_vm0 = vcmp.lt.s32.totalorder %v361_v5, 15  ;;  %v8989_v27 = vld [vmem:[%s8934_s21 + $0x38] sm:$0xff]  ;;  %v8380_v29 = vld [vmem:[#allocation5 + $0x10] sm:$0xff]   ;;  %v382_v31 = vrot.slane %v8979_v23, 7  ;;  %v8996_v32 = vpack.c.bf16 %v8979_v23, %v8976_v22  ;;  %v9000_v34 = vld [vmem:[%s8934_s21 + $0x40] sm:$0xff]  ;;  %vm396_vm4 = vcmp.lt.s32.totalorder %v8946_v3, 1  ;;  %p8634_p1 = pnand %p8633_p11, %p10940_p0 }
  0x74   : > { %6922 = vmatpush3.bf16.msra.mxu0 %v8371_v4  ;;  %vm8950_vm2 = vmpackc.low %vm468_vm0, %vm8712_vm1  ;;  %v9005_v36 = vpack.c.bf16 %v8989_v27, %v8984_v25  ;;  %v9008_v37 = vld [vmem:[%s8934_s21 + $0x48] sm:$0xff]  ;;  %v8381_v39 = vld [vmem:[#allocation5 + $0x18] sm:$0xff]   ;;  %v397_v58 = vsel %vm396_vm4, %v364_v21, %v380_v24  ;;  %v413_v38 = vsel %vm396_vm4, %v380_v24, %v364_v21  ;;  %v398_v40 = vsel %vm396_vm4, %v365_v26, %v381_v28 }
  0x75   : > { %6923 = vmatprep.subr.bf16.mxu0 %v8372_v6  ;;  %v9014_v41 = vld [vmem:[%s8934_s21 + $0x50] sm:$0xff]  ;;  %v9017_v42 = vld [vmem:[%s8934_s21 + $0x58] sm:$0xff]  ;;  %v8382_v43 = vld [vmem:[#allocation5 + $0x20] sm:$0xff]   ;;  %v9022_v44 = vpack.c.bf16 %v9008_v37, %v9000_v34  ;;  %v414_v33 = vsel %vm396_vm4, %v381_v28, %v365_v26  ;;  %v9168_v35 = vpack.c.bf16 %v397_v58, %v413_v38  ;;  %v10861_v26 = vrot.slane %v8976_v22, 7  ;;  %p8635_p3 = pneg %p8634_p1 }
  0x76   : > { %v8383_v45 = vld [vmem:[#allocation5 + $0x28] sm:$0xff]   ;;  %v9026_v46 = vpack.c.bf16 %v9017_v42, %v9014_v41  ;;  %v9029_v47 = vld [vmem:[%s8934_s21 + $0x60] sm:$0xff]  ;;  %v9037_v50 = vld [vmem:[%s8934_s21 + $0x70] sm:$0xff]  ;;  %v9170_v21 = vpack.c.bf16 %v398_v40, %v414_v33  ;;  %v10863_v40 = vrot.slane %v8989_v27, 7  ;;  %v10864_v58 = vrot.slane %v8984_v25, 7 }
  0x77   : > { %v9032_v48 = vld [vmem:[%s8934_s21 + $0x68] sm:$0xff]  ;;  %v9040_v51 = vld [vmem:[%s8934_s21 + $0x78] sm:$0xff]  ;;  %v8384_v52 = vld [vmem:[#allocation5 + $0x30] sm:$0xff]   ;;  %v399_v28 = vsel %vm396_vm4, %v10861_v26, %v382_v31  ;;  %v10862_v33 = vmov %v10861_v26  ;;  %vm501_vm6 = vcmp.lt.s32.totalorder %v8946_v3, 7 }
  0x78   : > { %6924 = vmatpush3.bf16.msra.mxu0 %v8372_v6  ;;  %10849 = vst [vmem:[#allocation12_spill] sm:$0xff] %v9026_v46  ;;  %v9045_v53 = vpack.c.bf16 %v9032_v48, %v9029_v47  ;;  %v8385_v54 = vld [vmem:[#allocation5 + $0x38] sm:$0xff]   ;;  %v9049_v55 = vpack.c.bf16 %v9040_v51, %v9037_v50  ;;  %v9052_v56 = vld [vmem:[%s8934_s21 + $0x80] sm:$0xff]  ;;  %v9055_v57 = vld [vmem:[%s8934_s21 + $0x88] sm:$0xff]  ;;  %v387_v4 = vrot.slane %v9040_v51, 7  ;;  %v415_v38 = vsel %vm396_vm4, %v382_v31, %v10862_v33 }
  0x79   : > { %6925 = vmatprep.subr.bf16.mxu0 %v8373_v7  ;;  %v9060_v59 = vld [vmem:[%s8934_s21 + $0x90] sm:$0xff]  ;;  %v9063_v60 = vld [vmem:[%s8934_s21 + $0x98] sm:$0xff]  ;;  %v8386_v61 = vld [vmem:[#allocation5 + $0x80] sm:$0xff]   ;;  %v9068_v62 = vpack.c.bf16 %v9055_v57, %v9052_v56  ;;  %v388_v24 = vrot.slane %v9055_v57, 7 }
  0x7a   : > { %10850 = vst [vmem:[#allocation13_spill] sm:$0xff] %v9045_v53  ;;  %10851 = vst [vmem:[#allocation14_spill] sm:$0xff] %v9049_v55  ;;  %v9072_v63 = vpack.c.bf16 %v9063_v60, %v9060_v59  ;;  %v9075_v1 = vld [vmem:[%s8934_s21 + $0xa0] sm:$0xff]  ;;  %v9078_v2 = vld [vmem:[%s8934_s21 + $0xa8] sm:$0xff]  ;;  %v373_v33 = vrot.slane %v9060_v59, 7 }
  0x7b   : > { %10852 = vst [vmem:[#allocation15_spill] sm:$0xff] %v9068_v62  ;;  %v9083_v5 = vld [vmem:[%s8934_s21 + $0xb0] sm:$0xff]  ;;  %v9086_v6 = vld [vmem:[%s8934_s21 + $0xb8] sm:$0xff]  ;;  %vm9139_vm5 = vmpackc.low %vm8712_vm1, %vm362_vm3 }
  0x7c   : > { %6926 = vmatpush3.bf16.msra.mxu0 %v8373_v7  ;;  %10853 = vst [vmem:[#allocation16_spill] sm:$0xff] %v9072_v63  ;;  %v9091_v7 = vpack.c.bf16 %v9078_v2, %v9075_v1  ;;  %v8387_v30 = vld [vmem:[#allocation5 + $0x88] sm:$0xff]   ;;  %v8462_v3 = vld [vmem:[#allocation7 + $0xa0] sm:$0xff]  }
  0x7d   : > { %6927 = vmatprep.subr.bf16.mxu0 %v8374_v9  ;;  %v8510_v49 = vld [vmem:[#allocation7 + $0x220] sm:$0xff]  }
  0x7e   : > { %10854 = vst [vmem:[#allocation17_spill] sm:$0xff] %v9091_v7 }
  0x80   : > { %6928 = vmatpush3.bf16.msra.mxu0 %v8374_v9  ;;  %v9095_v9 = vpack.c.bf16 %v9086_v6, %v9083_v5 }
  0x81   : > { %6929 = vmatprep.subr.bf16.mxu0 %v8375_v10 }
  0x82   : > { %10855 = vst [vmem:[#allocation18_spill] sm:$0xff] %v9095_v9 }
  0x84   : > { %6930 = vmatpush3.bf16.msra.mxu0 %v8375_v10  ;;  %v9098_v10 = vld [vmem:[%s8934_s21 + $0xc0] sm:$0xff] }
  0x85   : > { %6931 = vmatprep.subr.bf16.mxu0 %v8376_v11 }
  0x88   : > { %6932 = vmatpush3.bf16.msra.mxu0 %v8376_v11  ;;  %v9101_v11 = vld [vmem:[%s8934_s21 + $0xc8] sm:$0xff] }
  0x89   : > { %6933 = vmatprep.subr.bf16.mxu0 %v8377_v12 }
  0x8c   : > { %6934 = vmatpush3.bf16.msra.mxu0 %v8377_v12  ;;  %v372_v12 = vrot.slane %v9052_v56, 7 }
  0x8d   : > { %6967 = vmatprep.subr.bf16.mxu0 %v8378_v15 }
  0x8f   : > { %6936 = vmatmul.mubr.bf16.vlgmr.msra.gmra.mrb[0].mxu0 %v8968_v18 }
  0x90   : > { %6968 = vmatpush3.bf16.msra.mxu0 %v8378_v15  ;;  %6939 = vmatprep.mubr.bf16.mxu0 %v8972_v19  ;;  %v9106_v15 = vld [vmem:[%s8934_s21 + $0xd0] sm:$0xff] }
  0x91   : > { %6969 = vmatprep.subr.bf16.mxu0 %v8379_v20 }
  0x94   : > { %6970 = vmatpush3.bf16.msra.mxu0 %v8379_v20  ;;  %v9109_v20 = vld [vmem:[%s8934_s21 + $0xd8] sm:$0xff] }
  0x95   : > { %6971 = vmatprep.subr.bf16.mxu0 %v8380_v29 }
  0x97   : > { %6940 = vmatmul.mubr.bf16.gmra.mrb[4].mxu0 %v8996_v32 }
  0x98   : > { %6943 = vmatprep.mubr.bf16.mxu0 %v9005_v36  ;;  %6972 = vmatpush3.bf16.msra.mxu0 %v8380_v29  ;;  %v9114_v29 = vpack.c.bf16 %v9101_v11, %v9098_v10 }
  0x99   : > { %6973 = vmatprep.subr.bf16.mxu0 %v8381_v39 }
  0x9a   : > { %10856 = vst [vmem:[#allocation19_spill] sm:$0xff] %v9114_v29 }
  0x9c   : > { %6974 = vmatpush3.bf16.msra.mxu0 %v8381_v39  ;;  %v9118_v39 = vpack.c.bf16 %v9109_v20, %v9106_v15 }
  0x9d   : > { %6975 = vmatprep.subr.bf16.mxu0 %v8382_v43 }
  0x9e   : > { %10857 = vst [vmem:[#allocation20_spill] sm:$0xff] %v9118_v39 }
  0x9f   : > { %6944 = vmatmul.mubr.bf16.gmra.mrb[8].mxu0 %v9022_v44 }
  0xa0   : > { %6947 = vmatprep.mubr.bf16.mxu0 %v9026_v46  ;;  %6976 = vmatpush3.bf16.msra.mxu0 %v8382_v43  ;;  %v9123_v43 = vld [vmem:[%s8934_s21 + $0xe0] sm:$0xff] }
  0xa1   : > { %6977 = vmatprep.subr.bf16.mxu0 %v8383_v45 }
  0xa4   : > { %6978 = vmatpush3.bf16.msra.mxu0 %v8383_v45  ;;  %v371_v45 = vrot.slane %v9037_v50, 7 }
  0xa5   : > { %6979 = vmatprep.subr.bf16.mxu0 %v8384_v52 }
  0xa7   : > { %6948 = vmatmul.mubr.bf16.gmra.mrb[12].mxu0 %v9045_v53  ;;  %v8393_v53 = vld [vmem:[#allocation5 + $0xb8] sm:$0xff]  }
  0xa8   : > { %6951 = vmatprep.mubr.bf16.mxu0 %v9049_v55  ;;  %6980 = vmatpush3.bf16.msra.mxu0 %v8384_v52  ;;  %v9128_v52 = vld [vmem:[%s8934_s21 + $0xe8] sm:$0xff] }
  0xa9   : > { %6981 = vmatprep.subr.bf16.mxu0 %v8385_v54  ;;  %v8391_v55 = vld [vmem:[#allocation5 + $0xa8] sm:$0xff]  }
  0xac   : > { %6982 = vmatpush3.bf16.msra.mxu0 %v8385_v54  ;;  %v9133_v54 = vpack.c.bf16 %v9128_v52, %v9123_v43 }
  0xad   : > { %7015 = vmatprep.subr.bf16.mxu0 %v8386_v61 }
  0xae   : > { %10858 = vst [vmem:[#allocation21_spill] sm:$0xff] %v9133_v54 }
  0xaf   : > { %6952 = vmatmul.mubr.bf16.gmra.mrb[16].mxu0 %v9068_v62 }
  0xb0   : > { %6955 = vmatprep.mubr.bf16.mxu0 %v9072_v63 }
  0xb7   : > { %6956 = vmatmul.mubr.bf16.gmra.mrb[20].mxu0 %v9091_v7 }
  0xb8   : > { %6959 = vmatprep.mubr.bf16.mxu0 %v9095_v9  ;;  %v8389_v9 = vld [vmem:[#allocation5 + $0x98] sm:$0xff]  }
  0xbf   : > { %6960 = vmatmul.mubr.bf16.gmra.mrb[24].mxu0 %v9114_v29  ;;  %v9203_v29 = vpack.c.bf16 %v399_v28, %v415_v38 }
  0xc0   : > { %6963 = vmatprep.mubr.bf16.mxu0 %v9118_v39  ;;  %v10866_v39 = vmov %v10863_v40 }
  0xc7   : > { %6964 = vmatmul.mubr.bf16.gmra.mrb[28].mxu0 %v9133_v54  ;;  %v10865_v54 = vmov %v10864_v58 }
  0xc8   : > { %6983 = vmatprep.mubr.bf16.mxu0 %v10793_v0  ;;  %v8388_v0 = vld [vmem:[#allocation5 + $0x90] sm:$0xff]   ;;  %v416_v26 = vsel %vm396_vm4, %v10866_v39, %v10865_v54  ;;  %v10867_v39 = vrot.slane %v9008_v37, 7  ;;  %v10868_v54 = vrot.slane %v9000_v34, 7 }
  0xca   : > { %v10869_v28 = vmov %v10868_v54  ;;  %v10870_v38 = vmov %v10867_v39 }
  0xcf   : > { %6984 = vmatmul.mubr.msk.bf16.vlgmr.msra.gmra.mrb[0].mxu0 %vm9139_vm5, %v9168_v35 }
  0xd0   : > { %7016 = vmatpush3.bf16.msra.mxu0 %v8386_v61  ;;  %6987 = vmatprep.mubr.msk.bf16.mxu0 %vm9139_vm5, %v9170_v21  ;;  %v400_v61 = vsel %vm396_vm4, %v10864_v58, %v10863_v40  ;;  %v8390_v40 = vld [vmem:[#allocation5 + $0xa0] sm:$0xff]   ;;  %v417_v58 = vsel %vm396_vm4, %v10870_v38, %v10869_v28  ;;  %v8392_v38 = vld [vmem:[#allocation5 + $0xb0] sm:$0xff]  }
  0xd1   : > { %7017 = vmatprep.subr.bf16.mxu0 %v8387_v30  ;;  %v9205_v31 = vpack.c.bf16 %v400_v61, %v416_v26  ;;  %v10871_v61 = vrot.slane %v9017_v42, 7  ;;  %v10872_v26 = vrot.slane %v9014_v41, 7 }
  0xd3   : > { %v402_v7 = vsel %vm396_vm4, %v10872_v26, %v10871_v61  ;;  %v10873_v63 = vmov %v10872_v26  ;;  %v10874_v62 = vmov %v10871_v61  ;;  %v404_v61 = vsel %vm396_vm4, %v371_v45, %v387_v4 }
  0xd4   : > { %7018 = vmatpush3.bf16.msra.mxu0 %v8387_v30  ;;  %v401_v30 = vsel %vm396_vm4, %v10868_v54, %v10867_v39  ;;  %v418_v39 = vsel %vm396_vm4, %v10874_v62, %v10873_v63  ;;  %v10875_v62 = vrot.slane %v9032_v48, 7  ;;  %v10876_v63 = vrot.slane %v9029_v47, 7 }
  0xd5   : > { %7019 = vmatprep.subr.bf16.mxu0 %v8388_v0  ;;  %v9238_v54 = vpack.c.bf16 %v401_v30, %v417_v58  ;;  %v9240_v28 = vpack.c.bf16 %v402_v7, %v418_v39  ;;  %v420_v26 = vsel %vm396_vm4, %v387_v4, %v371_v45  ;;  %v421_v4 = vsel %vm396_vm4, %v388_v24, %v372_v12 }
  0xd6   : > { %v403_v7 = vsel %vm396_vm4, %v10876_v63, %v10875_v62  ;;  %v10878_v30 = vmov %v10875_v62  ;;  %v9267_v46 = vpack.c.bf16 %v404_v61, %v420_v26  ;;  %v8394_v62 = vld [vmem:[#allocation5 + $0xc0] sm:$0xff]   ;;  %v376_v61 = vrot.slane %v9098_v10, 7 }
  0xd7   : > { %6988 = vmatmul.mubr.msk.bf16.gmra.mrb[4].mxu0 %vm9139_vm5, %v9203_v29  ;;  %v392_v26 = vrot.slane %v9101_v11, 7 }
  0xd8   : > { %6991 = vmatprep.mubr.msk.bf16.mxu0 %vm9139_vm5, %v9205_v31  ;;  %7020 = vmatpush3.bf16.msra.mxu0 %v8388_v0  ;;  %v389_v0 = vrot.slane %v9063_v60, 7 }
  0xd9   : > { %7021 = vmatprep.subr.bf16.mxu0 %v8389_v9 }
  0xda   : > { %v406_v45 = vsel %vm396_vm4, %v373_v33, %v389_v0 }
  0xdc   : > { %7022 = vmatpush3.bf16.msra.mxu0 %v8389_v9  ;;  %v10877_v9 = vmov %v10876_v63 }
  0xdd   : > { %7023 = vmatprep.subr.bf16.mxu0 %v8390_v40  ;;  %v419_v58 = vsel %vm396_vm4, %v10878_v30, %v10877_v9  ;;  %v390_v9 = vrot.slane %v9078_v2, 7 }
  0xde   : > { %v9265_v39 = vpack.c.bf16 %v403_v7, %v419_v58  ;;  %v374_v7 = vrot.slane %v9075_v1, 7 }
  0xdf   : > { %6992 = vmatmul.mubr.msk.bf16.gmra.mrb[8].mxu0 %vm9139_vm5, %v9238_v54 }
  0xe0   : > { %6995 = vmatprep.mubr.msk.bf16.mxu0 %vm9139_vm5, %v9240_v28  ;;  %7024 = vmatpush3.bf16.msra.mxu0 %v8390_v40  ;;  %v405_v40 = vsel %vm396_vm4, %v372_v12, %v388_v24  ;;  %v375_v12 = vrot.slane %v9083_v5, 7  ;;  %v391_v24 = vrot.slane %v9086_v6, 7 }
  0xe1   : > { %7025 = vmatprep.subr.bf16.mxu0 %v8391_v55  ;;  %v9283_v63 = vpack.c.bf16 %v405_v40, %v421_v4  ;;  %v377_v4 = vrot.slane %v9106_v15, 7 }
  0xe4   : > { %7026 = vmatpush3.bf16.msra.mxu0 %v8391_v55  ;;  %v422_v55 = vsel %vm396_vm4, %v389_v0, %v373_v33  ;;  %v407_v33 = vsel %vm396_vm4, %v374_v7, %v390_v9  ;;  %v423_v0 = vsel %vm396_vm4, %v390_v9, %v374_v7  ;;  %v425_v7 = vsel %vm396_vm4, %v392_v26, %v376_v61 }
  0xe5   : > { %7027 = vmatprep.subr.bf16.mxu0 %v8392_v38  ;;  %v9287_v30 = vpack.c.bf16 %v406_v45, %v422_v55  ;;  %v9305_v58 = vpack.c.bf16 %v407_v33, %v423_v0  ;;  %v393_v45 = vrot.slane %v9109_v20, 7  ;;  %v409_v55 = vsel %vm396_vm4, %v376_v61, %v392_v26 }
  0xe6   : > { %v378_v33 = vrot.slane %v9123_v43, 7  ;;  %v394_v0 = vrot.slane %v9128_v52, 7 }
  0xe7   : > { %6996 = vmatmul.mubr.msk.bf16.gmra.mrb[12].mxu0 %vm9139_vm5, %v9265_v39  ;;  %v410_v9 = vsel %vm396_vm4, %v377_v4, %v393_v45 }
  0xe8   : > { %6999 = vmatprep.mubr.msk.bf16.mxu0 %vm9139_vm5, %v9267_v46  ;;  %7028 = vmatpush3.bf16.msra.mxu0 %v8392_v38  ;;  %v424_v38 = vsel %vm396_vm4, %v391_v24, %v375_v12  ;;  %v427_v61 = vsel %vm396_vm4, %v394_v0, %v378_v33 }
  0xe9   : > { %7029 = vmatprep.subr.bf16.mxu0 %v8393_v53 }
  0xec   : > { %7030 = vmatpush3.bf16.msra.mxu0 %v8393_v53  ;;  %v408_v53 = vsel %vm396_vm4, %v375_v12, %v391_v24  ;;  %v426_v12 = vsel %vm396_vm4, %v393_v45, %v377_v4  ;;  %v9327_v24 = vpack.c.bf16 %v409_v55, %v425_v7  ;;  %v469_v4 = vrot.slane %v8955_v13, 1 }
  0xed   : > { %7063 = vmatprep.subr.bf16.mxu0 %v8394_v62  ;;  %v9309_v40 = vpack.c.bf16 %v408_v53, %v424_v38  ;;  %v9331_v53 = vpack.c.bf16 %v410_v9, %v426_v12  ;;  %v411_v38 = vsel %vm396_vm4, %v378_v33, %v394_v0  ;;  %v485_v45 = vrot.slane %v8958_v14, 1 }
  0xee   : > { %v9343_v26 = vpack.c.bf16 %v411_v38, %v427_v61  ;;  %v470_v55 = vrot.slane %v8961_v16, 1  ;;  %v486_v7 = vrot.slane %v8964_v17, 1  ;;  %v10879_v33 = vmov 0.0|0.0  }
  0xef   : > { %7000 = vmatmul.mubr.msk.bf16.gmra.mrb[16].mxu0 %vm9139_vm5, %v9283_v63  ;;  %v502_v9 = vsel %vm501_vm6, %v469_v4, %v485_v45  ;;  %v518_v12 = vsel %vm501_vm6, %v485_v45, %v469_v4  ;;  %v471_v17 = vrot.slane %v8976_v22, 1  ;;  %v487_v0 = vrot.slane %v8979_v23, 1  ;;  %v8395_v45 = vld [vmem:[#allocation5 + $0xc8] sm:$0xff]  }
  0xf0   : > { %7003 = vmatprep.mubr.msk.bf16.mxu0 %vm9139_vm5, %v9287_v30  ;;  %v503_v13 = vsel %vm501_vm6, %v470_v55, %v486_v7  ;;  %v519_v14 = vsel %vm501_vm6, %v486_v7, %v470_v55  ;;  %v9362_v16 = vpack.c.bf16 %v518_v12, %v502_v9  ;;  %v472_v61 = vrot.slane %v8984_v25, 1  ;;  %v8396_v55 = vld [vmem:[#allocation5 + $0xd0] sm:$0xff]  }
  0xf1   : > { %v9366_v38 = vpack.c.bf16 %v519_v14, %v503_v13  ;;  %v488_v4 = vrot.slane %v8989_v27, 1  ;;  %v504_v22 = vsel %vm501_vm6, %v471_v17, %v487_v0  ;;  %v520_v23 = vsel %vm501_vm6, %v487_v0, %v471_v17  ;;  %v8397_v17 = vld [vmem:[#allocation5 + $0xd8] sm:$0xff]   ;;  %v8398_v0 = vld [vmem:[#allocation5 + $0xe0] sm:$0xff]  }
  0xf2   : > { %v9384_v7 = vpack.c.bf16 %v520_v23, %v504_v22  ;;  %v489_v9 = vrot.slane %v9008_v37, 1  ;;  %v474_v13 = vrot.slane %v9014_v41, 1  ;;  %v490_v14 = vrot.slane %v9017_v42, 1 }
  0xf3   : > { %v505_v25 = vsel %vm501_vm6, %v472_v61, %v488_v4  ;;  %v521_v27 = vsel %vm501_vm6, %v488_v4, %v472_v61  ;;  %v475_v4 = vrot.slane %v9029_v47, 1  ;;  %v476_v23 = vrot.slane %v9037_v50, 1 }
  0xf4   : > { %v9388_v12 = vpack.c.bf16 %v521_v27, %v505_v25  ;;  %v507_v41 = vsel %vm501_vm6, %v474_v13, %v490_v14  ;;  %v523_v42 = vsel %vm501_vm6, %v490_v14, %v474_v13  ;;  %v492_v25 = vrot.slane %v9040_v51, 1  ;;  %v8399_v27 = vld [vmem:[#allocation5 + $0xe8] sm:$0xff]  }
  0xf5   : > { %v9410_v22 = vpack.c.bf16 %v523_v42, %v507_v41  ;;  %v493_v13 = vrot.slane %v9055_v57, 1  ;;  %v8402_v41 = vld [vmem:[#allocation5 + $0x100] sm:$0xff]  }
  0xf6   : > { %v509_v50 = vsel %vm501_vm6, %v476_v23, %v492_v25  ;;  %v525_v51 = vsel %vm501_vm6, %v492_v25, %v476_v23  ;;  %v480_v23 = vrot.slane %v9083_v5, 1  ;;  %v496_v25 = vrot.slane %v9086_v6, 1 }
  0xf7   : > { %7004 = vmatmul.mubr.msk.bf16.gmra.mrb[20].mxu0 %vm9139_vm5, %v9305_v58  ;;  %v9432_v14 = vpack.c.bf16 %v525_v51, %v509_v50  ;;  %v482_v51 = vrot.slane %v9106_v15, 1 }
  0xf8   : > { %7007 = vmatprep.mubr.msk.bf16.mxu0 %vm9139_vm5, %v9309_v40  ;;  %v513_v5 = vsel %vm501_vm6, %v480_v23, %v496_v25  ;;  %v529_v6 = vsel %vm501_vm6, %v496_v25, %v480_v23  ;;  %v9555_v23 = vld [vmem:[%s8934_s21 + $0xf0] sm:$0xff]  ;;  %v9558_v25 = vld [vmem:[%s8934_s21 + $0xf8] sm:$0xff] }
  0xf9   : > { %v9476_v50 = vpack.c.bf16 %v529_v6, %v513_v5 }
  0xff   : > { %7008 = vmatmul.mubr.msk.bf16.gmra.mrb[24].mxu0 %vm9139_vm5, %v9327_v24 }
 0x100   : > { %7011 = vmatprep.mubr.msk.bf16.mxu0 %vm9139_vm5, %v9331_v53 }
 0x107   : > { %7012 = vmatmul.mubr.msk.bf16.gmra.mrb[28].mxu0 %vm9139_vm5, %v9343_v26 }
 0x108   : > { %7031 = vmatprep.mubr.bf16.mxu0 %v10879_v33 }
 0x10f   : > { %7032 = vmatmul.mubr.msk.bf16.vlgmr.msra.gmra.mrb[0].mxu0 %vm8950_vm2, %v9362_v16 }
 0x110   : > { %7064 = vmatpush3.bf16.msra.mxu0 %v8394_v62  ;;  %7035 = vmatprep.mubr.msk.bf16.mxu0 %vm8950_vm2, %v9366_v38  ;;  %v473_v62 = vrot.slane %v9000_v34, 1 }
 0x111   : > { %7065 = vmatprep.subr.bf16.mxu0 %v8395_v45 }
 0x112   : > { %v506_v34 = vsel %vm501_vm6, %v473_v62, %v489_v9  ;;  %v522_v37 = vsel %vm501_vm6, %v489_v9, %v473_v62  ;;  %v477_v9 = vrot.slane %v9052_v56, 1 }
 0x113   : > { %v9406_v61 = vpack.c.bf16 %v522_v37, %v506_v34  ;;  %v494_v34 = vrot.slane %v9063_v60, 1  ;;  %v8401_v37 = vld [vmem:[#allocation5 + $0xf8] sm:$0xff]  }
 0x114   : > { %7066 = vmatpush3.bf16.msra.mxu0 %v8395_v45  ;;  %v491_v45 = vrot.slane %v9032_v48, 1  ;;  %v510_v56 = vsel %vm501_vm6, %v477_v9, %v493_v13  ;;  %v526_v57 = vsel %vm501_vm6, %v493_v13, %v477_v9  ;;  %v483_v13 = vrot.slane %v9123_v43, 1  ;;  %v8403_v43 = vld [vmem:[#allocation5 + $0x108] sm:$0xff]  }
 0x115   : > { %7067 = vmatprep.subr.bf16.mxu0 %v8396_v55  ;;  %v9450_v42 = vpack.c.bf16 %v526_v57, %v510_v56 }
 0x116   : > { %v508_v47 = vsel %vm501_vm6, %v475_v4, %v491_v45  ;;  %v524_v48 = vsel %vm501_vm6, %v491_v45, %v475_v4  ;;  %v495_v4 = vrot.slane %v9078_v2, 1 }
 0x117   : > { %7036 = vmatmul.mubr.msk.bf16.gmra.mrb[4].mxu0 %vm8950_vm2, %v9384_v7  ;;  %v9428_v62 = vpack.c.bf16 %v524_v48, %v508_v47  ;;  %v481_v47 = vrot.slane %v9098_v10, 1  ;;  %v497_v48 = vrot.slane %v9101_v11, 1 }
 0x118   : > { %7039 = vmatprep.mubr.msk.bf16.mxu0 %vm8950_vm2, %v9388_v12  ;;  %7068 = vmatpush3.bf16.msra.mxu0 %v8396_v55  ;;  %v8400_v55 = vld [vmem:[#allocation5 + $0xf0] sm:$0xff]  }
 0x119   : > { %7069 = vmatprep.subr.bf16.mxu0 %v8397_v17  ;;  %v514_v9 = vsel %vm501_vm6, %v481_v47, %v497_v48  ;;  %v530_v10 = vsel %vm501_vm6, %v497_v48, %v481_v47  ;;  %v8411_v48 = vld [vmem:[#allocation5 + $0x148] sm:$0xff]  }
 0x11c   : > { %7070 = vmatpush3.bf16.msra.mxu0 %v8397_v17  ;;  %v478_v17 = vrot.slane %v9060_v59, 1 }
 0x11d   : > { %7071 = vmatprep.subr.bf16.mxu0 %v8398_v0 }
 0x11e   : > { %v511_v59 = vsel %vm501_vm6, %v478_v17, %v494_v34  ;;  %v527_v60 = vsel %vm501_vm6, %v494_v34, %v478_v17  ;;  %v499_v17 = vrot.slane %v9128_v52, 1  ;;  %v8404_v52 = vld [vmem:[#allocation5 + $0x110] sm:$0xff]  }
 0x11f   : > { %7040 = vmatmul.mubr.msk.bf16.gmra.mrb[8].mxu0 %vm8950_vm2, %v9406_v61  ;;  %v9454_v45 = vpack.c.bf16 %v527_v60, %v511_v59  ;;  %v8405_v59 = vld [vmem:[#allocation5 + $0x118] sm:$0xff]   ;;  %v8407_v60 = vld [vmem:[#allocation5 + $0x128] sm:$0xff]  }
 0x120   : > { %7043 = vmatprep.mubr.msk.bf16.mxu0 %vm8950_vm2, %v9410_v22  ;;  %7072 = vmatpush3.bf16.msra.mxu0 %v8398_v0  ;;  %v479_v0 = vrot.slane %v9075_v1, 1  ;;  %v532_v56 = vsel %vm501_vm6, %v499_v17, %v483_v13 }
 0x121   : > { %7073 = vmatprep.subr.bf16.mxu0 %v8399_v27 }
 0x122   : > { %v512_v1 = vsel %vm501_vm6, %v479_v0, %v495_v4  ;;  %v528_v2 = vsel %vm501_vm6, %v495_v4, %v479_v0  ;;  %v8409_v0 = vld [vmem:[#allocation5 + $0x138] sm:$0xff]   ;;  %v8410_v4 = vld [vmem:[#allocation5 + $0x140] sm:$0xff]  }
 0x124   : > { %7074 = vmatpush3.bf16.msra.mxu0 %v8399_v27  ;;  %v9472_v27 = vpack.c.bf16 %v528_v2, %v512_v1  ;;  %v379_v1 = vrot.slane %v9555_v23, 7  ;;  %v395_v2 = vrot.slane %v9558_v25, 7 }
 0x125   : > { %7075 = vmatprep.subr.bf16.mxu0 %v8400_v55 }
 0x126   : > { %v412_v5 = vsel %vm396_vm4, %v379_v1, %v395_v2  ;;  %v428_v6 = vsel %vm396_vm4, %v395_v2, %v379_v1  ;;  %v8420_v1 = vld [vmem:[#allocation5 + $0x190] sm:$0xff]   ;;  %v8421_v2 = vld [vmem:[#allocation5 + $0x198] sm:$0xff]  }
 0x127   : > { %7044 = vmatmul.mubr.msk.bf16.gmra.mrb[12].mxu0 %vm8950_vm2, %v9428_v62  ;;  %v9572_v47 = vpack.c.bf16 %v412_v5, %v428_v6  ;;  %v8423_v5 = vld [vmem:[#allocation5 + $0x1a8] sm:$0xff]   ;;  %v8424_v6 = vld [vmem:[#allocation5 + $0x1b0] sm:$0xff]  }
 0x128   : > { %7047 = vmatprep.mubr.msk.bf16.mxu0 %vm8950_vm2, %v9432_v14  ;;  %7076 = vmatpush3.bf16.msra.mxu0 %v8400_v55  ;;  %v498_v55 = vrot.slane %v9109_v20, 1  ;;  %v9494_v20 = vpack.c.bf16 %v530_v10, %v514_v9  ;;  %v8414_v9 = vld [vmem:[#allocation5 + $0x160] sm:$0xff]  }
 0x129   : > { %7077 = vmatprep.subr.bf16.mxu0 %v8401_v37  ;;  %v10880_v10 = vld [vmem:[#allocation12_spill] sm:$0xff] }
 0x12a   : > { %v515_v11 = vsel %vm501_vm6, %v482_v51, %v498_v55  ;;  %v531_v15 = vsel %vm501_vm6, %v498_v55, %v482_v51  ;;  %v8412_v51 = vld [vmem:[#allocation5 + $0x150] sm:$0xff]   ;;  %v8413_v55 = vld [vmem:[#allocation5 + $0x158] sm:$0xff]  }
 0x12b   : > { %v9498_v34 = vpack.c.bf16 %v531_v15, %v515_v11  ;;  %v10881_v11 = vld [vmem:[#allocation13_spill] sm:$0xff]  ;;  %v8416_v15 = vld [vmem:[#allocation5 + $0x170] sm:$0xff]  }
 0x12c   : > { %7078 = vmatpush3.bf16.msra.mxu0 %v8401_v37  ;;  %v516_v37 = vsel %vm501_vm6, %v483_v13, %v499_v17  ;;  %v8417_v13 = vld [vmem:[#allocation5 + $0x178] sm:$0xff]   ;;  %v10882_v17 = vld [vmem:[#allocation14_spill] sm:$0xff] }
 0x12d   : > { %7111 = vmatprep.subr.bf16.mxu0 %v8402_v41  ;;  %v9510_v57 = vpack.c.bf16 %v532_v56, %v516_v37  ;;  %v10883_v37 = vld [vmem:[#allocation15_spill] sm:$0xff]  ;;  %v8418_v56 = vld [vmem:[#allocation5 + $0x180] sm:$0xff]  }
 0x12f   : > { %7048 = vmatmul.mubr.msk.bf16.gmra.mrb[16].mxu0 %vm8950_vm2, %v9450_v42 }
 0x130   : > { %7051 = vmatprep.mubr.msk.bf16.mxu0 %vm8950_vm2, %v9454_v45 }
 0x137   : > { %7052 = vmatmul.mubr.msk.bf16.gmra.mrb[20].mxu0 %vm8950_vm2, %v9472_v27 }
 0x138   : > { %7055 = vmatprep.mubr.msk.bf16.mxu0 %vm8950_vm2, %v9476_v50 }
 0x13f   : > { %7056 = vmatmul.mubr.msk.bf16.gmra.mrb[24].mxu0 %vm8950_vm2, %v9494_v20 }
 0x140   : > { %7059 = vmatprep.mubr.msk.bf16.mxu0 %vm8950_vm2, %v9498_v34 }
 0x147   : > { %7060 = vmatmul.mubr.msk.bf16.gmra.mrb[28].mxu0 %vm8950_vm2, %v9510_v57 }
 0x148   : > { %7079 = vmatprep.mubr.msk.bf16.mxu0 %vm9139_vm5, %v9168_v35  ;;  %v8406_v35 = vld [vmem:[#allocation5 + $0x120] sm:$0xff]  }
 0x14f   : > { %7080 = vmatmul.mubr.msk.bf16.vlgmr.msra.gmra.mrb[0].mxu0 %vm9139_vm5, %v9170_v21 }
 0x150   : > { %7112 = vmatpush3.bf16.msra.mxu0 %v8402_v41  ;;  %7083 = vmatprep.mubr.msk.bf16.mxu0 %vm9139_vm5, %v9203_v29  ;;  %v8408_v41 = vld [vmem:[#allocation5 + $0x130] sm:$0xff]  }
 0x151   : > { %7113 = vmatprep.subr.bf16.mxu0 %v8403_v43 }
 0x154   : > { %7114 = vmatpush3.bf16.msra.mxu0 %v8403_v43  ;;  %v10884_v43 = vld [vmem:[#allocation16_spill] sm:$0xff] }
 0x155   : > { %7115 = vmatprep.subr.bf16.mxu0 %v8404_v52 }
 0x157   : > { %7084 = vmatmul.mubr.msk.bf16.gmra.mrb[4].mxu0 %vm9139_vm5, %v9205_v31 }
 0x158   : > { %7087 = vmatprep.mubr.msk.bf16.mxu0 %vm9139_vm5, %v9238_v54  ;;  %7116 = vmatpush3.bf16.msra.mxu0 %v8404_v52  ;;  %v10885_v52 = vld [vmem:[#allocation17_spill] sm:$0xff] }
 0x159   : > { %7117 = vmatprep.subr.bf16.mxu0 %v8405_v59 }
 0x15c   : > { %7118 = vmatpush3.bf16.msra.mxu0 %v8405_v59  ;;  %v10886_v59 = vld [vmem:[#allocation18_spill] sm:$0xff] }
 0x15d   : > { %7119 = vmatprep.subr.bf16.mxu0 %v8406_v35 }
 0x15f   : > { %7088 = vmatmul.mubr.msk.bf16.gmra.mrb[8].mxu0 %vm9139_vm5, %v9240_v28 }
 0x160   : > { %7091 = vmatprep.mubr.msk.bf16.mxu0 %vm9139_vm5, %v9265_v39  ;;  %7120 = vmatpush3.bf16.msra.mxu0 %v8406_v35  ;;  %v10887_v35 = vld [vmem:[#allocation19_spill] sm:$0xff] }
 0x161   : > { %7121 = vmatprep.subr.bf16.mxu0 %v8407_v60 }
 0x164   : > { %7122 = vmatpush3.bf16.msra.mxu0 %v8407_v60  ;;  %v10888_v60 = vld [vmem:[#allocation20_spill] sm:$0xff] }
 0x165   : > { %7123 = vmatprep.subr.bf16.mxu0 %v8408_v41 }
 0x167   : > { %7092 = vmatmul.mubr.msk.bf16.gmra.mrb[12].mxu0 %vm9139_vm5, %v9267_v46 }
 0x168   : > { %7095 = vmatprep.mubr.msk.bf16.mxu0 %vm9139_vm5, %v9283_v63  ;;  %7124 = vmatpush3.bf16.msra.mxu0 %v8408_v41  ;;  %v10889_v41 = vld [vmem:[#allocation21_spill] sm:$0xff] }
 0x169   : > { %7125 = vmatprep.subr.bf16.mxu0 %v8409_v0 }
 0x16c   : > { %7126 = vmatpush3.bf16.msra.mxu0 %v8409_v0  ;;  %v9594_v0 = vpack.c.bf16 %v9558_v25, %v9555_v23 }
 0x16d   : > { %7159 = vmatprep.subr.bf16.mxu0 %v8410_v4 }
 0x16f   : > { %7096 = vmatmul.mubr.msk.bf16.gmra.mrb[16].mxu0 %vm9139_vm5, %v9287_v30 }
 0x170   : > { %7099 = vmatprep.mubr.msk.bf16.mxu0 %vm9139_vm5, %v9305_v58 }
 0x177   : > { %7100 = vmatmul.mubr.msk.bf16.gmra.mrb[20].mxu0 %vm9139_vm5, %v9309_v40 }
 0x178   : > { %7103 = vmatprep.mubr.msk.bf16.mxu0 %vm9139_vm5, %v9327_v24 }
 0x17f   : > { %7104 = vmatmul.mubr.msk.bf16.gmra.mrb[24].mxu0 %vm9139_vm5, %v9331_v53 }
 0x180   : > { %7107 = vmatprep.mubr.msk.bf16.mxu0 %vm9139_vm5, %v9343_v26 }
 0x187   : > { %7108 = vmatmul.mubr.msk.bf16.gmra.mrb[28].mxu0 %vm9139_vm5, %v9572_v47 }
 0x188   : > { %7127 = vmatprep.mubr.bf16.mxu0 %v8968_v18  ;;  %v8415_v18 = vld [vmem:[#allocation5 + $0x168] sm:$0xff]  }
 0x18f   : > { %7128 = vmatmul.mubr.bf16.vlgmr.msra.gmra.mrb[0].mxu0 %v8972_v19 }
 0x190   : > { %7160 = vmatpush3.bf16.msra.mxu0 %v8410_v4  ;;  %7131 = vmatprep.mubr.bf16.mxu0 %v8996_v32  ;;  %v8419_v4 = vld [vmem:[#allocation5 + $0x188] sm:$0xff]  }
 0x191   : > { %7161 = vmatprep.subr.bf16.mxu0 %v8411_v48 }
 0x194   : > { %7162 = vmatpush3.bf16.msra.mxu0 %v8411_v48  ;;  %v8425_v48 = vld [vmem:[#allocation5 + $0x1b8] sm:$0xff]  }
 0x195   : > { %7163 = vmatprep.subr.bf16.mxu0 %v8412_v51 }
 0x197   : > { %7132 = vmatmul.mubr.bf16.gmra.mrb[4].mxu0 %v9005_v36 }
 0x198   : > { %7135 = vmatprep.mubr.bf16.mxu0 %v9022_v44  ;;  %7164 = vmatpush3.bf16.msra.mxu0 %v8412_v51  ;;  %v8426_v51 = vld [vmem:[#allocation5 + $0x1c0] sm:$0xff]  }
 0x199   : > { %7165 = vmatprep.subr.bf16.mxu0 %v8413_v55 }
 0x19c   : > { %7166 = vmatpush3.bf16.msra.mxu0 %v8413_v55  ;;  %v484_v55 = vrot.slane %v9555_v23, 1  ;;  %v8427_v23 = vld [vmem:[#allocation5 + $0x1c8] sm:$0xff]  }
 0x19d   : > { %7167 = vmatprep.subr.bf16.mxu0 %v8414_v9 }
 0x19f   : > { %7136 = vmatmul.mubr.bf16.gmra.mrb[8].mxu0 %v10880_v10 }
 0x1a0   : > { %7139 = vmatprep.mubr.bf16.mxu0 %v10881_v11  ;;  %7168 = vmatpush3.bf16.msra.mxu0 %v8414_v9  ;;  %v500_v9 = vrot.slane %v9558_v25, 1  ;;  %v8428_v25 = vld [vmem:[#allocation5 + $0x1d0] sm:$0xff]  }
 0x1a1   : > { %7169 = vmatprep.subr.bf16.mxu0 %v8415_v18 }
 0x1a4   : > { %7170 = vmatpush3.bf16.msra.mxu0 %v8415_v18  ;;  %v517_v18 = vsel %vm501_vm6, %v484_v55, %v500_v9 }
 0x1a5   : > { %7171 = vmatprep.subr.bf16.mxu0 %v8416_v15 }
 0x1a7   : > { %7140 = vmatmul.mubr.bf16.gmra.mrb[12].mxu0 %v10882_v17 }
 0x1a8   : > { %7143 = vmatprep.mubr.bf16.mxu0 %v10883_v37  ;;  %7172 = vmatpush3.bf16.msra.mxu0 %v8416_v15  ;;  %v533_v15 = vsel %vm501_vm6, %v500_v9, %v484_v55 }
 0x1a9   : > { %7173 = vmatprep.subr.bf16.mxu0 %v8417_v13 }
 0x1ac   : > { %7174 = vmatpush3.bf16.msra.mxu0 %v8417_v13  ;;  %v9648_v13 = vpack.c.bf16 %v533_v15, %v517_v18  ;;  %v8451_v18 = vld [vmem:[#allocation7 + $0x8] sm:$0xff]  }
 0x1ad   : > { %7207 = vmatprep.subr.bf16.mxu0 %v8418_v56 }
 0x1af   : > { %7144 = vmatmul.mubr.bf16.gmra.mrb[16].mxu0 %v10884_v43 }
 0x1b0   : > { %7147 = vmatprep.mubr.bf16.mxu0 %v10885_v52 }
 0x1b7   : > { %7148 = vmatmul.mubr.bf16.gmra.mrb[20].mxu0 %v10886_v59 }
 0x1b8   : > { %7151 = vmatprep.mubr.bf16.mxu0 %v10887_v35 }
 0x1bf   : > { %7152 = vmatmul.mubr.bf16.gmra.mrb[24].mxu0 %v10888_v60 }
 0x1c0   : > { %7155 = vmatprep.mubr.bf16.mxu0 %v10889_v41 }
 0x1c7   : > { %7156 = vmatmul.mubr.bf16.gmra.mrb[28].mxu0 %v9594_v0 }
 0x1c8   : > { %7175 = vmatprep.mubr.msk.bf16.mxu0 %vm8950_vm2, %v9362_v16  ;;  %v8422_v16 = vld [vmem:[#allocation5 + $0x1a0] sm:$0xff]  }
 0x1cf   : > { %7176 = vmatmul.mubr.msk.bf16.vlgmr.msra.gmra.mrb[0].mxu0 %vm8950_vm2, %v9366_v38 }
 0x1d0   : > { %7208 = vmatpush3.bf16.msra.mxu0 %v8418_v56  ;;  %7179 = vmatprep.mubr.msk.bf16.mxu0 %vm8950_vm2, %v9384_v7  ;;  %v8429_v56 = vld [vmem:[#allocation5 + $0x1d8] sm:$0xff]  }
 0x1d1   : > { %7209 = vmatprep.subr.bf16.mxu0 %v8419_v4 }
 0x1d4   : > { %7210 = vmatpush3.bf16.msra.mxu0 %v8419_v4 }
 0x1d5   : > { %7211 = vmatprep.subr.bf16.mxu0 %v8420_v1 }
 0x1d7   : > { %7180 = vmatmul.mubr.msk.bf16.gmra.mrb[4].mxu0 %vm8950_vm2, %v9388_v12 }
 0x1d8   : > { %7183 = vmatprep.mubr.msk.bf16.mxu0 %vm8950_vm2, %v9406_v61  ;;  %7212 = vmatpush3.bf16.msra.mxu0 %v8420_v1 }
 0x1d9   : > { %7213 = vmatprep.subr.bf16.mxu0 %v8421_v2 }
 0x1dc   : > { %7214 = vmatpush3.bf16.msra.mxu0 %v8421_v2 }
 0x1dd   : > { %7215 = vmatprep.subr.bf16.mxu0 %v8422_v16 }
 0x1df   : > { %7184 = vmatmul.mubr.msk.bf16.gmra.mrb[8].mxu0 %vm8950_vm2, %v9410_v22 }
 0x1e0   : > { %7187 = vmatprep.mubr.msk.bf16.mxu0 %vm8950_vm2, %v9428_v62  ;;  %7216 = vmatpush3.bf16.msra.mxu0 %v8422_v16 }
 0x1e1   : > { %7217 = vmatprep.subr.bf16.mxu0 %v8423_v5 }
 0x1e4   : > { %7218 = vmatpush3.bf16.msra.mxu0 %v8423_v5 }
 0x1e5   : > { %7219 = vmatprep.subr.bf16.mxu0 %v8424_v6 }
 0x1e7   : > { %7188 = vmatmul.mubr.msk.bf16.gmra.mrb[12].mxu0 %vm8950_vm2, %v9432_v14 }
 0x1e8   : > { %7191 = vmatprep.mubr.msk.bf16.mxu0 %vm8950_vm2, %v9450_v42  ;;  %7220 = vmatpush3.bf16.msra.mxu0 %v8424_v6 }
 0x1e9   : > { %7221 = vmatprep.subr.bf16.mxu0 %v8425_v48 }
 0x1ec   : > { %7222 = vmatpush3.bf16.msra.mxu0 %v8425_v48 }
 0x1ed   : > { %7255 = vmatprep.subr.bf16.mxu0 %v8426_v51 }
 0x1ef   : > { %7192 = vmatmul.mubr.msk.bf16.gmra.mrb[16].mxu0 %vm8950_vm2, %v9454_v45 }
 0x1f0   : > { %7195 = vmatprep.mubr.msk.bf16.mxu0 %vm8950_vm2, %v9472_v27 }
 0x1f7   : > { %7196 = vmatmul.mubr.msk.bf16.gmra.mrb[20].mxu0 %vm8950_vm2, %v9476_v50 }
 0x1f8   : > { %7199 = vmatprep.mubr.msk.bf16.mxu0 %vm8950_vm2, %v9494_v20 }
 0x1ff   : > { %7200 = vmatmul.mubr.msk.bf16.gmra.mrb[24].mxu0 %vm8950_vm2, %v9498_v34 }
 0x200   : > { %7203 = vmatprep.mubr.msk.bf16.mxu0 %vm8950_vm2, %v9510_v57 }
 0x207   : > { %7204 = vmatmul.mubr.msk.bf16.gmra.mrb[28].mxu0 %vm8950_vm2, %v9648_v13 }
 0x208   : > { %7223 = vmatprep.mubr.msk.bf16.mxu0 %vm9139_vm5, %v9170_v21  ;;  %v8431_v21 = vld [vmem:[#allocation5 + $0x1e8] sm:$0xff]  }
 0x20f   : > { %7224 = vmatmul.mubr.msk.bf16.vlgmr.msra.gmra.mrb[0].mxu0 %vm9139_vm5, %v9203_v29  ;;  %v8430_v29 = vld [vmem:[#allocation5 + $0x1e0] sm:$0xff]  }
 0x210   : > { %7256 = vmatpush3.bf16.msra.mxu0 %v8426_v51  ;;  %7227 = vmatprep.mubr.msk.bf16.mxu0 %vm9139_vm5, %v9205_v31  ;;  %v8432_v31 = vld [vmem:[#allocation5 + $0x1f0] sm:$0xff]  }
 0x211   : > { %7257 = vmatprep.subr.bf16.mxu0 %v8427_v23 }
 0x214   : > { %7258 = vmatpush3.bf16.msra.mxu0 %v8427_v23 }
 0x215   : > { %7259 = vmatprep.subr.bf16.mxu0 %v8428_v25 }
 0x217   : > { %7228 = vmatmul.mubr.msk.bf16.gmra.mrb[4].mxu0 %vm9139_vm5, %v9238_v54  ;;  %v8433_v54 = vld [vmem:[#allocation5 + $0x1f8] sm:$0xff]  }
 0x218   : > { %7231 = vmatprep.mubr.msk.bf16.mxu0 %vm9139_vm5, %v9240_v28  ;;  %7260 = vmatpush3.bf16.msra.mxu0 %v8428_v25  ;;  %v8434_v28 = vld [vmem:[#allocation5 + $0x200] sm:$0xff]  }
 0x219   : > { %7261 = vmatprep.subr.bf16.mxu0 %v8429_v56 }
 0x21c   : > { %7262 = vmatpush3.bf16.msra.mxu0 %v8429_v56 }
 0x21d   : > { %7263 = vmatprep.subr.bf16.mxu0 %v8430_v29 }
 0x21f   : > { %7232 = vmatmul.mubr.msk.bf16.gmra.mrb[8].mxu0 %vm9139_vm5, %v9265_v39  ;;  %v8443_v39 = vld [vmem:[#allocation7 + $0x48] sm:$0xff]  }
 0x220   : > { %7235 = vmatprep.mubr.msk.bf16.mxu0 %vm9139_vm5, %v9267_v46  ;;  %7264 = vmatpush3.bf16.msra.mxu0 %v8430_v29  ;;  %v8442_v46 = vld [vmem:[#allocation7 + $0x40] sm:$0xff]  }
 0x221   : > { %7265 = vmatprep.subr.bf16.mxu0 %v8431_v21  ;;  %7351 = vmatprep.subr.bf16.mxu1 %v8442_v46 }
 0x222   : > { %7352 = vmatpush3.bf16.msra.mxu1 %v8442_v46 }
 0x223   : > { %7353 = vmatprep.subr.bf16.mxu1 %v8443_v39 }
 0x224   : > { %7266 = vmatpush3.bf16.msra.mxu0 %v8431_v21 }
 0x225   : > { %7267 = vmatprep.subr.bf16.mxu0 %v8432_v31 }
 0x226   : > { %7354 = vmatpush3.bf16.msra.mxu1 %v8443_v39 }
 0x227   : > { %7236 = vmatmul.mubr.msk.bf16.gmra.mrb[12].mxu0 %vm9139_vm5, %v9283_v63  ;;  %v8444_v63 = vld [vmem:[#allocation7 + $0x50] sm:$0xff]  }
 0x228   : > { %7239 = vmatprep.mubr.msk.bf16.mxu0 %vm9139_vm5, %v9287_v30  ;;  %7268 = vmatpush3.bf16.msra.mxu0 %v8432_v31  ;;  %v8435_v30 = vld [vmem:[#allocation5 + $0x208] sm:$0xff]  }
 0x229   : > { %7269 = vmatprep.subr.bf16.mxu0 %v8433_v54  ;;  %7355 = vmatprep.subr.bf16.mxu1 %v8444_v63 }
 0x22a   : > { %7356 = vmatpush3.bf16.msra.mxu1 %v8444_v63 }
 0x22c   : > { %7270 = vmatpush3.bf16.msra.mxu0 %v8433_v54 }
 0x22d   : > { %7303 = vmatprep.subr.bf16.mxu0 %v8434_v28 }
 0x22f   : > { %7240 = vmatmul.mubr.msk.bf16.gmra.mrb[16].mxu0 %vm9139_vm5, %v9305_v58  ;;  %v8445_v58 = vld [vmem:[#allocation7 + $0x58] sm:$0xff]  }
 0x230   : > { %7243 = vmatprep.mubr.msk.bf16.mxu0 %vm9139_vm5, %v9309_v40  ;;  %v8436_v40 = vld [vmem:[#allocation5 + $0x210] sm:$0xff]   ;;  %7357 = vmatprep.subr.bf16.mxu1 %v8445_v58 }
 0x231   : > { %7358 = vmatpush3.bf16.msra.mxu1 %v8445_v58 }
 0x237   : > { %7244 = vmatmul.mubr.msk.bf16.gmra.mrb[20].mxu0 %vm9139_vm5, %v9327_v24  ;;  %v8446_v24 = vld [vmem:[#allocation7 + $0x60] sm:$0xff]  }
 0x238   : > { %7247 = vmatprep.mubr.msk.bf16.mxu0 %vm9139_vm5, %v9331_v53  ;;  %7359 = vmatprep.subr.bf16.mxu1 %v8446_v24  ;;  %v8440_v53 = vld [vmem:[#allocation5 + $0x230] sm:$0xff]  }
 0x239   : > { %7360 = vmatpush3.bf16.msra.mxu1 %v8446_v24 }
 0x23f   : > { %7248 = vmatmul.mubr.msk.bf16.gmra.mrb[24].mxu0 %vm9139_vm5, %v9343_v26  ;;  %v8447_v26 = vld [vmem:[#allocation7 + $0x68] sm:$0xff]  }
 0x240   : > { %7251 = vmatprep.mubr.msk.bf16.mxu0 %vm9139_vm5, %v9572_v47  ;;  %7361 = vmatprep.subr.bf16.mxu1 %v8447_v26 }
 0x241   : > { %7362 = vmatpush3.bf16.msra.mxu1 %v8447_v26 }
 0x247   : > { %7252 = vmatmul.mubr.bf16.gmra.mrb[28].mxu0 %v10879_v33 }
 0x248   : > { %7271 = vmatprep.mubr.bf16.mxu0 %v8972_v19  ;;  %v8437_v19 = vld [vmem:[#allocation5 + $0x218] sm:$0xff]  }
 0x24f   : > { %7272 = vmatmul.mubr.bf16.vlgmr.msra.gmra.mrb[0].mxu0 %v8996_v32  ;;  %v8438_v32 = vld [vmem:[#allocation5 + $0x220] sm:$0xff]  }
 0x250   : > { %7304 = vmatpush3.bf16.msra.mxu0 %v8434_v28  ;;  %7275 = vmatprep.mubr.bf16.mxu0 %v9005_v36  ;;  %v8439_v36 = vld [vmem:[#allocation5 + $0x228] sm:$0xff]  }
 0x251   : > { %7305 = vmatprep.subr.bf16.mxu0 %v8435_v30 }
 0x254   : > { %7306 = vmatpush3.bf16.msra.mxu0 %v8435_v30 }
 0x255   : > { %7307 = vmatprep.subr.bf16.mxu0 %v8436_v40 }
 0x257   : > { %7276 = vmatmul.mubr.bf16.gmra.mrb[4].mxu0 %v9022_v44  ;;  %v8441_v44 = vld [vmem:[#allocation5 + $0x238] sm:$0xff]  }
 0x258   : > { %7279 = vmatprep.mubr.bf16.mxu0 %v10880_v10  ;;  %7308 = vmatpush3.bf16.msra.mxu0 %v8436_v40  ;;  %v8452_v40 = vld [vmem:[#allocation7 + $0x10] sm:$0xff]  }
 0x259   : > { %7309 = vmatprep.subr.bf16.mxu0 %v8437_v19 }
 0x25c   : > { %7310 = vmatpush3.bf16.msra.mxu0 %v8437_v19 }
 0x25d   : > { %7311 = vmatprep.subr.bf16.mxu0 %v8438_v32 }
 0x25f   : > { %7280 = vmatmul.mubr.bf16.gmra.mrb[8].mxu0 %v10881_v11 }
 0x260   : > { %7283 = vmatprep.mubr.bf16.mxu0 %v10882_v17  ;;  %7312 = vmatpush3.bf16.msra.mxu0 %v8438_v32 }
 0x261   : > { %7313 = vmatprep.subr.bf16.mxu0 %v8439_v36 }
 0x264   : > { %7314 = vmatpush3.bf16.msra.mxu0 %v8439_v36 }
 0x265   : > { %7315 = vmatprep.subr.bf16.mxu0 %v8440_v53 }
 0x267   : > { %7284 = vmatmul.mubr.bf16.gmra.mrb[12].mxu0 %v10883_v37 }
 0x268   : > { %7287 = vmatprep.mubr.bf16.mxu0 %v10884_v43  ;;  %7316 = vmatpush3.bf16.msra.mxu0 %v8440_v53 }
 0x269   : > { %7317 = vmatprep.subr.bf16.mxu0 %v8441_v44 }
 0x26c   : > { %7318 = vmatpush3.bf16.msra.mxu0 %v8441_v44 }
 0x26f   : > { %7288 = vmatmul.mubr.bf16.gmra.mrb[16].mxu0 %v10885_v52 }
 0x270   : > { %7291 = vmatprep.mubr.bf16.mxu0 %v10886_v59 }
 0x277   : > { %7292 = vmatmul.mubr.bf16.gmra.mrb[20].mxu0 %v10887_v35 }
 0x278   : > { %7295 = vmatprep.mubr.bf16.mxu0 %v10888_v60 }
 0x27f   : > { %7296 = vmatmul.mubr.bf16.gmra.mrb[24].mxu0 %v10889_v41 }
 0x280   : > { %7299 = vmatprep.mubr.bf16.mxu0 %v9594_v0 }
 0x287   : > { %7300 = vmatmul.mubr.bf16.gmra.mrb[28].mxu0 %v10879_v33 }
 0x288   : > { %7319 = vmatprep.mubr.msk.bf16.mxu0 %vm8950_vm2, %v9366_v38  ;;  %v8448_v38 = vld [vmem:[#allocation7 + $0x70] sm:$0xff]  }
 0x289   : > { %7363 = vmatprep.subr.bf16.mxu1 %v8448_v38 }
 0x28a   : > { %7364 = vmatpush3.bf16.msra.mxu1 %v8448_v38 }
 0x28f   : > { %7320 = vmatmul.mubr.msk.bf16.vlgmr.msra.gmra.mrb[0].mxu0 %vm8950_vm2, %v9384_v7  ;;  %v8449_v7 = vld [vmem:[#allocation7 + $0x78] sm:$0xff]  }
 0x290   : > { %7323 = vmatprep.mubr.msk.bf16.mxu0 %vm8950_vm2, %v9388_v12  ;;  %7365 = vmatprep.subr.bf16.mxu1 %v8449_v7  ;;  %v8450_v12 = vld [vmem:[#allocation7] sm:$0xff]  }
 0x291   : > { %7366 = vmatpush3.bf16.msra.mxu1 %v8449_v7 }
 0x292   : > { %7399 = vmatprep.subr.bf16.mxu1 %v8450_v12 }
 0x297   : > { %7324 = vmatmul.mubr.msk.bf16.gmra.mrb[4].mxu0 %vm8950_vm2, %v9406_v61  ;;  %v9764_v61 = vld [vmem:[%s10784_s2] ss:$0 sm:$0xff] }
 0x298   : > { %7327 = vmatprep.mubr.msk.bf16.mxu0 %vm8950_vm2, %v9410_v22 }
 0x29f   : > { %7328 = vmatmul.mubr.msk.bf16.gmra.mrb[8].mxu0 %vm8950_vm2, %v9428_v62  ;;  %v9769_v62 = vld [vmem:[%s10785_s3] ss:$0 sm:$0xff] }
 0x2a0   : > { %7331 = vmatprep.mubr.msk.bf16.mxu0 %vm8950_vm2, %v9432_v14 }
 0x2a7   : > { %7332 = vmatmul.mubr.msk.bf16.gmra.mrb[12].mxu0 %vm8950_vm2, %v9450_v42 }
 0x2a8   : > { %7335 = vmatprep.mubr.msk.bf16.mxu0 %vm8950_vm2, %v9454_v45 }
 0x2af   : > { %7336 = vmatmul.mubr.msk.bf16.gmra.mrb[16].mxu0 %vm8950_vm2, %v9472_v27 }
 0x2b0   : > { %7339 = vmatprep.mubr.msk.bf16.mxu0 %vm8950_vm2, %v9476_v50 }
 0x2b7   : > { %7340 = vmatmul.mubr.msk.bf16.gmra.mrb[20].mxu0 %vm8950_vm2, %v9494_v20 }
 0x2b8   : > { %7343 = vmatprep.mubr.msk.bf16.mxu0 %vm8950_vm2, %v9498_v34 }
 0x2bf   : > { %7344 = vmatmul.mubr.msk.bf16.gmra.mrb[24].mxu0 %vm8950_vm2, %v9510_v57 }
 0x2c0   : > { %7347 = vmatprep.mubr.msk.bf16.mxu0 %vm8950_vm2, %v9648_v13 }
 0x2c7   : > { %7348 = vmatmul.mubr.bf16.gmra.mrb[28].mxu0 %v10879_v33 }
 0x362   : > { %v7321_v22 = vpop.f32.mrb[0].mxu0 }
 0x363   : > { %v2889_v14 = vmul.f32 %v7321_v22, %v9764_v61  ;;  %v2721_v42 = vpop.f32.mrb[1].mxu0 }
 0x364   : > { %v2887_v45 = vmul.f32 %v9764_v61, %v2721_v42  ;;  %v7322_v27 = vpop.f32.mrb[2].mxu0 }
 0x365   : > { %v2928_v50 = vadd.f32 %v9769_v62, %v2889_v14  ;;  %v2890_v20 = vmul.f32 %v7322_v27, %v9764_v61  ;;  %v2724_v34 = vpop.f32.mrb[3].mxu0 }
 0x366   : > { %v2926_v57 = vadd.f32 %v9769_v62, %v2887_v45  ;;  %v2888_v47 = vmul.f32 %v9764_v61, %v2724_v34 }
 0x367   : > { %v2960_v10 = vmax.f32 %v2928_v50, 0.0  ;;  %v2929_v11 = vadd.f32 %v9769_v62, %v2890_v20 }
 0x368   : > { %v2958_v17 = vmax.f32 %v2926_v57, 0.0  ;;  %v2927_v37 = vadd.f32 %v9769_v62, %v2888_v47  ;;  %v8453_v57 = vld [vmem:[#allocation7 + $0x18] sm:$0xff]  }
 0x369   : > { %v2991_v43 = vrot.slane %v2960_v10, 7  ;;  %v2961_v52 = vmax.f32 %v2929_v11, 0.0  ;;  %v3087_v59 = vrot.slane %v2960_v10, 1 }
 0x36a   : > { %v2990_v35 = vrot.slane %v2958_v17, 7  ;;  %v3086_v60 = vrot.slane %v2958_v17, 1  ;;  %v2959_v41 = vmax.f32 %v2927_v37, 0.0  ;;  %v7325_v0 = vpop.f32.mrb[4].mxu0 }
 0x36b   : > { %v3007_v4 = vrot.slane %v2961_v52, 7  ;;  %v3103_v1 = vrot.slane %v2961_v52, 1  ;;  %v2893_v2 = vmul.f32 %v7325_v0, %v9764_v61  ;;  %v2737_v16 = vpop.f32.mrb[5].mxu0  ;;  %v9780_v5 = vpack.c.bf16 %v2961_v52, %v2960_v10 }
 0x36c   : > { %v3006_v6 = vrot.slane %v2959_v41, 7  ;;  %v3102_v48 = vrot.slane %v2959_v41, 1  ;;  %v2891_v51 = vmul.f32 %v9764_v61, %v2737_v16  ;;  %v7326_v55 = vpop.f32.mrb[6].mxu0  ;;  %v9783_v9 = vpack.c.bf16 %v2959_v41, %v2958_v17  ;;  %v8454_v16 = vld [vmem:[#allocation7 + $0x20] sm:$0xff]  }
 0x36d   : > { %v2932_v15 = vadd.f32 %v9769_v62, %v2893_v2  ;;  %v2894_v13 = vmul.f32 %v7326_v55, %v9764_v61  ;;  %v2740_v23 = vpop.f32.mrb[7].mxu0  ;;  %v3023_v25 = vsel %vm396_vm4, %v2991_v43, %v3007_v4  ;;  %v3039_v56 = vsel %vm396_vm4, %v3007_v4, %v2991_v43 }
 0x36e   : > { %v3022_v29 = vsel %vm396_vm4, %v2990_v35, %v3006_v6  ;;  %v3038_v21 = vsel %vm396_vm4, %v3006_v6, %v2990_v35  ;;  %v3118_v31 = vsel %vm501_vm6, %v3086_v60, %v3102_v48  ;;  %v3134_v54 = vsel %vm501_vm6, %v3102_v48, %v3086_v60  ;;  %7368 = vmatmul.mubr.bf16.vlgmr.msra.gmra.mrb[0].mxu1 %v9783_v9 }
 0x36f   : > { %v9800_v28 = vpack.c.bf16 %v3022_v29, %v3038_v21  ;;  %v9802_v46 = vpack.c.bf16 %v3134_v54, %v3118_v31  ;;  %v9804_v39 = vmax.f32 %v2932_v15, 0.0  ;;  %v2930_v63 = vadd.f32 %v9769_v62, %v2891_v51  ;;  %7371 = vmatprep.mubr.bf16.mxu1 %v9780_v5  ;;  %7400 = vmatpush3.bf16.msra.mxu1 %v8450_v12 }
 0x370   : > { %v2933_v30 = vadd.f32 %v9769_v62, %v2894_v13  ;;  %v2892_v58 = vmul.f32 %v9764_v61, %v2740_v23  ;;  %7401 = vmatprep.subr.bf16.mxu1 %v8451_v18  ;;  %v9810_v24 = vpack.c.bf16 %v3023_v25, %v3039_v56  ;;  %v3119_v19 = vsel %vm501_vm6, %v3087_v59, %v3103_v1 }
 0x371   : > { %v9814_v32 = vmax.f32 %v2930_v63, 0.0  ;;  %v3135_v36 = vsel %vm501_vm6, %v3103_v1, %v3087_v59  ;;  %v2993_v7 = vrot.slane %v9804_v39, 7  ;;  %v3089_v12 = vrot.slane %v9804_v39, 1 }
 0x372   : > { %v9818_v53 = vmax.f32 %v2933_v30, 0.0  ;;  %v2931_v44 = vadd.f32 %v9769_v62, %v2892_v58  ;;  %v7329_v26 = vpop.f32.mrb[8].mxu0  ;;  %v9821_v38 = vpack.c.bf16 %v3135_v36, %v3119_v19 }
 0x373   : > { %v2992_v22 = vrot.slane %v9814_v32, 7  ;;  %v2897_v14 = vmul.f32 %v7329_v26, %v9764_v61  ;;  %v2753_v42 = vpop.f32.mrb[9].mxu0  ;;  %7402 = vmatpush3.bf16.msra.mxu1 %v8451_v18  ;;  %v3088_v45 = vrot.slane %v9814_v32, 1  ;;  %v8455_v26 = vld [vmem:[#allocation7 + $0x28] sm:$0xff]  }
 0x374   : > { %v3009_v27 = vrot.slane %v9818_v53, 7  ;;  %v9829_v50 = vmax.f32 %v2931_v44, 0.0  ;;  %v2895_v20 = vmul.f32 %v9764_v61, %v2753_v42  ;;  %v7330_v34 = vpop.f32.mrb[10].mxu0  ;;  %7403 = vmatprep.subr.bf16.mxu1 %v8452_v40  ;;  %v3105_v47 = vrot.slane %v9818_v53, 1 }
 0x375   : > { %v2936_v10 = vadd.f32 %v9769_v62, %v2897_v14  ;;  %v2898_v11 = vmul.f32 %v7330_v34, %v9764_v61  ;;  %v2756_v17 = vpop.f32.mrb[11].mxu0  ;;  %v9837_v37 = vpack.c.bf16 %v9818_v53, %v9804_v39 }
 0x376   : > { %v3008_v43 = vrot.slane %v9829_v50, 7  ;;  %v3104_v52 = vrot.slane %v9829_v50, 1  ;;  %v2934_v59 = vadd.f32 %v9769_v62, %v2895_v20  ;;  %v2896_v35 = vmul.f32 %v9764_v61, %v2756_v17 }
 0x377   : > { %10890 = vst [vmem:[#allocation12_spill] sm:$0xff] %v9837_v37  ;;  %v9843_v60 = vmax.f32 %v2936_v10, 0.0  ;;  %v2937_v41 = vadd.f32 %v9769_v62, %v2898_v11  ;;  %v9848_v0 = vpack.c.bf16 %v9829_v50, %v9814_v32  ;;  %7404 = vmatpush3.bf16.msra.mxu1 %v8452_v40  ;;  %v3025_v4 = vsel %vm396_vm4, %v2993_v7, %v3009_v27 }
 0x378   : > { %v9852_v1 = vmax.f32 %v2934_v59, 0.0  ;;  %v2935_v2 = vadd.f32 %v9769_v62, %v2896_v35  ;;  %7405 = vmatprep.subr.bf16.mxu1 %v8453_v57  ;;  %v3024_v6 = vsel %vm396_vm4, %v2992_v22, %v3008_v43  ;;  %v3040_v48 = vsel %vm396_vm4, %v3008_v43, %v2992_v22 }
 0x379   : > { %v2995_v51 = vrot.slane %v9843_v60, 7  ;;  %v9861_v18 = vmax.f32 %v2937_v41, 0.0  ;;  %7372 = vmatmul.mubr.bf16.gmra.mrb[4].mxu1 %v9848_v0  ;;  %v9864_v15 = vpack.c.bf16 %v3024_v6, %v3040_v48  ;;  %v3041_v29 = vsel %vm396_vm4, %v3009_v27, %v2993_v7 }
 0x37a   : > { %v2994_v13 = vrot.slane %v9852_v1, 7  ;;  %v3090_v23 = vrot.slane %v9852_v1, 1  ;;  %v9868_v25 = vmax.f32 %v2935_v2, 0.0  ;;  %7375 = vmatprep.mubr.bf16.mxu1 %v9837_v37  ;;  %v7333_v56 = vpop.f32.mrb[12].mxu0  ;;  %v9889_v42 = vpack.c.bf16 %v3025_v4, %v3041_v29  ;;  %v8456_v4 = vld [vmem:[#allocation7 + $0x30] sm:$0xff]  }
 0x37b   : > { %v3011_v21 = vrot.slane %v9861_v18, 7  ;;  %v3107_v31 = vrot.slane %v9861_v18, 1  ;;  %v2901_v54 = vmul.f32 %v7333_v56, %v9764_v61  ;;  %v2769_v63 = vpop.f32.mrb[13].mxu0  ;;  %v9878_v30 = vpack.c.bf16 %v9861_v18, %v9843_v60  ;;  %7406 = vmatpush3.bf16.msra.mxu1 %v8453_v57 }
 0x37c   : > { %v3010_v58 = vrot.slane %v9868_v25, 7  ;;  %v3106_v40 = vrot.slane %v9868_v25, 1  ;;  %v2899_v19 = vmul.f32 %v9764_v61, %v2769_v63  ;;  %v7334_v36 = vpop.f32.mrb[14].mxu0  ;;  %v9885_v44 = vpack.c.bf16 %v9868_v25, %v9852_v1  ;;  %7407 = vmatprep.subr.bf16.mxu1 %v8454_v16 }
 0x37d   : > { %10891 = vst [vmem:[#allocation13_spill] sm:$0xff] %v9878_v30  ;;  %v2940_v7 = vadd.f32 %v9769_v62, %v2901_v54  ;;  %v2902_v22 = vmul.f32 %v7334_v36, %v9764_v61  ;;  %v2772_v14 = vpop.f32.mrb[15].mxu0  ;;  %v3027_v27 = vsel %vm396_vm4, %v2995_v51, %v3011_v21  ;;  %v3043_v59 = vsel %vm396_vm4, %v3011_v21, %v2995_v51 }
 0x37e   : > { %10892 = vst [vmem:[#allocation14_spill] sm:$0xff] %v9885_v44  ;;  %v2938_v20 = vadd.f32 %v9769_v62, %v2899_v19  ;;  %v2900_v34 = vmul.f32 %v9764_v61, %v2772_v14  ;;  %v3026_v57 = vsel %vm396_vm4, %v2994_v13, %v3010_v58  ;;  %v3042_v10 = vsel %vm396_vm4, %v3010_v58, %v2994_v13 }
 0x37f   : > { %v9899_v11 = vmax.f32 %v2940_v7, 0.0  ;;  %v2941_v17 = vadd.f32 %v9769_v62, %v2902_v22  ;;  %7408 = vmatpush3.bf16.msra.mxu1 %v8454_v16  ;;  %v9902_v43 = vpack.c.bf16 %v3026_v57, %v3042_v10  ;;  %v9909_v2 = vpack.c.bf16 %v3027_v27, %v3043_v59  ;;  %v8457_v27 = vld [vmem:[#allocation7 + $0x38] sm:$0xff]  }
 0x380   : > { %v9906_v35 = vmax.f32 %v2938_v20, 0.0  ;;  %v2939_v41 = vadd.f32 %v9769_v62, %v2900_v34  ;;  %7409 = vmatprep.subr.bf16.mxu1 %v8455_v26  ;;  %v3120_v16 = vsel %vm501_vm6, %v3088_v45, %v3104_v52  ;;  %v3136_v13 = vsel %vm501_vm6, %v3104_v52, %v3088_v45 }
 0x381   : > { %v2997_v6 = vrot.slane %v9899_v11, 7  ;;  %v9919_v51 = vmax.f32 %v2941_v17, 0.0  ;;  %7376 = vmatmul.mubr.bf16.gmra.mrb[8].mxu1 %v9885_v44  ;;  %v9933_v63 = vpack.c.bf16 %v3136_v13, %v3120_v16 }
 0x382   : > { %v2996_v56 = vrot.slane %v9906_v35, 7  ;;  %v9930_v21 = vmax.f32 %v2939_v41, 0.0  ;;  %7379 = vmatprep.mubr.bf16.mxu1 %v9878_v30  ;;  %v7337_v54 = vpop.f32.mrb[16].mxu0 }
 0x383   : > { %v3013_v58 = vrot.slane %v9919_v51, 7  ;;  %v2905_v50 = vmul.f32 %v7337_v54, %v9764_v61  ;;  %v2785_v19 = vpop.f32.mrb[17].mxu0  ;;  %v9940_v45 = vpack.c.bf16 %v9919_v51, %v9899_v11  ;;  %7410 = vmatpush3.bf16.msra.mxu1 %v8455_v26 }
 0x384   : > { %v3012_v52 = vrot.slane %v9930_v21, 7  ;;  %v2903_v7 = vmul.f32 %v9764_v61, %v2785_v19  ;;  %v7338_v22 = vpop.f32.mrb[18].mxu0  ;;  %v9947_v14 = vpack.c.bf16 %v9930_v21, %v9906_v35  ;;  %7411 = vmatprep.subr.bf16.mxu1 %v8456_v4 }
 0x385   : > { %10893 = vst [vmem:[#allocation15_spill] sm:$0xff] %v9940_v45  ;;  %v2944_v20 = vadd.f32 %v9769_v62, %v2905_v50  ;;  %v2906_v34 = vmul.f32 %v7338_v22, %v9764_v61  ;;  %v2788_v57 = vpop.f32.mrb[19].mxu0  ;;  %v3029_v26 = vsel %vm396_vm4, %v2997_v6, %v3013_v58  ;;  %v3045_v10 = vsel %vm396_vm4, %v3013_v58, %v2997_v6 }
 0x386   : > { %10894 = vst [vmem:[#allocation16_spill] sm:$0xff] %v9947_v14  ;;  %v2942_v17 = vadd.f32 %v9769_v62, %v2903_v7  ;;  %v2904_v59 = vmul.f32 %v9764_v61, %v2788_v57  ;;  %v3028_v41 = vsel %vm396_vm4, %v2996_v56, %v3012_v52  ;;  %v3044_v16 = vsel %vm396_vm4, %v3012_v52, %v2996_v56  ;;  %v9971_v7 = vld [vmem:[#allocation7 + $0x80] sm:$0xff]  }
 0x387   : > { %v9961_v13 = vmax.f32 %v2944_v20, 0.0  ;;  %v2945_v54 = vadd.f32 %v9769_v62, %v2906_v34  ;;  %7412 = vmatpush3.bf16.msra.mxu1 %v8456_v4  ;;  %v9964_v50 = vpack.c.bf16 %v3028_v41, %v3044_v16  ;;  %v9966_v19 = vpack.c.bf16 %v3029_v26, %v3045_v10 }
 0x388   : > { %v9968_v6 = vmax.f32 %v2942_v17, 0.0  ;;  %v2943_v58 = vadd.f32 %v9769_v62, %v2904_v59  ;;  %7413 = vmatprep.subr.bf16.mxu1 %v8457_v27  ;;  %v3121_v56 = vsel %vm501_vm6, %v3089_v12, %v3105_v47  ;;  %v3137_v4 = vsel %vm501_vm6, %v3105_v47, %v3089_v12 }
 0x389   : > { %v2999_v52 = vrot.slane %v9961_v13, 7  ;;  %v9987_v20 = vmax.f32 %v2945_v54, 0.0  ;;  %7380 = vmatmul.mubr.bf16.gmra.mrb[12].mxu1 %v9947_v14  ;;  %v9990_v34 = vpack.c.bf16 %v3137_v4, %v3121_v56  ;;  %v3122_v12 = vsel %vm501_vm6, %v3090_v23, %v3106_v40 }
 0x38a   : > { %v2998_v57 = vrot.slane %v9968_v6, 7  ;;  %v9994_v39 = vmax.f32 %v2943_v58, 0.0  ;;  %7383 = vmatprep.mubr.bf16.mxu1 %v9940_v45  ;;  %v7341_v53 = vpop.f32.mrb[20].mxu0 }
 0x38b   : > { %v3015_v47 = vrot.slane %v9987_v20, 7  ;;  %v2909_v17 = vmul.f32 %v7341_v53, %v9764_v61  ;;  %v2801_v59 = vpop.f32.mrb[21].mxu0  ;;  %v10008_v41 = vpack.c.bf16 %v9987_v20, %v9961_v13  ;;  %7414 = vmatpush3.bf16.msra.mxu1 %v8457_v27 }
 0x38c   : > { %v3014_v16 = vrot.slane %v9994_v39, 7  ;;  %v2907_v58 = vmul.f32 %v9764_v61, %v2801_v59  ;;  %v7342_v56 = vpop.f32.mrb[22].mxu0  ;;  %v10015_v4 = vpack.c.bf16 %v9994_v39, %v9968_v6  ;;  %7447 = vmatprep.subr.bf16.mxu1 %v9971_v7 }
 0x38d   : > { %10895 = vst [vmem:[#allocation17_spill] sm:$0xff] %v10008_v41  ;;  %v2948_v53 = vadd.f32 %v9769_v62, %v2909_v17  ;;  %v2910_v22 = vmul.f32 %v7342_v56, %v9764_v61  ;;  %v2804_v10 = vpop.f32.mrb[23].mxu0  ;;  %v3031_v27 = vsel %vm396_vm4, %v2999_v52, %v3015_v47  ;;  %v3047_v26 = vsel %vm396_vm4, %v3015_v47, %v2999_v52 }
 0x38e   : > { %10896 = vst [vmem:[#allocation18_spill] sm:$0xff] %v10015_v4  ;;  %v2946_v59 = vadd.f32 %v9769_v62, %v2907_v58  ;;  %v2908_v54 = vmul.f32 %v9764_v61, %v2804_v10  ;;  %v3030_v48 = vsel %vm396_vm4, %v2998_v57, %v3014_v16  ;;  %v3046_v32 = vsel %vm396_vm4, %v3014_v16, %v2998_v57 }
 0x38f   : > { %v10030_v17 = vmax.f32 %v2948_v53, 0.0  ;;  %v2949_v56 = vadd.f32 %v9769_v62, %v2910_v22  ;;  %v10033_v29 = vpack.c.bf16 %v3030_v48, %v3046_v32  ;;  %v10035_v36 = vpack.c.bf16 %v3031_v27, %v3047_v26 }
 0x390   : > { %v10037_v55 = vmax.f32 %v2946_v59, 0.0  ;;  %v2947_v52 = vadd.f32 %v9769_v62, %v2908_v54  ;;  %v3138_v47 = vsel %vm501_vm6, %v3106_v40, %v3090_v23  ;;  %v10897_v57 = vrot.slane %v9843_v60, 1 }
 0x391   : > { %v3001_v32 = vrot.slane %v10030_v17, 7  ;;  %v10054_v26 = vmax.f32 %v2949_v56, 0.0  ;;  %7384 = vmatmul.mubr.bf16.gmra.mrb[16].mxu1 %v10015_v4  ;;  %v10057_v1 = vpack.c.bf16 %v3138_v47, %v3122_v12 }
 0x392   : > { %v3123_v48 = vsel %vm501_vm6, %v10897_v57, %v3107_v31  ;;  %v3000_v25 = vrot.slane %v10037_v55, 7  ;;  %v10061_v40 = vmax.f32 %v2947_v52, 0.0  ;;  %7387 = vmatprep.mubr.bf16.mxu1 %v10008_v41  ;;  %v7345_v10 = vpop.f32.mrb[24].mxu0  ;;  %v10898_v16 = vmov %v10897_v57 }
 0x393   : > { %v3139_v54 = vsel %vm501_vm6, %v3107_v31, %v10898_v16  ;;  %v3017_v58 = vrot.slane %v10054_v26, 7  ;;  %v2913_v53 = vmul.f32 %v7345_v10, %v9764_v61  ;;  %v2817_v27 = vpop.f32.mrb[25].mxu0  ;;  %v10075_v59 = vpack.c.bf16 %v10054_v26, %v10030_v17 }
 0x394   : > { %v3016_v56 = vrot.slane %v10061_v40, 7  ;;  %v2911_v18 = vmul.f32 %v9764_v61, %v2817_v27  ;;  %v7346_v52 = vpop.f32.mrb[26].mxu0  ;;  %v10082_v31 = vpack.c.bf16 %v10061_v40, %v10037_v55 }
 0x395   : > { %10899 = vst [vmem:[#allocation19_spill] sm:$0xff] %v10075_v59  ;;  %v2952_v47 = vadd.f32 %v9769_v62, %v2913_v53  ;;  %v2914_v57 = vmul.f32 %v7346_v52, %v9764_v61  ;;  %v2820_v10 = vpop.f32.mrb[27].mxu0  ;;  %v3033_v16 = vsel %vm396_vm4, %v3001_v32, %v3017_v58  ;;  %v3049_v22 = vsel %vm396_vm4, %v3017_v58, %v3001_v32 }
 0x396   : > { %10900 = vst [vmem:[#allocation20_spill] sm:$0xff] %v10082_v31  ;;  %v2950_v12 = vadd.f32 %v9769_v62, %v2911_v18  ;;  %v2912_v27 = vmul.f32 %v9764_v61, %v2820_v10  ;;  %v3032_v23 = vsel %vm396_vm4, %v3000_v25, %v3016_v56  ;;  %v3048_v60 = vsel %vm396_vm4, %v3016_v56, %v3000_v25 }
 0x397   : > { %v10096_v53 = vmax.f32 %v2952_v47, 0.0  ;;  %v2953_v52 = vadd.f32 %v9769_v62, %v2914_v57  ;;  %v10099_v41 = vpack.c.bf16 %v3032_v23, %v3048_v60  ;;  %v10101_v4 = vpack.c.bf16 %v3033_v16, %v3049_v22 }
 0x398   : > { %v10103_v45 = vmax.f32 %v2950_v12, 0.0  ;;  %v2951_v32 = vadd.f32 %v9769_v62, %v2912_v27  ;;  %v10106_v58 = vpack.c.bf16 %v3139_v54, %v3123_v48  ;;  %v10901_v18 = vrot.slane %v9930_v21, 1 }
 0x399   : > { %v10902_v10 = vrot.slane %v9906_v35, 1  ;;  %v3003_v56 = vrot.slane %v10096_v53, 7  ;;  %v10116_v60 = vmax.f32 %v2953_v52, 0.0  ;;  %7388 = vmatmul.mubr.bf16.gmra.mrb[20].mxu1 %v10082_v31 }
 0x39a   : > { %v10904_v48 = vmov %v10901_v18  ;;  %v3002_v12 = vrot.slane %v10103_v45, 7  ;;  %v3098_v47 = vrot.slane %v10103_v45, 1  ;;  %v2983_v57 = vmax.f32 %v2951_v32, 0.0  ;;  %7391 = vmatprep.mubr.bf16.mxu1 %v10075_v59  ;;  %v7349_v16 = vpop.f32.mrb[28].mxu0 }
 0x39b   : > { %v3124_v25 = vsel %vm501_vm6, %v10902_v10, %v10901_v18  ;;  %v10903_v22 = vmov %v10902_v10  ;;  %v3019_v52 = vrot.slane %v10116_v60, 7  ;;  %v3115_v18 = vrot.slane %v10116_v60, 1  ;;  %v2833_v21 = vpop.f32.mrb[29].mxu0 }
 0x39c   : > { %v3140_v54 = vsel %vm501_vm6, %v10904_v48, %v10903_v22  ;;  %v2917_v35 = vmul.f32 %v7349_v16, %v9764_v61  ;;  %v10135_v10 = vpack.c.bf16 %v10116_v60, %v10096_v53  ;;  %v3018_v22 = vrot.slane %v2983_v57, 7  ;;  %v7350_v23 = vpop.f32.mrb[30].mxu0 }
 0x39d   : > { %v10128_v27 = vpack.c.bf16 %v3140_v54, %v3124_v25  ;;  %v3114_v48 = vrot.slane %v2983_v57, 1  ;;  %v2915_v32 = vmul.f32 %v9764_v61, %v2833_v21  ;;  %v10139_v59 = vpack.c.bf16 %v2983_v57, %v10103_v45  ;;  %v2836_v31 = vpop.f32.mrb[31].mxu0 }
 0x39e   : > { %10905 = vst [vmem:[#allocation21_spill] sm:$0xff] %v10135_v10  ;;  %v2956_v25 = vadd.f32 %v9769_v62, %v2917_v35  ;;  %v2918_v54 = vmul.f32 %v7350_v23, %v9764_v61  ;;  %v3035_v16 = vsel %vm396_vm4, %v3003_v56, %v3019_v52  ;;  %v3051_v60 = vsel %vm396_vm4, %v3019_v52, %v3003_v56 }
 0x39f   : > { %10906 = vst [vmem:[#allocation22_spill] sm:$0xff] %v10139_v59  ;;  %v2954_v14 = vadd.f32 %v9769_v62, %v2915_v32  ;;  %v2916_v30 = vmul.f32 %v9764_v61, %v2836_v31  ;;  %v3034_v21 = vsel %vm396_vm4, %v3002_v12, %v3018_v22  ;;  %v3050_v45 = vsel %vm396_vm4, %v3018_v22, %v3002_v12 }
 0x3a0   : > { %v2988_v57 = vmax.f32 %v2956_v25, 0.0  ;;  %v2957_v23 = vadd.f32 %v9769_v62, %v2918_v54  ;;  %v10154_v35 = vpack.c.bf16 %v3034_v21, %v3050_v45  ;;  %v10156_v44 = vpack.c.bf16 %v3035_v16, %v3051_v60 }
 0x3a1   : > { %v2986_v37 = vmax.f32 %v2954_v14, 0.0  ;;  %v2955_v56 = vadd.f32 %v9769_v62, %v2916_v30  ;;  %v10907_v52 = vrot.slane %v9919_v51, 1  ;;  %v10908_v61 = vrot.slane %v9899_v11, 1  ;;  %7392 = vmatmul.mubr.bf16.gmra.mrb[24].mxu1 %v10139_v59 }
 0x3a2   : > { %v3005_v25 = vrot.slane %v2988_v57, 7  ;;  %v3101_v54 = vrot.slane %v2988_v57, 1  ;;  %v2989_v16 = vmax.f32 %v2957_v23, 0.0  ;;  %7395 = vmatprep.mubr.bf16.mxu1 %v10135_v10  ;;  %v10911_v21 = vrot.slane %v9994_v39, 1 }
 0x3a3   : > { %v3125_v31 = vsel %vm501_vm6, %v10908_v61, %v10907_v52  ;;  %v10909_v32 = vmov %v10908_v61  ;;  %v10910_v12 = vmov %v10907_v52  ;;  %v3004_v30 = vrot.slane %v2986_v37, 7 }
 0x3a4   : > { %v3141_v22 = vsel %vm501_vm6, %v10910_v12, %v10909_v32  ;;  %v3100_v14 = vrot.slane %v2986_v37, 1  ;;  %v2987_v60 = vmax.f32 %v2955_v56, 0.0  ;;  %v10912_v11 = vrot.slane %v9968_v6, 1 }
 0x3a5   : > { %v10172_v62 = vpack.c.bf16 %v3141_v22, %v3125_v31  ;;  %v3021_v45 = vrot.slane %v2989_v16, 7  ;;  %v3117_v52 = vrot.slane %v2989_v16, 1  ;;  %v10914_v61 = vmov %v10911_v21 }
 0x3a6   : > { %v3126_v51 = vsel %vm501_vm6, %v10912_v11, %v10911_v21  ;;  %v10913_v23 = vmov %v10912_v11  ;;  %v10915_v56 = vrot.slane %v9987_v20, 1  ;;  %v10916_v32 = vrot.slane %v9961_v13, 1 }
 0x3a7   : > { %v3142_v31 = vsel %vm501_vm6, %v10914_v61, %v10913_v23  ;;  %v3020_v22 = vrot.slane %v2987_v60, 7  ;;  %v3116_v10 = vrot.slane %v2987_v60, 1  ;;  %v10193_v59 = vpack.c.bf16 %v2987_v60, %v2986_v37 }
 0x3a8   : > { %v3127_v12 = vsel %vm501_vm6, %v10916_v32, %v10915_v56  ;;  %v10195_v21 = vpack.c.bf16 %v3142_v31, %v3126_v51  ;;  %v10917_v6 = vmov %v10916_v32  ;;  %v10918_v39 = vmov %v10915_v56 }
 0x3a9   : > { %v3143_v11 = vsel %vm501_vm6, %v10918_v39, %v10917_v6  ;;  %v10919_v23 = vrot.slane %v10061_v40, 1  ;;  %v10920_v61 = vrot.slane %v10037_v55, 1  ;;  %v10923_v13 = vrot.slane %v10054_v26, 1  ;;  %7396 = vmatmul.mubr.bf16.gmra.mrb[28].mxu1 %v10193_v59 }
 0x3aa   : > { %v10924_v20 = vrot.slane %v10030_v17, 1  ;;  %v3036_v31 = vsel %vm396_vm4, %v3004_v30, %v3020_v22  ;;  %v3052_v6 = vsel %vm396_vm4, %v3020_v22, %v3004_v30  ;;  %v10225_v39 = vpack.c.bf16 %v3143_v11, %v3127_v12  ;;  %7415 = vmatprep.mubr.bf16.mxu1 %v10879_v33 }
 0x3ab   : > { %v3128_v56 = vsel %vm501_vm6, %v10920_v61, %v10919_v23  ;;  %v10921_v32 = vmov %v10920_v61  ;;  %v10922_v37 = vmov %v10919_v23  ;;  %v10229_v40 = vpack.c.bf16 %v3036_v31, %v3052_v6  ;;  %v8459_v6 = vld [vmem:[#allocation7 + $0x88] sm:$0xff]  }
 0x3ac   : > { %v3144_v60 = vsel %vm501_vm6, %v10922_v37, %v10921_v32  ;;  %v3129_v51 = vsel %vm501_vm6, %v10924_v20, %v10923_v13  ;;  %v10925_v23 = vmov %v10924_v20  ;;  %v10926_v61 = vmov %v10923_v13 }
 0x3ad   : > { %v10227_v55 = vpack.c.bf16 %v3144_v60, %v3128_v56  ;;  %v3145_v32 = vsel %vm501_vm6, %v10926_v61, %v10925_v23  ;;  %v3130_v37 = vsel %vm501_vm6, %v3098_v47, %v3114_v48  ;;  %v3146_v13 = vsel %vm501_vm6, %v3114_v48, %v3098_v47  ;;  %v8468_v23 = vld [vmem:[#allocation7 + $0xd0] sm:$0xff]   ;;  %v8469_v61 = vld [vmem:[#allocation7 + $0xd8] sm:$0xff]  }
 0x3ae   : > { %v10241_v30 = vpack.c.bf16 %v3145_v32, %v3129_v51  ;;  %v10243_v12 = vpack.c.bf16 %v3146_v13, %v3130_v37  ;;  %v10927_v22 = vrot.slane %v10096_v53, 1  ;;  %v3132_v47 = vsel %vm501_vm6, %v3100_v14, %v3116_v10  ;;  %v8470_v32 = vld [vmem:[#allocation7 + $0xe0] sm:$0xff]   ;;  %v8471_v37 = vld [vmem:[#allocation7 + $0xe8] sm:$0xff]   ;;  %v8472_v13 = vld [vmem:[#allocation7 + $0xf0] sm:$0xff]  }
 0x3af   : > { %v3148_v48 = vsel %vm501_vm6, %v3116_v10, %v3100_v14  ;;  %v3037_v60 = vsel %vm396_vm4, %v3005_v25, %v3021_v45  ;;  %v3053_v53 = vsel %vm396_vm4, %v3021_v45, %v3005_v25  ;;  %v3133_v51 = vsel %vm501_vm6, %v3101_v54, %v3117_v52  ;;  %v8461_v25 = vld [vmem:[#allocation7 + $0x98] sm:$0xff]   ;;  %v8466_v45 = vld [vmem:[#allocation7 + $0xc0] sm:$0xff]  }
 0x3b0   : > { %v3131_v17 = vsel %vm501_vm6, %v10927_v22, %v3115_v18  ;;  %v10928_v26 = vmov %v10927_v22  ;;  %v10263_v20 = vpack.c.bf16 %v3148_v48, %v3132_v47  ;;  %v10271_v31 = vpack.c.bf16 %v3037_v60, %v3053_v53  ;;  %v8473_v22 = vld [vmem:[#allocation7 + $0xf8] sm:$0xff]   ;;  %v8479_v48 = vld [vmem:[#allocation7 + $0x128] sm:$0xff]   ;;  %v8480_v60 = vld [vmem:[#allocation7 + $0x130] sm:$0xff]  }
 0x3b1   : > { %v3147_v11 = vsel %vm501_vm6, %v3115_v18, %v10928_v26  ;;  %v10267_v18 = vpack.c.bf16 %v2989_v16, %v2988_v57  ;;  %v3149_v10 = vsel %vm501_vm6, %v3117_v52, %v3101_v54  ;;  %7416 = vmatmul.mubr.msk.bf16.vlgmr.msra.gmra.mrb[0].mxu1 %vm9139_vm5, %v9800_v28  ;;  %v8460_v57 = vld [vmem:[#allocation7 + $0x90] sm:$0xff]   ;;  %v8463_v54 = vld [vmem:[#allocation7 + $0xa8] sm:$0xff]   ;;  %v8465_v16 = vld [vmem:[#allocation7 + $0xb8] sm:$0xff]  }
 0x3b2   : > { %v10254_v56 = vpack.c.bf16 %v3147_v11, %v3131_v17  ;;  %v10275_v14 = vpack.c.bf16 %v3149_v10, %v3133_v51  ;;  %7419 = vmatprep.mubr.msk.bf16.mxu1 %vm9139_vm5, %v9810_v24  ;;  %7448 = vmatpush3.bf16.msra.mxu1 %v9971_v7  ;;  %v8464_v7 = vld [vmem:[#allocation7 + $0xb0] sm:$0xff]   ;;  %v8467_v52 = vld [vmem:[#allocation7 + $0xc8] sm:$0xff]   ;;  %v8474_v17 = vld [vmem:[#allocation7 + $0x100] sm:$0xff]  }
 0x3b3   : > { %7449 = vmatprep.subr.bf16.mxu1 %v8459_v6  ;;  %v8475_v26 = vld [vmem:[#allocation7 + $0x108] sm:$0xff]   ;;  %v8476_v11 = vld [vmem:[#allocation7 + $0x110] sm:$0xff]   ;;  %v8477_v47 = vld [vmem:[#allocation7 + $0x118] sm:$0xff]  }
 0x3b4   : > { %v8481_v53 = vld [vmem:[#allocation7 + $0x138] sm:$0xff]   ;;  %v8482_v51 = vld [vmem:[#allocation7 + $0x140] sm:$0xff]   ;;  %v8483_v10 = vld [vmem:[#allocation7 + $0x148] sm:$0xff]  }
 0x3b6   : > { %7450 = vmatpush3.bf16.msra.mxu1 %v8459_v6  ;;  %v8484_v6 = vld [vmem:[#allocation7 + $0x150] sm:$0xff]  }
 0x3b7   : > { %7451 = vmatprep.subr.bf16.mxu1 %v8460_v57 }
 0x3b9   : > { %7420 = vmatmul.mubr.msk.bf16.gmra.mrb[4].mxu1 %vm9139_vm5, %v9864_v15 }
 0x3ba   : > { %7423 = vmatprep.mubr.msk.bf16.mxu1 %vm9139_vm5, %v9889_v42  ;;  %7452 = vmatpush3.bf16.msra.mxu1 %v8460_v57  ;;  %v8485_v57 = vld [vmem:[#allocation7 + $0x158] sm:$0xff]  }
 0x3bb   : > { %7453 = vmatprep.subr.bf16.mxu1 %v8461_v25 }
 0x3be   : > { %7454 = vmatpush3.bf16.msra.mxu1 %v8461_v25  ;;  %v10929_v25 = vld [vmem:[#allocation12_spill] sm:$0xff] }
 0x3bf   : > { %7455 = vmatprep.subr.bf16.mxu1 %v8462_v3 }
 0x3c1   : > { %7424 = vmatmul.mubr.msk.bf16.gmra.mrb[8].mxu1 %vm9139_vm5, %v9902_v43 }
 0x3c2   : > { %7427 = vmatprep.mubr.msk.bf16.mxu1 %vm9139_vm5, %v9909_v2  ;;  %7456 = vmatpush3.bf16.msra.mxu1 %v8462_v3  ;;  %v10930_v3 = vld [vmem:[#allocation14_spill] sm:$0xff] }
 0x3c3   : > { %7457 = vmatprep.subr.bf16.mxu1 %v8463_v54 }
 0x3c6   : > { %7458 = vmatpush3.bf16.msra.mxu1 %v8463_v54  ;;  %v8486_v54 = vld [vmem:[#allocation7 + $0x160] sm:$0xff]  }
 0x3c7   : > { %7459 = vmatprep.subr.bf16.mxu1 %v8464_v7 }
 0x3c9   : > { %7428 = vmatmul.mubr.msk.bf16.gmra.mrb[12].mxu1 %vm9139_vm5, %v9964_v50 }
 0x3ca   : > { %7431 = vmatprep.mubr.msk.bf16.mxu1 %vm9139_vm5, %v9966_v19  ;;  %7460 = vmatpush3.bf16.msra.mxu1 %v8464_v7  ;;  %v10931_v7 = vld [vmem:[#allocation13_spill] sm:$0xff] }
 0x3cb   : > { %7461 = vmatprep.subr.bf16.mxu1 %v8465_v16 }
 0x3ce   : > { %7462 = vmatpush3.bf16.msra.mxu1 %v8465_v16  ;;  %v10932_v16 = vld [vmem:[#allocation16_spill] sm:$0xff] }
 0x3cf   : > { %7495 = vmatprep.subr.bf16.mxu1 %v8466_v45 }
 0x3d1   : > { %7432 = vmatmul.mubr.msk.bf16.gmra.mrb[16].mxu1 %vm9139_vm5, %v10033_v29 }
 0x3d2   : > { %7435 = vmatprep.mubr.msk.bf16.mxu1 %vm9139_vm5, %v10035_v36 }
 0x3d9   : > { %7436 = vmatmul.mubr.msk.bf16.gmra.mrb[20].mxu1 %vm9139_vm5, %v10099_v41 }
 0x3da   : > { %7439 = vmatprep.mubr.msk.bf16.mxu1 %vm9139_vm5, %v10101_v4 }
 0x3e1   : > { %7440 = vmatmul.mubr.msk.bf16.gmra.mrb[24].mxu1 %vm9139_vm5, %v10154_v35 }
 0x3e2   : > { %7443 = vmatprep.mubr.msk.bf16.mxu1 %vm9139_vm5, %v10156_v44 }
 0x3e9   : > { %7444 = vmatmul.mubr.msk.bf16.gmra.mrb[28].mxu1 %vm9139_vm5, %v10229_v40 }
 0x3ea   : > { %7463 = vmatprep.mubr.bf16.mxu1 %v10879_v33 }
 0x3f1   : > { %7464 = vmatmul.mubr.msk.bf16.vlgmr.msra.gmra.mrb[0].mxu1 %vm8950_vm2, %v9802_v46 }
 0x3f2   : > { %7467 = vmatprep.mubr.msk.bf16.mxu1 %vm8950_vm2, %v9821_v38  ;;  %7496 = vmatpush3.bf16.msra.mxu1 %v8466_v45  ;;  %v8488_v45 = vld [vmem:[#allocation7 + $0x170] sm:$0xff]  }
 0x3f3   : > { %7497 = vmatprep.subr.bf16.mxu1 %v8467_v52 }
 0x3f6   : > { %7498 = vmatpush3.bf16.msra.mxu1 %v8467_v52  ;;  %v8489_v52 = vld [vmem:[#allocation7 + $0x178] sm:$0xff]  }
 0x3f7   : > { %7499 = vmatprep.subr.bf16.mxu1 %v8468_v23 }
 0x3f9   : > { %7468 = vmatmul.mubr.msk.bf16.gmra.mrb[4].mxu1 %vm8950_vm2, %v9933_v63 }
 0x3fa   : > { %7471 = vmatprep.mubr.msk.bf16.mxu1 %vm8950_vm2, %v9990_v34  ;;  %7500 = vmatpush3.bf16.msra.mxu1 %v8468_v23  ;;  %v10933_v23 = vld [vmem:[#allocation15_spill] sm:$0xff] }
 0x3fb   : > { %7501 = vmatprep.subr.bf16.mxu1 %v8469_v61 }
 0x3fe   : > { %7502 = vmatpush3.bf16.msra.mxu1 %v8469_v61  ;;  %v10934_v61 = vld [vmem:[#allocation18_spill] sm:$0xff] }
 0x3ff   : > { %7503 = vmatprep.subr.bf16.mxu1 %v8470_v32 }
 0x401   : > { %7472 = vmatmul.mubr.msk.bf16.gmra.mrb[8].mxu1 %vm8950_vm2, %v10057_v1 }
 0x402   : > { %7475 = vmatprep.mubr.msk.bf16.mxu1 %vm8950_vm2, %v10106_v58  ;;  %7504 = vmatpush3.bf16.msra.mxu1 %v8470_v32  ;;  %v8490_v32 = vld [vmem:[#allocation7 + $0x180] sm:$0xff]  }
 0x403   : > { %7505 = vmatprep.subr.bf16.mxu1 %v8471_v37 }
 0x406   : > { %7506 = vmatpush3.bf16.msra.mxu1 %v8471_v37  ;;  %v10935_v37 = vld [vmem:[#allocation17_spill] sm:$0xff] }
 0x407   : > { %7507 = vmatprep.subr.bf16.mxu1 %v8472_v13 }
 0x409   : > { %7476 = vmatmul.mubr.msk.bf16.gmra.mrb[12].mxu1 %vm8950_vm2, %v10128_v27 }
 0x40a   : > { %7479 = vmatprep.mubr.msk.bf16.mxu1 %vm8950_vm2, %v10172_v62  ;;  %7508 = vmatpush3.bf16.msra.mxu1 %v8472_v13  ;;  %v10936_v13 = vld [vmem:[#allocation20_spill] sm:$0xff] }
 0x40b   : > { %7509 = vmatprep.subr.bf16.mxu1 %v8473_v22 }
 0x40e   : > { %7510 = vmatpush3.bf16.msra.mxu1 %v8473_v22  ;;  %v10937_v22 = vld [vmem:[#allocation19_spill] sm:$0xff] }
 0x40f   : > { %7543 = vmatprep.subr.bf16.mxu1 %v8474_v17 }
 0x411   : > { %7480 = vmatmul.mubr.msk.bf16.gmra.mrb[16].mxu1 %vm8950_vm2, %v10195_v21 }
 0x412   : > { %7483 = vmatprep.mubr.msk.bf16.mxu1 %vm8950_vm2, %v10225_v39 }
 0x419   : > { %7484 = vmatmul.mubr.msk.bf16.gmra.mrb[20].mxu1 %vm8950_vm2, %v10227_v55 }
 0x41a   : > { %7487 = vmatprep.mubr.msk.bf16.mxu1 %vm8950_vm2, %v10241_v30 }
 0x421   : > { %7488 = vmatmul.mubr.msk.bf16.gmra.mrb[24].mxu1 %vm8950_vm2, %v10243_v12 }
 0x422   : > { %7491 = vmatprep.mubr.msk.bf16.mxu1 %vm8950_vm2, %v10254_v56 }
 0x429   : > { %7492 = vmatmul.mubr.msk.bf16.gmra.mrb[28].mxu1 %vm8950_vm2, %v10263_v20 }
 0x42a   : > { %7511 = vmatprep.mubr.msk.bf16.mxu1 %vm9139_vm5, %v9800_v28  ;;  %v8478_v28 = vld [vmem:[#allocation7 + $0x120] sm:$0xff]  }
 0x431   : > { %7512 = vmatmul.mubr.msk.bf16.vlgmr.msra.gmra.mrb[0].mxu1 %vm9139_vm5, %v9810_v24 }
 0x432   : > { %7515 = vmatprep.mubr.msk.bf16.mxu1 %vm9139_vm5, %v9864_v15  ;;  %7544 = vmatpush3.bf16.msra.mxu1 %v8474_v17  ;;  %v10938_v17 = vld [vmem:[#allocation22_spill] sm:$0xff] }
 0x433   : > { %7545 = vmatprep.subr.bf16.mxu1 %v8475_v26 }
 0x436   : > { %7546 = vmatpush3.bf16.msra.mxu1 %v8475_v26  ;;  %v10939_v26 = vld [vmem:[#allocation21_spill] sm:$0xff] }
 0x437   : > { %7547 = vmatprep.subr.bf16.mxu1 %v8476_v11 }
 0x439   : > { %7516 = vmatmul.mubr.msk.bf16.gmra.mrb[4].mxu1 %vm9139_vm5, %v9889_v42 }
 0x43a   : > { %7519 = vmatprep.mubr.msk.bf16.mxu1 %vm9139_vm5, %v9902_v43  ;;  %7548 = vmatpush3.bf16.msra.mxu1 %v8476_v11  ;;  %v8491_v11 = vld [vmem:[#allocation7 + $0x188] sm:$0xff]  }
 0x43b   : > { %7549 = vmatprep.subr.bf16.mxu1 %v8477_v47 }
 0x43e   : > { %7550 = vmatpush3.bf16.msra.mxu1 %v8477_v47  ;;  %v8492_v47 = vld [vmem:[#allocation7 + $0x190] sm:$0xff]  }
 0x43f   : > { %7551 = vmatprep.subr.bf16.mxu1 %v8478_v28 }
 0x441   : > { %7520 = vmatmul.mubr.msk.bf16.gmra.mrb[8].mxu1 %vm9139_vm5, %v9909_v2 }
 0x442   : > { %7523 = vmatprep.mubr.msk.bf16.mxu1 %vm9139_vm5, %v9964_v50  ;;  %7552 = vmatpush3.bf16.msra.mxu1 %v8478_v28  ;;  %v8493_v28 = vld [vmem:[#allocation7 + $0x198] sm:$0xff]  }
 0x443   : > { %7553 = vmatprep.subr.bf16.mxu1 %v8479_v48 }
 0x446   : > { %7554 = vmatpush3.bf16.msra.mxu1 %v8479_v48  ;;  %v8495_v48 = vld [vmem:[#allocation7 + $0x1a8] sm:$0xff]  }
 0x447   : > { %7555 = vmatprep.subr.bf16.mxu1 %v8480_v60 }
 0x449   : > { %7524 = vmatmul.mubr.msk.bf16.gmra.mrb[12].mxu1 %vm9139_vm5, %v9966_v19 }
 0x44a   : > { %7527 = vmatprep.mubr.msk.bf16.mxu1 %vm9139_vm5, %v10033_v29  ;;  %7556 = vmatpush3.bf16.msra.mxu1 %v8480_v60  ;;  %v8496_v60 = vld [vmem:[#allocation7 + $0x1b0] sm:$0xff]  }
 0x44b   : > { %7557 = vmatprep.subr.bf16.mxu1 %v8481_v53 }
 0x44e   : > { %7558 = vmatpush3.bf16.msra.mxu1 %v8481_v53  ;;  %v8497_v53 = vld [vmem:[#allocation7 + $0x1b8] sm:$0xff]  }
 0x44f   : > { %7591 = vmatprep.subr.bf16.mxu1 %v8482_v51 }
 0x451   : > { %7528 = vmatmul.mubr.msk.bf16.gmra.mrb[16].mxu1 %vm9139_vm5, %v10035_v36 }
 0x452   : > { %7531 = vmatprep.mubr.msk.bf16.mxu1 %vm9139_vm5, %v10099_v41 }
 0x459   : > { %7532 = vmatmul.mubr.msk.bf16.gmra.mrb[20].mxu1 %vm9139_vm5, %v10101_v4 }
 0x45a   : > { %7535 = vmatprep.mubr.msk.bf16.mxu1 %vm9139_vm5, %v10154_v35 }
 0x461   : > { %7536 = vmatmul.mubr.msk.bf16.gmra.mrb[24].mxu1 %vm9139_vm5, %v10156_v44 }
 0x462   : > { %7539 = vmatprep.mubr.msk.bf16.mxu1 %vm9139_vm5, %v10229_v40 }
 0x469   : > { %7540 = vmatmul.mubr.msk.bf16.gmra.mrb[28].mxu1 %vm9139_vm5, %v10271_v31 }
 0x46a   : > { %7559 = vmatprep.mubr.bf16.mxu1 %v9783_v9  ;;  %v8487_v9 = vld [vmem:[#allocation7 + $0x168] sm:$0xff]  }
 0x471   : > { %7560 = vmatmul.mubr.bf16.vlgmr.msra.gmra.mrb[0].mxu1 %v9780_v5 }
 0x472   : > { %7563 = vmatprep.mubr.bf16.mxu1 %v9848_v0  ;;  %7592 = vmatpush3.bf16.msra.mxu1 %v8482_v51  ;;  %v8498_v51 = vld [vmem:[#allocation7 + $0x1c0] sm:$0xff]  }
 0x473   : > { %7593 = vmatprep.subr.bf16.mxu1 %v8483_v10 }
 0x476   : > { %7594 = vmatpush3.bf16.msra.mxu1 %v8483_v10  ;;  %v8499_v10 = vld [vmem:[#allocation7 + $0x1c8] sm:$0xff]  }
 0x477   : > { %7595 = vmatprep.subr.bf16.mxu1 %v8484_v6 }
 0x479   : > { %7564 = vmatmul.mubr.bf16.gmra.mrb[4].mxu1 %v10929_v25 }
 0x47a   : > { %7567 = vmatprep.mubr.bf16.mxu1 %v10930_v3  ;;  %7596 = vmatpush3.bf16.msra.mxu1 %v8484_v6  ;;  %v8500_v6 = vld [vmem:[#allocation7 + $0x1d0] sm:$0xff]  }
 0x47b   : > { %7597 = vmatprep.subr.bf16.mxu1 %v8485_v57 }
 0x47e   : > { %7598 = vmatpush3.bf16.msra.mxu1 %v8485_v57  ;;  %v8501_v57 = vld [vmem:[#allocation7 + $0x1d8] sm:$0xff]  }
 0x47f   : > { %7599 = vmatprep.subr.bf16.mxu1 %v8486_v54 }
 0x481   : > { %7568 = vmatmul.mubr.bf16.gmra.mrb[8].mxu1 %v10931_v7 }
 0x482   : > { %7571 = vmatprep.mubr.bf16.mxu1 %v10932_v16  ;;  %7600 = vmatpush3.bf16.msra.mxu1 %v8486_v54 }
 0x483   : > { %7601 = vmatprep.subr.bf16.mxu1 %v8487_v9 }
 0x486   : > { %7602 = vmatpush3.bf16.msra.mxu1 %v8487_v9 }
 0x487   : > { %7603 = vmatprep.subr.bf16.mxu1 %v8488_v45 }
 0x489   : > { %7572 = vmatmul.mubr.bf16.gmra.mrb[12].mxu1 %v10933_v23 }
 0x48a   : > { %7575 = vmatprep.mubr.bf16.mxu1 %v10934_v61  ;;  %7604 = vmatpush3.bf16.msra.mxu1 %v8488_v45 }
 0x48b   : > { %7605 = vmatprep.subr.bf16.mxu1 %v8489_v52 }
 0x48e   : > { %7606 = vmatpush3.bf16.msra.mxu1 %v8489_v52 }
 0x48f   : > { %7639 = vmatprep.subr.bf16.mxu1 %v8490_v32 }
 0x491   : > { %7576 = vmatmul.mubr.bf16.gmra.mrb[16].mxu1 %v10935_v37 }
 0x492   : > { %7579 = vmatprep.mubr.bf16.mxu1 %v10936_v13 }
 0x499   : > { %7580 = vmatmul.mubr.bf16.gmra.mrb[20].mxu1 %v10937_v22 }
 0x49a   : > { %7583 = vmatprep.mubr.bf16.mxu1 %v10938_v17 }
 0x4a1   : > { %7584 = vmatmul.mubr.bf16.gmra.mrb[24].mxu1 %v10939_v26 }
 0x4a2   : > { %7587 = vmatprep.mubr.bf16.mxu1 %v10193_v59 }
 0x4a9   : > { %7588 = vmatmul.mubr.bf16.gmra.mrb[28].mxu1 %v10267_v18 }
 0x4aa   : > { %7607 = vmatprep.mubr.msk.bf16.mxu1 %vm8950_vm2, %v9802_v46  ;;  %v8494_v46 = vld [vmem:[#allocation7 + $0x1a0] sm:$0xff]  }
 0x4b1   : > { %7608 = vmatmul.mubr.msk.bf16.vlgmr.msra.gmra.mrb[0].mxu1 %vm8950_vm2, %v9821_v38 }
 0x4b2   : > { %7611 = vmatprep.mubr.msk.bf16.mxu1 %vm8950_vm2, %v9933_v63  ;;  %7640 = vmatpush3.bf16.msra.mxu1 %v8490_v32 }
 0x4b3   : > { %7641 = vmatprep.subr.bf16.mxu1 %v8491_v11 }
 0x4b6   : > { %7642 = vmatpush3.bf16.msra.mxu1 %v8491_v11 }
 0x4b7   : > { %7643 = vmatprep.subr.bf16.mxu1 %v8492_v47 }
 0x4b9   : > { %7612 = vmatmul.mubr.msk.bf16.gmra.mrb[4].mxu1 %vm8950_vm2, %v9990_v34 }
 0x4ba   : > { %7615 = vmatprep.mubr.msk.bf16.mxu1 %vm8950_vm2, %v10057_v1  ;;  %7644 = vmatpush3.bf16.msra.mxu1 %v8492_v47 }
 0x4bb   : > { %7645 = vmatprep.subr.bf16.mxu1 %v8493_v28 }
 0x4be   : > { %7646 = vmatpush3.bf16.msra.mxu1 %v8493_v28  ;;  %v8520_v28 = vld [vmem:[%s8934_s21 + $0x38] sm:$0xff] }
 0x4bf   : > { %7647 = vmatprep.subr.bf16.mxu1 %v8494_v46 }
 0x4c1   : > { %7616 = vmatmul.mubr.msk.bf16.gmra.mrb[8].mxu1 %vm8950_vm2, %v10106_v58 }
 0x4c2   : > { %7619 = vmatprep.mubr.msk.bf16.mxu1 %vm8950_vm2, %v10128_v27  ;;  %7648 = vmatpush3.bf16.msra.mxu1 %v8494_v46 }
 0x4c3   : > { %7649 = vmatprep.subr.bf16.mxu1 %v8495_v48 }
 0x4c6   : > { %7650 = vmatpush3.bf16.msra.mxu1 %v8495_v48 }
 0x4c7   : > { %7651 = vmatprep.subr.bf16.mxu1 %v8496_v60 }
 0x4c9   : > { %7620 = vmatmul.mubr.msk.bf16.gmra.mrb[12].mxu1 %vm8950_vm2, %v10172_v62 }
 0x4ca   : > { %7623 = vmatprep.mubr.msk.bf16.mxu1 %vm8950_vm2, %v10195_v21  ;;  %7652 = vmatpush3.bf16.msra.mxu1 %v8496_v60  ;;  %v8521_v60 = vld [vmem:[%s8934_s21 + $0x28] sm:$0xff] }
 0x4cb   : > { %7653 = vmatprep.subr.bf16.mxu1 %v8497_v53 }
 0x4ce   : > { %7654 = vmatpush3.bf16.msra.mxu1 %v8497_v53 }
 0x4cf   : > { %7687 = vmatprep.subr.bf16.mxu1 %v8498_v51 }
 0x4d1   : > { %7624 = vmatmul.mubr.msk.bf16.gmra.mrb[16].mxu1 %vm8950_vm2, %v10225_v39 }
 0x4d2   : > { %7627 = vmatprep.mubr.msk.bf16.mxu1 %vm8950_vm2, %v10227_v55 }
 0x4d9   : > { %7628 = vmatmul.mubr.msk.bf16.gmra.mrb[20].mxu1 %vm8950_vm2, %v10241_v30 }
 0x4da   : > { %7631 = vmatprep.mubr.msk.bf16.mxu1 %vm8950_vm2, %v10243_v12 }
 0x4e1   : > { %7632 = vmatmul.mubr.msk.bf16.gmra.mrb[24].mxu1 %vm8950_vm2, %v10254_v56 }
 0x4e2   : > { %7635 = vmatprep.mubr.msk.bf16.mxu1 %vm8950_vm2, %v10263_v20 }
 0x4e9   : > { %7636 = vmatmul.mubr.msk.bf16.gmra.mrb[28].mxu1 %vm8950_vm2, %v10275_v14 }
 0x4ea   : > { %7655 = vmatprep.mubr.msk.bf16.mxu1 %vm9139_vm5, %v9810_v24  ;;  %v8502_v24 = vld [vmem:[#allocation7 + $0x1e0] sm:$0xff]  }
 0x4f1   : > { %7656 = vmatmul.mubr.msk.bf16.vlgmr.msra.gmra.mrb[0].mxu1 %vm9139_vm5, %v9864_v15  ;;  %v8503_v15 = vld [vmem:[#allocation7 + $0x1e8] sm:$0xff]  }
 0x4f2   : > { %7659 = vmatprep.mubr.msk.bf16.mxu1 %vm9139_vm5, %v9889_v42  ;;  %7688 = vmatpush3.bf16.msra.mxu1 %v8498_v51  ;;  %v8504_v42 = vld [vmem:[#allocation7 + $0x1f0] sm:$0xff]  }
 0x4f3   : > { %7689 = vmatprep.subr.bf16.mxu1 %v8499_v10 }
 0x4f6   : > { %7690 = vmatpush3.bf16.msra.mxu1 %v8499_v10 }
 0x4f7   : > { %7691 = vmatprep.subr.bf16.mxu1 %v8500_v6 }
 0x4f9   : > { %7660 = vmatmul.mubr.msk.bf16.gmra.mrb[4].mxu1 %vm9139_vm5, %v9902_v43  ;;  %v8505_v43 = vld [vmem:[#allocation7 + $0x1f8] sm:$0xff]  }
 0x4fa   : > { %7663 = vmatprep.mubr.msk.bf16.mxu1 %vm9139_vm5, %v9909_v2  ;;  %7692 = vmatpush3.bf16.msra.mxu1 %v8500_v6  ;;  %v8506_v2 = vld [vmem:[#allocation7 + $0x200] sm:$0xff]  }
 0x4fb   : > { %7693 = vmatprep.subr.bf16.mxu1 %v8501_v57 }
 0x4fe   : > { %7694 = vmatpush3.bf16.msra.mxu1 %v8501_v57 }
 0x4ff   : > { %7695 = vmatprep.subr.bf16.mxu1 %v8502_v24 }
 0x501   : > { %7664 = vmatmul.mubr.msk.bf16.gmra.mrb[8].mxu1 %vm9139_vm5, %v9964_v50  ;;  %v8513_v50 = vld [vmem:[#allocation7 + $0x238] sm:$0xff]  }
 0x502   : > { %7667 = vmatprep.mubr.msk.bf16.mxu1 %vm9139_vm5, %v9966_v19  ;;  %7696 = vmatpush3.bf16.msra.mxu1 %v8502_v24  ;;  %v10597_v19 = vld [vmem:[%s10788_s6] ss:$0 sm:$0xff] }
 0x503   : > { %7697 = vmatprep.subr.bf16.mxu1 %v8503_v15 }
 0x506   : > { %7698 = vmatpush3.bf16.msra.mxu1 %v8503_v15 }
 0x507   : > { %7699 = vmatprep.subr.bf16.mxu1 %v8504_v42 }
 0x509   : > { %7668 = vmatmul.mubr.msk.bf16.gmra.mrb[12].mxu1 %vm9139_vm5, %v10033_v29  ;;  %v8507_v29 = vld [vmem:[#allocation7 + $0x208] sm:$0xff]  }
 0x50a   : > { %7671 = vmatprep.mubr.msk.bf16.mxu1 %vm9139_vm5, %v10035_v36  ;;  %7700 = vmatpush3.bf16.msra.mxu1 %v8504_v42  ;;  %v8509_v36 = vld [vmem:[#allocation7 + $0x218] sm:$0xff]  }
 0x50b   : > { %7701 = vmatprep.subr.bf16.mxu1 %v8505_v43 }
 0x50e   : > { %7702 = vmatpush3.bf16.msra.mxu1 %v8505_v43 }
 0x50f   : > { %7735 = vmatprep.subr.bf16.mxu1 %v8506_v2 }
 0x511   : > { %7672 = vmatmul.mubr.msk.bf16.gmra.mrb[16].mxu1 %vm9139_vm5, %v10099_v41 }
 0x512   : > { %7675 = vmatprep.mubr.msk.bf16.mxu1 %vm9139_vm5, %v10101_v4 }
 0x519   : > { %7676 = vmatmul.mubr.msk.bf16.gmra.mrb[20].mxu1 %vm9139_vm5, %v10154_v35  ;;  %v8514_v35 = vld [vmem:[%s8934_s21 + $0x10] sm:$0xff] }
 0x51a   : > { %7679 = vmatprep.mubr.msk.bf16.mxu1 %vm9139_vm5, %v10156_v44  ;;  %v8508_v44 = vld [vmem:[#allocation7 + $0x210] sm:$0xff]  }
 0x521   : > { %7680 = vmatmul.mubr.msk.bf16.gmra.mrb[24].mxu1 %vm9139_vm5, %v10229_v40 }
 0x522   : > { %7683 = vmatprep.mubr.msk.bf16.mxu1 %vm9139_vm5, %v10271_v31 }
 0x529   : > { %7684 = vmatmul.mubr.bf16.gmra.mrb[28].mxu1 %v10879_v33 }
 0x52a   : > { %7703 = vmatprep.mubr.bf16.mxu1 %v9780_v5  ;;  %v8511_v5 = vld [vmem:[#allocation7 + $0x228] sm:$0xff]  }
 0x531   : > { %7704 = vmatmul.mubr.bf16.vlgmr.msra.gmra.mrb[0].mxu1 %v9848_v0  ;;  %v8512_v0 = vld [vmem:[#allocation7 + $0x230] sm:$0xff]  }
 0x532   : > { %7707 = vmatprep.mubr.bf16.mxu1 %v10929_v25  ;;  %7736 = vmatpush3.bf16.msra.mxu1 %v8506_v2 }
 0x533   : > { %7737 = vmatprep.subr.bf16.mxu1 %v8507_v29 }
 0x536   : > { %7738 = vmatpush3.bf16.msra.mxu1 %v8507_v29 }
 0x537   : > { %7739 = vmatprep.subr.bf16.mxu1 %v8508_v44 }
 0x539   : > { %7708 = vmatmul.mubr.bf16.gmra.mrb[4].mxu1 %v10930_v3 }
 0x53a   : > { %7711 = vmatprep.mubr.bf16.mxu1 %v10931_v7  ;;  %7740 = vmatpush3.bf16.msra.mxu1 %v8508_v44 }
 0x53b   : > { %7741 = vmatprep.subr.bf16.mxu1 %v8509_v36 }
 0x53e   : > { %7742 = vmatpush3.bf16.msra.mxu1 %v8509_v36 }
 0x53f   : > { %7743 = vmatprep.subr.bf16.mxu1 %v8510_v49 }
 0x541   : > { %7712 = vmatmul.mubr.bf16.gmra.mrb[8].mxu1 %v10932_v16 }
 0x542   : > { %7715 = vmatprep.mubr.bf16.mxu1 %v10933_v23  ;;  %7744 = vmatpush3.bf16.msra.mxu1 %v8510_v49  ;;  %v8522_v49 = vld [vmem:[%s8934_s21 + $0x50] sm:$0xff] }
 0x543   : > { %7745 = vmatprep.subr.bf16.mxu1 %v8511_v5 }
 0x546   : > { %7746 = vmatpush3.bf16.msra.mxu1 %v8511_v5 }
 0x547   : > { %7747 = vmatprep.subr.bf16.mxu1 %v8512_v0 }
 0x549   : > { %7716 = vmatmul.mubr.bf16.gmra.mrb[12].mxu1 %v10934_v61 }
 0x54a   : > { %7719 = vmatprep.mubr.bf16.mxu1 %v10935_v37  ;;  %7748 = vmatpush3.bf16.msra.mxu1 %v8512_v0  ;;  %v8518_v37 = vld [vmem:[%s8934_s21 + $0x30] sm:$0xff] }
 0x54b   : > { %7749 = vmatprep.subr.bf16.mxu1 %v8513_v50 }
 0x54e   : > { %7750 = vmatpush3.bf16.msra.mxu1 %v8513_v50  ;;  %v8523_v50 = vld [vmem:[%s8934_s21 + $0x40] sm:$0xff] }
 0x551   : > { %7720 = vmatmul.mubr.bf16.gmra.mrb[16].mxu1 %v10936_v13 }
 0x552   : > { %7723 = vmatprep.mubr.bf16.mxu1 %v10937_v22 }
 0x559   : > { %7724 = vmatmul.mubr.bf16.gmra.mrb[20].mxu1 %v10938_v17  ;;  %v8519_v17 = vld [vmem:[%s8934_s21 + $0x20] sm:$0xff] }
 0x55a   : > { %7727 = vmatprep.mubr.bf16.mxu1 %v10939_v26 }
 0x561   : > { %7728 = vmatmul.mubr.bf16.gmra.mrb[24].mxu1 %v10193_v59 }
 0x562   : > { %7731 = vmatprep.mubr.bf16.mxu1 %v10267_v18  ;;  %v8517_v18 = vld [vmem:[%s8934_s21 + $0x8] sm:$0xff] }
 0x569   : > { %7732 = vmatmul.mubr.bf16.gmra.mrb[28].mxu1 %v10879_v33 }
 0x56a   : > { %7751 = vmatprep.mubr.msk.bf16.mxu1 %vm8950_vm2, %v9821_v38  ;;  %v10592_v38 = vld [vmem:[%s10787_s5] ss:$0 sm:$0xff] }
 0x571   : > { %7752 = vmatmul.mubr.msk.bf16.vlgmr.msra.gmra.mrb[0].mxu1 %vm8950_vm2, %v9933_v63 }
 0x572   : > { %7755 = vmatprep.mubr.msk.bf16.mxu1 %vm8950_vm2, %v9990_v34 }
 0x579   : > { %7756 = vmatmul.mubr.msk.bf16.gmra.mrb[4].mxu1 %vm8950_vm2, %v10057_v1 }
 0x57a   : > { %7759 = vmatprep.mubr.msk.bf16.mxu1 %vm8950_vm2, %v10106_v58 }
 0x581   : > { %7760 = vmatmul.mubr.msk.bf16.gmra.mrb[8].mxu1 %vm8950_vm2, %v10128_v27 }
 0x582   : > { %7763 = vmatprep.mubr.msk.bf16.mxu1 %vm8950_vm2, %v10172_v62 }
 0x589   : > { %7764 = vmatmul.mubr.msk.bf16.gmra.mrb[12].mxu1 %vm8950_vm2, %v10195_v21 }
 0x58a   : > { %7767 = vmatprep.mubr.msk.bf16.mxu1 %vm8950_vm2, %v10225_v39  ;;  %v8515_v39 = vld [vmem:[%s8934_s21] sm:$0xff] }
 0x591   : > { %7768 = vmatmul.mubr.msk.bf16.gmra.mrb[16].mxu1 %vm8950_vm2, %v10227_v55 }
 0x592   : > { %7771 = vmatprep.mubr.msk.bf16.mxu1 %vm8950_vm2, %v10241_v30 }
 0x599   : > { %7772 = vmatmul.mubr.msk.bf16.gmra.mrb[20].mxu1 %vm8950_vm2, %v10243_v12  ;;  %v8516_v12 = vld [vmem:[%s8934_s21 + $0x18] sm:$0xff] }
 0x59a   : > { %7775 = vmatprep.mubr.msk.bf16.mxu1 %vm8950_vm2, %v10254_v56 }
 0x5a1   : > { %7776 = vmatmul.mubr.msk.bf16.gmra.mrb[24].mxu1 %vm8950_vm2, %v10263_v20 }
 0x5a2   : > { %7779 = vmatprep.mubr.msk.bf16.mxu1 %vm8950_vm2, %v10275_v14 }
 0x5a9   : > { %7780 = vmatmul.mubr.bf16.gmra.mrb[28].mxu1 %v10879_v33 }
 0x644   : > { %v7753_v63 = vpop.f32.mrb[0].mxu1 }
 0x645   : > { %v5496_v34 = vmul.f32 %v7753_v63, %v10592_v38  ;;  %v5328_v41 = vpop.f32.mrb[1].mxu1 }
 0x646   : > { %v5494_v8 = vmul.f32 %v10592_v38, %v5328_v41  ;;  %v7754_v4 = vpop.f32.mrb[2].mxu1 }
 0x647   : > { %v5535_v33 = vadd.f32 %v10597_v19, %v5496_v34  ;;  %v5497_v1 = vmul.f32 %v7754_v4, %v10592_v38  ;;  %v5331_v59 = vpop.f32.mrb[3].mxu1 }
 0x648   : > { %v5533_v58 = vadd.f32 %v10597_v19, %v5494_v8  ;;  %v5495_v27 = vmul.f32 %v10592_v38, %v5331_v59  ;;  %v8524_v8 = vld [vmem:[%s8934_s21 + $0x58] sm:$0xff] }
 0x649   : > { %v5567_v62 = vadd.f32 %v8514_v35, %v5535_v33  ;;  %v5536_v21 = vadd.f32 %v10597_v19, %v5497_v1  ;;  %v8525_v1 = vld [vmem:[%s8934_s21 + $0x48] sm:$0xff] }
 0x64a   : > { %v5565_v55 = vadd.f32 %v8515_v39, %v5533_v58  ;;  %v5534_v40 = vadd.f32 %v10597_v19, %v5495_v27 }
 0x64b   : > { %v5599_v30 = vmax.f32 %v5567_v62, 0.0  ;;  %v5568_v56 = vadd.f32 %v8516_v12, %v5536_v21 }
 0x64c   : > { %v5597_v20 = vmax.f32 %v5565_v55, 0.0  ;;  %v5566_v31 = vadd.f32 %v8517_v18, %v5534_v40  ;;  %v7757_v14 = vpop.f32.mrb[4].mxu1  ;;  %v8526_v18 = vld [vmem:[%s8934_s21 + $0x70] sm:$0xff] }
 0x64d   : > { %5631 = vst [vmem:[%s10613_s12 + $0x10] sm:$0xff] %v5599_v30  ;;  %v5600_v25 = vmax.f32 %v5568_v56, 0.0  ;;  %v5500_v3 = vmul.f32 %v7757_v14, %v10592_v38  ;;  %v5344_v54 = vpop.f32.mrb[5].mxu1 }
 0x64e   : > { %5629 = vst [vmem:[%s10613_s12] sm:$0xff] %v5597_v20  ;;  %v5598_v9 = vmax.f32 %v5566_v31, 0.0  ;;  %v5498_v7 = vmul.f32 %v10592_v38, %v5344_v54  ;;  %v7758_v16 = vpop.f32.mrb[6].mxu1 }
 0x64f   : > { %5632 = vst [vmem:[%s10613_s12 + $0x18] sm:$0xff] %v5600_v25  ;;  %v5539_v45 = vadd.f32 %v10597_v19, %v5500_v3  ;;  %v5501_v52 = vmul.f32 %v7758_v16, %v10592_v38  ;;  %v5347_v23 = vpop.f32.mrb[7].mxu1  ;;  %v8527_v25 = vld [vmem:[%s8934_s21 + $0x60] sm:$0xff] }
 0x650   : > { %5630 = vst [vmem:[%s10613_s12 + $0x8] sm:$0xff] %v5598_v9  ;;  %v5537_v61 = vadd.f32 %v10597_v19, %v5498_v7  ;;  %v5499_v32 = vmul.f32 %v10592_v38, %v5347_v23  ;;  %v8528_v7 = vld [vmem:[%s8934_s21 + $0x78] sm:$0xff] }
 0x651   : > { %v5571_v13 = vadd.f32 %v8518_v37, %v5539_v45  ;;  %v5540_v22 = vadd.f32 %v10597_v19, %v5501_v52  ;;  %v8529_v52 = vld [vmem:[%s8934_s21 + $0x68] sm:$0xff] }
 0x652   : > { %v5569_v26 = vadd.f32 %v8519_v17, %v5537_v61  ;;  %v5538_v11 = vadd.f32 %v10597_v19, %v5499_v32 }
 0x653   : > { %v5603_v47 = vmax.f32 %v5571_v13, 0.0  ;;  %v5572_v46 = vadd.f32 %v8520_v28, %v5540_v22 }
 0x654   : > { %v5601_v48 = vmax.f32 %v5569_v26, 0.0  ;;  %v5570_v53 = vadd.f32 %v8521_v60, %v5538_v11  ;;  %v7761_v51 = vpop.f32.mrb[8].mxu1  ;;  %v8530_v60 = vld [vmem:[%s8934_s21 + $0x90] sm:$0xff] }
 0x655   : > { %5635 = vst [vmem:[%s10613_s12 + $0x30] sm:$0xff] %v5603_v47  ;;  %v5604_v10 = vmax.f32 %v5572_v46, 0.0  ;;  %v5504_v6 = vmul.f32 %v7761_v51, %v10592_v38  ;;  %v5360_v57 = vpop.f32.mrb[9].mxu1 }
 0x656   : > { %5633 = vst [vmem:[%s10613_s12 + $0x20] sm:$0xff] %v5601_v48  ;;  %v5602_v24 = vmax.f32 %v5570_v53, 0.0  ;;  %v5502_v15 = vmul.f32 %v10592_v38, %v5360_v57  ;;  %v7762_v42 = vpop.f32.mrb[10].mxu1 }
 0x657   : > { %5636 = vst [vmem:[%s10613_s12 + $0x38] sm:$0xff] %v5604_v10  ;;  %v5543_v43 = vadd.f32 %v10597_v19, %v5504_v6  ;;  %v5505_v2 = vmul.f32 %v7762_v42, %v10592_v38  ;;  %v5363_v29 = vpop.f32.mrb[11].mxu1  ;;  %v8531_v10 = vld [vmem:[%s8934_s21 + $0x80] sm:$0xff] }
 0x658   : > { %5634 = vst [vmem:[%s10613_s12 + $0x28] sm:$0xff] %v5602_v24  ;;  %v5541_v44 = vadd.f32 %v10597_v19, %v5502_v15  ;;  %v5503_v36 = vmul.f32 %v10592_v38, %v5363_v29  ;;  %v8532_v15 = vld [vmem:[%s8934_s21 + $0x98] sm:$0xff] }
 0x659   : > { %v5575_v5 = vadd.f32 %v8522_v49, %v5543_v43  ;;  %v5544_v0 = vadd.f32 %v10597_v19, %v5505_v2  ;;  %v8533_v2 = vld [vmem:[%s8934_s21 + $0x88] sm:$0xff] }
 0x65a   : > { %v5573_v63 = vadd.f32 %v8523_v50, %v5541_v44  ;;  %v5542_v34 = vadd.f32 %v10597_v19, %v5503_v36 }
 0x65b   : > { %v5607_v41 = vmax.f32 %v5575_v5, 0.0  ;;  %v5576_v4 = vadd.f32 %v8524_v8, %v5544_v0 }
 0x65c   : > { %v5605_v33 = vmax.f32 %v5573_v63, 0.0  ;;  %v5574_v59 = vadd.f32 %v8525_v1, %v5542_v34  ;;  %v7765_v58 = vpop.f32.mrb[12].mxu1  ;;  %v8534_v1 = vld [vmem:[%s8934_s21 + $0xb0] sm:$0xff] }
 0x65d   : > { %5639 = vst [vmem:[%s10613_s12 + $0x50] sm:$0xff] %v5607_v41  ;;  %v5608_v27 = vmax.f32 %v5576_v4, 0.0  ;;  %v5508_v35 = vmul.f32 %v7765_v58, %v10592_v38  ;;  %v5376_v62 = vpop.f32.mrb[13].mxu1 }
 0x65e   : > { %5637 = vst [vmem:[%s10613_s12 + $0x40] sm:$0xff] %v5605_v33  ;;  %v5606_v21 = vmax.f32 %v5574_v59, 0.0  ;;  %v5506_v39 = vmul.f32 %v10592_v38, %v5376_v62  ;;  %v7766_v55 = vpop.f32.mrb[14].mxu1 }
 0x65f   : > { %5640 = vst [vmem:[%s10613_s12 + $0x58] sm:$0xff] %v5608_v27  ;;  %v5547_v40 = vadd.f32 %v10597_v19, %v5508_v35  ;;  %v5509_v30 = vmul.f32 %v7766_v55, %v10592_v38  ;;  %v5379_v12 = vpop.f32.mrb[15].mxu1  ;;  %v8535_v27 = vld [vmem:[%s8934_s21 + $0xa0] sm:$0xff] }
 0x660   : > { %5638 = vst [vmem:[%s10613_s12 + $0x48] sm:$0xff] %v5606_v21  ;;  %v5545_v56 = vadd.f32 %v10597_v19, %v5506_v39  ;;  %v5507_v20 = vmul.f32 %v10592_v38, %v5379_v12  ;;  %v8536_v39 = vld [vmem:[%s8934_s21 + $0xb8] sm:$0xff] }
 0x661   : > { %v5579_v31 = vadd.f32 %v8526_v18, %v5547_v40  ;;  %v5548_v14 = vadd.f32 %v10597_v19, %v5509_v30  ;;  %v8537_v30 = vld [vmem:[%s8934_s21 + $0xa8] sm:$0xff] }
 0x662   : > { %v5577_v3 = vadd.f32 %v8527_v25, %v5545_v56  ;;  %v5546_v54 = vadd.f32 %v10597_v19, %v5507_v20 }
 0x663   : > { %v5611_v9 = vmax.f32 %v5579_v31, 0.0  ;;  %v5580_v16 = vadd.f32 %v8528_v7, %v5548_v14 }
 0x664   : > { %v5609_v45 = vmax.f32 %v5577_v3, 0.0  ;;  %v5578_v23 = vadd.f32 %v8529_v52, %v5546_v54  ;;  %v7769_v61 = vpop.f32.mrb[16].mxu1  ;;  %v8538_v52 = vld [vmem:[%s8934_s21 + $0xd0] sm:$0xff] }
 0x665   : > { %5643 = vst [vmem:[%s10613_s12 + $0x70] sm:$0xff] %v5611_v9  ;;  %v5612_v32 = vmax.f32 %v5580_v16, 0.0  ;;  %v5512_v37 = vmul.f32 %v7769_v61, %v10592_v38  ;;  %v5392_v13 = vpop.f32.mrb[17].mxu1 }
 0x666   : > { %5641 = vst [vmem:[%s10613_s12 + $0x60] sm:$0xff] %v5609_v45  ;;  %v5610_v22 = vmax.f32 %v5578_v23, 0.0  ;;  %v5510_v17 = vmul.f32 %v10592_v38, %v5392_v13  ;;  %v7770_v26 = vpop.f32.mrb[18].mxu1 }
 0x667   : > { %5644 = vst [vmem:[%s10613_s12 + $0x78] sm:$0xff] %v5612_v32  ;;  %v5551_v11 = vadd.f32 %v10597_v19, %v5512_v37  ;;  %v5513_v47 = vmul.f32 %v7770_v26, %v10592_v38  ;;  %v5395_v28 = vpop.f32.mrb[19].mxu1  ;;  %v8539_v32 = vld [vmem:[%s8934_s21 + $0xc0] sm:$0xff] }
 0x668   : > { %5642 = vst [vmem:[%s10613_s12 + $0x68] sm:$0xff] %v5610_v22  ;;  %v5549_v46 = vadd.f32 %v10597_v19, %v5510_v17  ;;  %v5511_v48 = vmul.f32 %v10592_v38, %v5395_v28  ;;  %v8540_v17 = vld [vmem:[%s8934_s21 + $0xd8] sm:$0xff] }
 0x669   : > { %v5583_v53 = vadd.f32 %v8530_v60, %v5551_v11  ;;  %v5552_v51 = vadd.f32 %v10597_v19, %v5513_v47  ;;  %v8541_v47 = vld [vmem:[%s8934_s21 + $0xc8] sm:$0xff] }
 0x66a   : > { %v5581_v6 = vadd.f32 %v8531_v10, %v5549_v46  ;;  %v5550_v57 = vadd.f32 %v10597_v19, %v5511_v48 }
 0x66b   : > { %v5615_v24 = vmax.f32 %v5583_v53, 0.0  ;;  %v5584_v42 = vadd.f32 %v8532_v15, %v5552_v51 }
 0x66c   : > { %v5613_v43 = vmax.f32 %v5581_v6, 0.0  ;;  %v5582_v29 = vadd.f32 %v8533_v2, %v5550_v57  ;;  %v7773_v44 = vpop.f32.mrb[20].mxu1  ;;  %v8542_v2 = vld [vmem:[%s8934_s21 + $0xf0] sm:$0xff] }
 0x66d   : > { %5647 = vst [vmem:[%s10613_s12 + $0x90] sm:$0xff] %v5615_v24  ;;  %v5616_v36 = vmax.f32 %v5584_v42, 0.0  ;;  %v5516_v49 = vmul.f32 %v7773_v44, %v10592_v38  ;;  %v5408_v5 = vpop.f32.mrb[21].mxu1 }
 0x66e   : > { %5645 = vst [vmem:[%s10613_s12 + $0x80] sm:$0xff] %v5613_v43  ;;  %v5614_v0 = vmax.f32 %v5582_v29, 0.0  ;;  %v5514_v50 = vmul.f32 %v10592_v38, %v5408_v5  ;;  %v7774_v63 = vpop.f32.mrb[22].mxu1 }
 0x66f   : > { %5648 = vst [vmem:[%s10613_s12 + $0x98] sm:$0xff] %v5616_v36  ;;  %v5555_v34 = vadd.f32 %v10597_v19, %v5516_v49  ;;  %v5517_v41 = vmul.f32 %v7774_v63, %v10592_v38  ;;  %v5411_v8 = vpop.f32.mrb[23].mxu1  ;;  %v8543_v36 = vld [vmem:[%s8934_s21 + $0xe0] sm:$0xff] }
 0x670   : > { %5646 = vst [vmem:[%s10613_s12 + $0x88] sm:$0xff] %v5614_v0  ;;  %v5553_v4 = vadd.f32 %v10597_v19, %v5514_v50  ;;  %v5515_v33 = vmul.f32 %v10592_v38, %v5411_v8  ;;  %v8544_v50 = vld [vmem:[%s8934_s21 + $0xf8] sm:$0xff] }
 0x671   : > { %v5587_v59 = vadd.f32 %v8534_v1, %v5555_v34  ;;  %v5556_v58 = vadd.f32 %v10597_v19, %v5517_v41 }
 0x672   : > { %v5585_v35 = vadd.f32 %v8535_v27, %v5553_v4  ;;  %v5554_v62 = vadd.f32 %v10597_v19, %v5515_v33 }
 0x673   : > { %v5619_v21 = vmax.f32 %v5587_v59, 0.0  ;;  %v5588_v55 = vadd.f32 %v8536_v39, %v5556_v58 }
 0x674   : > { %v5617_v40 = vmax.f32 %v5585_v35, 0.0  ;;  %v5586_v12 = vadd.f32 %v8537_v30, %v5554_v62  ;;  %v7777_v56 = vpop.f32.mrb[24].mxu1 }
 0x675   : > { %5651 = vst [vmem:[%s10613_s12 + $0xb0] sm:$0xff] %v5619_v21  ;;  %v5620_v20 = vmax.f32 %v5588_v55, 0.0  ;;  %v5520_v18 = vmul.f32 %v7777_v56, %v10592_v38  ;;  %v5424_v31 = vpop.f32.mrb[25].mxu1 }
 0x676   : > { %5649 = vst [vmem:[%s10613_s12 + $0xa0] sm:$0xff] %v5617_v40  ;;  %v5618_v14 = vmax.f32 %v5586_v12, 0.0  ;;  %v5518_v25 = vmul.f32 %v10592_v38, %v5424_v31  ;;  %v7778_v3 = vpop.f32.mrb[26].mxu1 }
 0x677   : > { %5652 = vst [vmem:[%s10613_s12 + $0xb8] sm:$0xff] %v5620_v20  ;;  %v5559_v54 = vadd.f32 %v10597_v19, %v5520_v18  ;;  %v5521_v9 = vmul.f32 %v7778_v3, %v10592_v38  ;;  %v5427_v7 = vpop.f32.mrb[27].mxu1 }
 0x678   : > { %5650 = vst [vmem:[%s10613_s12 + $0xa8] sm:$0xff] %v5618_v14  ;;  %v5557_v16 = vadd.f32 %v10597_v19, %v5518_v25  ;;  %v5519_v45 = vmul.f32 %v10592_v38, %v5427_v7 }
 0x679   : > { %v5591_v23 = vadd.f32 %v8538_v52, %v5559_v54  ;;  %v5560_v61 = vadd.f32 %v10597_v19, %v5521_v9 }
 0x67a   : > { %v5589_v37 = vadd.f32 %v8539_v32, %v5557_v16  ;;  %v5558_v13 = vadd.f32 %v10597_v19, %v5519_v45 }
 0x67b   : > { %v5623_v22 = vmax.f32 %v5591_v23, 0.0  ;;  %v5592_v26 = vadd.f32 %v8540_v17, %v5560_v61 }
 0x67c   : > { %v5621_v11 = vmax.f32 %v5589_v37, 0.0  ;;  %v5590_v28 = vadd.f32 %v8541_v47, %v5558_v13  ;;  %v7781_v46 = vpop.f32.mrb[28].mxu1 }
 0x67d   : > { %5655 = vst [vmem:[%s10613_s12 + $0xd0] sm:$0xff] %v5623_v22  ;;  %v5624_v48 = vmax.f32 %v5592_v26, 0.0  ;;  %v5524_v60 = vmul.f32 %v7781_v46, %v10592_v38  ;;  %v5440_v53 = vpop.f32.mrb[29].mxu1 }
 0x67e   : > { %5653 = vst [vmem:[%s10613_s12 + $0xc0] sm:$0xff] %v5621_v11  ;;  %v5622_v51 = vmax.f32 %v5590_v28, 0.0  ;;  %v5522_v10 = vmul.f32 %v10592_v38, %v5440_v53  ;;  %v7782_v6 = vpop.f32.mrb[30].mxu1 }
 0x67f   : > { %5656 = vst [vmem:[%s10613_s12 + $0xd8] sm:$0xff] %v5624_v48  ;;  %v5563_v57 = vadd.f32 %v10597_v19, %v5524_v60  ;;  %v5525_v24 = vmul.f32 %v7782_v6, %v10592_v38  ;;  %v5443_v15 = vpop.f32.mrb[31].mxu1 }
 0x680   : > { %5654 = vst [vmem:[%s10613_s12 + $0xc8] sm:$0xff] %v5622_v51  ;;  %v5561_v42 = vadd.f32 %v10597_v19, %v5522_v10  ;;  %v5523_v43 = vmul.f32 %v10592_v38, %v5443_v15  ;;  %v8545_v38 = vld [vmem:[%s8934_s21 + $0xe8] sm:$0xff]  ;;  %s8713_s21 = smov [#allocation8]  }
 0x681   : > { %v5595_v29 = vadd.f32 %v8542_v2, %v5563_v57  ;;  %v5564_v44 = vadd.f32 %v10597_v19, %v5525_v24  ;;  %s8636_s11 = sshll.u32 %s8713_s21, 4  ;;  %s8637_s11 = int_to_ptr.vmem [resolvable:$false] %s8636_s11 }
 0x682   : > { %v5593_v49 = vadd.f32 %v8543_v36, %v5561_v42  ;;  %v5562_v5 = vadd.f32 %v10597_v19, %v5523_v43  ;;  %s8638_s22 = scalar_lea.vmem %s8637_s11, 8192  ;;  %p8639_p7 = scmp.lt.s32.totalorder %s10735_s29, %s8637_s11 }
 0x683   : > { %v5627_v0 = vmax.f32 %v5595_v29, 0.0  ;;  %v5596_v63 = vadd.f32 %v8544_v50, %v5564_v44  ;;  %p8640_p9 = scmp.lt.s32.totalorder %s8638_s22, %s8632_s20 }
 0x684   : > { %v5625_v34 = vmax.f32 %v5593_v49, 0.0  ;;  %v5594_v41 = vadd.f32 %v8545_v38, %v5562_v5 }
 0x685   : > { %5659 = vst [vmem:[%s10613_s12 + $0xf0] sm:$0xff] %v5627_v0  ;;  %v5628_v8 = vmax.f32 %v5596_v63, 0.0  ;;  %p8641_p12 = por %p8640_p9, %p8639_p7 }
 0x686   : > { %5657 = vst [vmem:[%s10613_s12 + $0xe0] sm:$0xff] %v5625_v34  ;;  %v5626_v19 = vmax.f32 %v5594_v41, 0.0 }
 0x687   : > { %5660 = vst [vmem:[%s10613_s12 + $0xf8] sm:$0xff] %v5628_v8  ;;  %p8642_p2 = pnand %p8641_p12, %p8635_p3 }
 0x688   : > { %5658 = vst [vmem:[%s10613_s12 + $0xe8] sm:$0xff] %v5626_v19 }
 0x689   : > { %8645 = shalt.err (!%p8642_p2)
}
 0x68a   : > { %s8646_s10 = scalar_lea.hbm %s10733_s9, 4096  ;;  %s8650_s12 = scalar_lea.hbm %s10789_s7, 8192 }
 0x68b   : > { %p8647_p13 = scmp.ne.s32.totalorder %s10733_s9, %s8646_s10  ;;  %p8651_p4 = scmp.lt.u32.totalorder %s10733_s9, %s10789_s7 }
 0x68c   : > { %p8652_p5 = scmp.lt.u32.totalorder %s8650_s12, %s8646_s10  ;;  %p8654_p11 = scmp.lt.u32.totalorder %s8646_s10, %s10733_s9 }
 0x68d   : > { %p8648_p6 = pnand %p8647_p13, %p10940_p0 }
 0x68e   : > { %p8653_p8 = por %p8652_p5, %p8651_p4 }
 0x68f   : > { %p8649_p10 = pneg %p8648_p6 }
 0x690   : > { %p8655_p1 = por %p8654_p11, %p8653_p8 }
 0x692   : > { %p8656_p3 = pnand %p8655_p1, %p8649_p10 }
 0x694   : > { %8659 = shalt.err (!%p8656_p3)
}
 0x695   : > { %s8714_s30 = smov 128   ;;  %s8715_s20 = smov 8  }
 0x696   : > { %8305 = dma.vmem_to_hbm [thread:$0]  (%p10940_p0), %s10735_s29, 4096, %s10733_s9, %s5662_s28, %s8714_s30, %s8714_s30, %s8715_s20  }
 0x697 PF: > { %s5690_s21 = sand.u32 1, %s8690_s24   ;;  %p10941_p7 = scmp.ne.s32.totalorder %s10838_s8, 0 }
 0x698   : > { %p10942_p9 = scmp.ge.s32.totalorder %s8702_s27, 2  ;;  %s5691_s11 = scalar_lea.sflag [#allocation4], %s5690_s21 }
 0x69a   : > { %p8319_p12 = pnand %p10942_p9, %p10941_p7 }
 0x69c   : > { %8685 = dma.done.wait (!%p8319_p12), %s5691_s11, 4096  }
 0x69d   : > { %8687 = vsyncadd (!%p8319_p12), %s5691_s11, 4294963200  ;;  %p21_p2 = scmp.ge.s32.totalorder %s8866_s13, 4   ;;  %s10943_s24 = smov %s8694_s25 }
 0x69e   : > { %s10944_s25 = smov %s8698_s26  ;;  %s10945_s26 = smov %s8882_s17 }
 0x69f   : > { %s10946_s27 = smov %s8866_s13  ;;  %23 = sbr.rel (!%p21_p2) target bundleno = 6 (0x6), region = 117 }
 0x6a6   :  { %5696 = vsyncpa [#allocation3], 1 }
 0x6a7   :  { %5698 = vsyncpa [#allocation3 + $0x1], 1 }
 0x6a8   :  { %5699 = vsyncpa [#allocation6], 1 }
 0x6a9   :  { %5700 = vsyncpa [#allocation4], 1 }
 0x6aa   :  { %5702 = vsyncpa [#allocation4 + $0x1], 1 }

</bundles_post_ra>
